<compile_context>
chip_gen: v7x
topology: tpu7x:2x2x1
jax: 0.10.0
libtpu: 0.0.40
codegen_flags: <defaults>
</compile_context>

<pallas_src>
import functools

import jax
import jax.numpy as jnp
import numpy as np
from jax.experimental import pallas as pl
from jax.experimental.pallas import tpu as pltpu

# ---- config (mirrors the PyTorch config fields the module reads) ----
D_HIDN = 32          # config.d_hidn
N_HEAD = 2           # config.n_head
D_HEAD = 16          # config.d_head
D_FF = 64            # config.d_ff
LN_EPS = 1e-6        # config.layer_norm_epsilon
NEG_INF = -1e9
_GELU_C = 0.7978845608028654  # sqrt(2/pi)

_HD = N_HEAD * D_HEAD                      # 32 (== D_HIDN; required by W_O packing)
_PREC = jax.lax.Precision.HIGHEST          # explicit, kernel-local precision choice

# Column offsets inside the packed (D_HIDN, _W_COLS) matrix slab.
_OFF_SA_QKV = 0
_OFF_SA_O = _OFF_SA_QKV + 3 * _HD          # 96
_OFF_CA_Q = _OFF_SA_O + D_HIDN             # 128
_OFF_CA_KV = _OFF_CA_Q + _HD               # 160
_OFF_CA_O = _OFF_CA_KV + 2 * _HD           # 224
_OFF_F1 = _OFF_CA_O + D_HIDN               # 256
_W_COLS = _OFF_F1 + D_FF                   # 320

# Row layout of the packed bias/LayerNorm vector slab (each row padded to 128 lanes).
_VW = 128
(_V_B_SA_QKV, _V_B_SA_O, _V_B_CA_Q, _V_B_CA_KV, _V_B_CA_O,
 _V_G1, _V_BE1, _V_G2, _V_BE2, _V_G3, _V_BE3, _V_B_F1, _V_B_F2) = range(13)
_NV = 13


# --------------------------- in-kernel helpers (traced) ----------------------
def _gelu_tanh(x):
    return 0.5 * x * (1.0 + jnp.tanh(_GELU_C * (x + 0.044715 * x * x * x)))


def _add_ln(x, res, g, b, eps):
    """(x + residual) then LayerNorm over the last dim."""
    y = x + res
    mean = jnp.mean(y, axis=-1, keepdims=True)
    yc = y - mean
    var = jnp.mean(yc * yc, axis=-1, keepdims=True)
    return yc * jax.lax.rsqrt(var + eps) * g + b


def _mm(a, b):
    return jnp.dot(a, b, preferred_element_type=jnp.float32, precision=_PREC)


def _attend(q, kv, w_o, b_o, mask, prob_ref, n_batch, sq, sk, n_head, d_head):
    """Per-head attention, batched over the folded batch dim.

    q:  (n_batch*sq, n_head*d_head)   -- 1/sqrt(d_head) already folded into W_Q
    kv: (n_batch*sk, 2*n_head*d_head) -- [K heads | V heads]
    w_o:(n_head*d_head, D), b_o:(1, D), mask:(n_batch, sq, sk) with 1.0 == masked.
    Writes probs (n_batch, n_head, sq, sk) to prob_ref; returns (n_batch*sq, D).
    """
    masked = mask > 0.5
    out = None
    for h in range(n_head):                       # static python loop (n_head=2)
        qh = q[:, h * d_head:(h + 1) * d_head].reshape(n_batch, sq, d_head)
        kh = kv[:, h * d_head:(h + 1) * d_head].reshape(n_batch, sk, d_head)
        vh = kv[:, (n_head + h) * d_head:(n_head + h + 1) * d_head].reshape(
            n_batch, sk, d_head)
        s = jnp.einsum('bqe,bke->bqk', qh, kh,
                       preferred_element_type=jnp.float32, precision=_PREC)
        s = jnp.where(masked, NEG_INF, s)         # == torch masked_fill_(-1e9)
        m = jnp.max(s, axis=-1, keepdims=True)
        e = jnp.exp(s - m)
        p = e * pl.reciprocal(jnp.sum(e, axis=-1, keepdims=True), approx=True)
        prob_ref[:, h:h + 1, :, :] = p[:, None]
        ctx = jnp.einsum('bqk,bke->bqe', p, vh,
                         preferred_element_type=jnp.float32, precision=_PREC)
        part = _mm(ctx.reshape(n_batch * sq, d_head),
                   w_o[h * d_head:(h + 1) * d_head, :])
        out = part if out is None else out + part
    return out + b_o


# --------------------------- fused decoder-layer kernel ----------------------
def _decoder_layer_kernel(dec_ref, enc_ref, smask_ref, cmask_ref,
                          w_a_ref, w_f2_ref, vec_ref,
                          out_ref, sprob_ref, cprob_ref,
                          *, n_head, d_head, eps):
    nb, sq, d = dec_ref.shape
    sk = enc_ref.shape[1]
    f = w_f2_ref.shape[0]
    hd = n_head * d_head

    def vec(row, width):
        return vec_ref[row:row + 1, 0:width]      # (1, width), static slice

    x0 = dec_ref[...].reshape(nb * sq, d)
    enc = enc_ref[...].reshape(nb * sk, d)

    # ---------------- self attention (fused QKV projection) ----------------
    qkv = _mm(x0, w_a_ref[:, _OFF_SA_QKV:_OFF_SA_QKV + 3 * hd]) + vec(_V_B_SA_QKV, 3 * hd)
    sa = _attend(qkv[:, :hd], qkv[:, hd:3 * hd],
                 w_a_ref[:, _OFF_SA_O:_OFF_SA_O + d], vec(_V_B_SA_O, d),
                 smask_ref[...], sprob_ref, nb, sq, sq, n_head, d_head)
    x1 = _add_ln(sa, x0, vec(_V_G1, d), vec(_V_BE1, d), eps)

    # ---------------- cross attention (fused KV projection) ----------------
    qc = _mm(x1, w_a_ref[:, _OFF_CA_Q:_OFF_CA_Q + hd]) + vec(_V_B_CA_Q, hd)
    kvc = _mm(enc, w_a_ref[:, _OFF_CA_KV:_OFF_CA_KV + 2 * hd]) + vec(_V_B_CA_KV, 2 * hd)
    ca = _attend(qc, kvc,
                 w_a_ref[:, _OFF_CA_O:_OFF_CA_O + d], vec(_V_B_CA_O, d),
                 cmask_ref[...], cprob_ref, nb, sq, sk, n_head, d_head)
    x2 = _add_ln(ca, x1, vec(_V_G2, d), vec(_V_BE2, d), eps)

    # ---------------- position-wise FFN (Conv1d k=1 == per-position matmul) -
    h = _mm(x2, w_a_ref[:, _OFF_F1:_OFF_F1 + f]) + vec(_V_B_F1, f)
    h = _gelu_tanh(h)
    ff = _mm(h, w_f2_ref[...]) + vec(_V_B_F2, d)
    x3 = _add_ln(ff, x2, vec(_V_G3, d), vec(_V_BE3, d), eps)
    out_ref[...] = x3.reshape(nb, sq, d).astype(out_ref.dtype)


# --------------------------- one-time weight packing --------------------------
def pack_params(params):
    """Hoisted out of the forward path: repack the parameter tree once into
    three TPU-friendly slabs (scale 1/sqrt(d_head) folded into the Q weights)."""
    assert _HD == D_HIDN, "W_O slab packing assumes n_head*d_head == d_hidn"
    scale = 1.0 / np.sqrt(D_HEAD)
    pa, pc, pf = params["self_attn"], params["cross_attn"], params["ffn"]

    w_slab = jnp.concatenate([
        pa["wq"] * scale, pa["wk"], pa["wv"],      # fused self-attn QKV (scaled Q)
        pa["wo"],
        pc["wq"] * scale,                          # cross-attn Q (scaled)
        pc["wk"], pc["wv"],                        # fused cross-attn KV
        pc["wo"],
        pf["w1"],
    ], axis=1).astype(jnp.float32)                 # (D_HIDN, 320)

    def row(v):
        return jnp.pad(v, ((0, 0), (0, _VW - v.shape[1])))

    vec_rows = [
        jnp.concatenate([pa["bq"] * scale, pa["bk"], pa["bv"]], axis=1),
        pa["bo"],
        pc["bq"] * scale,
        jnp.concatenate([pc["bk"], pc["bv"]], axis=1),
        pc["bo"],
        params["ln1"]["gamma"], params["ln1"]["beta"],
        params["ln2"]["gamma"], params["ln2"]["beta"],
        params["ln3"]["gamma"], params["ln3"]["beta"],
        pf["b1"], pf["b2"],
    ]
    vec_slab = jnp.concatenate([row(v) for v in vec_rows], axis=0).astype(jnp.float32)

    return dict(w_slab=w_slab, w_f2=pf["w2"].astype(jnp.float32), vec_slab=vec_slab)


# --------------------------- wrapper ------------------------------------------
def _full_spec(shape):
    zeros = (0,) * len(shape)
    return pl.BlockSpec(shape, lambda i, _z=zeros: _z)   # full slab, constant index


def decoder_layer(dec_inputs, enc_outputs, self_attn_mask, dec_enc_attn_mask,
                  packed, *, batch_block=None):
    """Fused decoder layer.  `packed` comes from pack_params() (computed once).

    batch_block=None -> whole batch in one grid step (best on 1-TC v5e/v6e).
    On v7x, pass batch_block=pl.cdiv(B, 2) so the "parallel" batch axis is
    sharded over the two TensorCores while keeping per-step work large.
    """
    B, Sq, D = dec_inputs.shape
    Sk = enc_outputs.shape[1]
    H, dh = N_HEAD, D_HEAD
    F = packed["w_f2"].shape[0]

    bb = B if batch_block is None else batch_block
    assert B % bb == 0, "batch_block must divide the batch size"
    grid = (B // bb,)

    kern = functools.partial(_decoder_layer_kernel, n_head=H, d_head=dh, eps=LN_EPS)

    in_specs = [
        pl.BlockSpec((bb, Sq, D), lambda i: (i, 0, 0)),
        pl.BlockSpec((bb, Sk, D), lambda i: (i, 0, 0)),
        pl.BlockSpec((bb, Sq, Sq), lambda i: (i, 0, 0)),
        pl.BlockSpec((bb, Sq, Sk), lambda i: (i, 0, 0)),
        _full_spec((D, _W_COLS)),
        _full_spec((F, D)),
        _full_spec((_NV, _VW)),
    ]
    out_specs = [
        pl.BlockSpec((bb, Sq, D), lambda i: (i, 0, 0)),
        pl.BlockSpec((bb, H, Sq, Sq), lambda i: (i, 0, 0, 0)),
        pl.BlockSpec((bb, H, Sq, Sk), lambda i: (i, 0, 0, 0)),
    ]
    out_shape = [
        jax.ShapeDtypeStruct((B, Sq, D), jnp.float32),
        jax.ShapeDtypeStruct((B, H, Sq, Sq), jnp.float32),
        jax.ShapeDtypeStruct((B, H, Sq, Sk), jnp.float32),
    ]

    out, sprob, cprob = pl.pallas_call(
        kern,
        grid=grid,
        in_specs=in_specs,
        out_specs=out_specs,
        out_shape=out_shape,
        compiler_params=pltpu.CompilerParams(dimension_semantics=("parallel",)),
    )(dec_inputs, enc_outputs, self_attn_mask, dec_enc_attn_mask,
      packed["w_slab"], packed["w_f2"], packed["vec_slab"])
    return out, sprob, cprob


# --------------------------- pure-JAX reference -------------------------------
def _ref_mha(xq, xkv, mask, p, n_head, d_head):
    B, Sq, _ = xq.shape
    Sk = xkv.shape[1]
    q = (xq @ p["wq"] + p["bq"]).reshape(B, Sq, n_head, d_head).transpose(0, 2, 1, 3)
    k = (xkv @ p["wk"] + p["bk"]).reshape(B, Sk, n_head, d_head).transpose(0, 2, 1, 3)
    v = (xkv @ p["wv"] + p["bv"]).reshape(B, Sk, n_head, d_head).transpose(0, 2, 1, 3)
    scores = jnp.einsum("bhqd,bhkd->bhqk", q, k) * (1.0 / np.sqrt(d_head))
    scores = jnp.where(mask[:, None] > 0.5, NEG_INF, scores)
    prob = jax.nn.softmax(scores, axis=-1)
    ctx = jnp.einsum("bhqk,bhkd->bhqd", prob, v)
    ctx = ctx.transpose(0, 2, 1, 3).reshape(B, Sq, n_head * d_head)
    return ctx @ p["wo"] + p["bo"], prob


def _ref_add_ln(x, res, p):
    y = x + res
    mean = jnp.mean(y, axis=-1, keepdims=True)
    var = jnp.mean((y - mean) ** 2, axis=-1, keepdims=True)
    return (y - mean) * jax.lax.rsqrt(var + LN_EPS) * p["gamma"] + p["beta"]


def _ref_ffn(x, p):
    h = x @ p["w1"] + p["b1"]
    h = _gelu_tanh(h)
    return h @ p["w2"] + p["b2"]


def _ref_decoder(dec_inputs, enc_outputs, self_mask, cross_mask, params):
    sa, sp = _ref_mha(dec_inputs, dec_inputs, self_mask, params["self_attn"], N_HEAD, D_HEAD)
    x1 = _ref_add_ln(sa, dec_inputs, params["ln1"])
    ca, cp = _ref_mha(x1, enc_outputs, cross_mask, params["cross_attn"], N_HEAD, D_HEAD)
    x2 = _ref_add_ln(ca, x1, params["ln2"])
    x3 = _ref_add_ln(_ref_ffn(x2, params["ffn"]), x2, params["ln3"])
    return x3, sp, cp


# --------------------------- params / main -------------------------------------
def init_params(key):
    HD = N_HEAD * D_HEAD
    counter = iter(range(10_000))

    def w(shape, scale=0.05):
        return scale * jax.random.normal(
            jax.random.fold_in(key, next(counter)), shape, jnp.float32)

    def attn_params():
        return dict(wq=w((D_HIDN, HD)), bq=w((1, HD)),
                    wk=w((D_HIDN, HD)), bk=w((1, HD)),
                    wv=w((D_HIDN, HD)), bv=w((1, HD)),
                    wo=w((HD, D_HIDN)), bo=w((1, D_HIDN)))

    def ln_params():
        return dict(gamma=1.0 + w((1, D_HIDN), 0.01), beta=w((1, D_HIDN), 0.01))

    return dict(
        self_attn=attn_params(),
        cross_attn=attn_params(),
        ln1=ln_params(), ln2=ln_params(), ln3=ln_params(),
        ffn=dict(w1=w((D_HIDN, D_FF)), b1=w((1, D_FF)),
                 w2=w((D_FF, D_HIDN)), b2=w((1, D_HIDN))),
    )


if __name__ == "__main__":
    key = jax.random.PRNGKey(0)
    kp, kd, ke = jax.random.split(key, 3)

    B, S_DEC, S_ENC = 2, 8, 16
    params = init_params(kp)
    packed = pack_params(params)            # one-time repack (hoisted off the fwd path)
    jax.block_until_ready(packed)

    dec_inputs = jax.random.normal(kd, (B, S_DEC, D_HIDN), jnp.float32)
    enc_outputs = jax.random.normal(ke, (B, S_ENC, D_HIDN), jnp.float32)

    # masks: 1.0 == masked (mirrors torch bool mask + masked_fill_(-1e9))
    causal = (jnp.arange(S_DEC)[None, :] > jnp.arange(S_DEC)[:, None]).astype(jnp.float32)
    self_attn_mask = jnp.broadcast_to(causal, (B, S_DEC, S_DEC))
    enc_pad = jnp.stack([jnp.zeros((S_ENC,), jnp.float32),
                         jnp.concatenate([jnp.zeros((S_ENC - 3,), jnp.float32),
                                          jnp.ones((3,), jnp.float32)])])
    dec_enc_attn_mask = jnp.broadcast_to(enc_pad[:, None, :], (B, S_DEC, S_ENC))

    out, self_prob, cross_prob = decoder_layer(
        dec_inputs, enc_outputs, self_attn_mask, dec_enc_attn_mask, packed)
    jax.block_until_ready((out, self_prob, cross_prob))

    # Reference in full f32 matmul precision, scoped locally (not a global flag).
    with jax.default_matmul_precision("highest"):
        ref_out, ref_sp, ref_cp = _ref_decoder(
            dec_inputs, enc_outputs, self_attn_mask, dec_enc_attn_mask, params)
        jax.block_until_ready((ref_out, ref_sp, ref_cp))

    # 2e-3 tolerance covers the EUP approximate-reciprocal softmax (~3e-4).
    np.testing.assert_allclose(np.asarray(out), np.asarray(ref_out), atol=2e-3, rtol=2e-3)
    np.testing.assert_allclose(np.asarray(self_prob), np.asarray(ref_sp), atol=2e-3, rtol=2e-3)
    np.testing.assert_allclose(np.asarray(cross_prob), np.asarray(ref_cp), atol=2e-3, rtol=2e-3)

    print("KERNEL_OK")
</pallas_src>

<mosaic_0001>
module attributes {stable_mosaic.version = 11 : i64} {
  func.func @_decoder_layer_kernel(%arg0: i32, %arg1: memref<2x8x32xf32, #tpu.memory_space<vmem>>, %arg2: memref<2x16x32xf32, #tpu.memory_space<vmem>>, %arg3: memref<2x8x8xf32, #tpu.memory_space<vmem>>, %arg4: memref<2x8x16xf32, #tpu.memory_space<vmem>>, %arg5: memref<32x320xf32, #tpu.memory_space<vmem>>, %arg6: memref<64x32xf32, #tpu.memory_space<vmem>>, %arg7: memref<13x128xf32, #tpu.memory_space<vmem>>, %arg8: memref<2x8x32xf32, #tpu.memory_space<vmem>>, %arg9: memref<2x2x8x8xf32, #tpu.memory_space<vmem>>, %arg10: memref<2x2x8x16xf32, #tpu.memory_space<vmem>>) attributes {dimension_semantics = [#tpu.dimension_semantics<parallel>], iteration_bounds = array<i64: 1>, scalar_prefetch = 0 : i64, scratch_operands = 0 : i64, tpu.core_type = #tpu.core_type<tc>, window_params = [{transform_indices = @transform_0, window_bounds = array<i64: 2, 8, 32>}, {transform_indices = @transform_1, window_bounds = array<i64: 2, 16, 32>}, {transform_indices = @transform_2, window_bounds = array<i64: 2, 8, 8>}, {transform_indices = @transform_3, window_bounds = array<i64: 2, 8, 16>}, {pipeline_mode = #tpu.pipeline_mode<synchronous>, transform_indices = @transform_4, window_bounds = array<i64: 32, 320>}, {pipeline_mode = #tpu.pipeline_mode<synchronous>, transform_indices = @transform_5, window_bounds = array<i64: 64, 32>}, {pipeline_mode = #tpu.pipeline_mode<synchronous>, transform_indices = @transform_6, window_bounds = array<i64: 13, 128>}, {transform_indices = @transform_7, window_bounds = array<i64: 2, 8, 32>}, {transform_indices = @transform_8, window_bounds = array<i64: 2, 2, 8, 8>}, {transform_indices = @transform_9, window_bounds = array<i64: 2, 2, 8, 16>}]} {
    %c0 = arith.constant 0 : index
    %c0_0 = arith.constant 0 : index
    %c0_1 = arith.constant 0 : index
    %0 = vector.load %arg1[%c0, %c0_0, %c0_1] : memref<2x8x32xf32, #tpu.memory_space<vmem>>, vector<2x8x32xf32>
    %1 = vector.shape_cast %0 : vector<2x8x32xf32> to vector<16x32xf32>
    %c0_2 = arith.constant 0 : index
    %c0_3 = arith.constant 0 : index
    %c0_4 = arith.constant 0 : index
    %2 = vector.load %arg2[%c0_2, %c0_3, %c0_4] : memref<2x16x32xf32, #tpu.memory_space<vmem>>, vector<2x16x32xf32>
    %3 = vector.shape_cast %2 : vector<2x16x32xf32> to vector<32x32xf32>
    %c0_5 = arith.constant 0 : index
    %c0_6 = arith.constant 0 : index
    %4 = vector.load %arg5[%c0_5, %c0_6] : memref<32x320xf32, #tpu.memory_space<vmem>>, vector<32x96xf32>
    %cst = arith.constant dense<0.000000e+00> : vector<16x96xf32>
    %5 = tpu.matmul %1, %4, %cst {dimension_numbers = #tpu.dot_dimension_numbers<[1], [0], [0], [1], [0, 0, 1, 1], [], []>, precision = #tpu.contract_precision<fp32>} : vector<16x32xf32>, vector<32x96xf32>, vector<16x96xf32> -> vector<16x96xf32>
    %c0_7 = arith.constant 0 : index
    %c0_8 = arith.constant 0 : index
    %6 = vector.load %arg7[%c0_7, %c0_8] : memref<13x128xf32, #tpu.memory_space<vmem>>, vector<1x96xf32>
    %7 = vector.broadcast %6 : vector<1x96xf32> to vector<16x96xf32>
    %8 = arith.addf %5, %7 : vector<16x96xf32>
    %9 = vector.extract_strided_slice %8 {offsets = [0, 0], sizes = [16, 32], strides = [1, 1]} : vector<16x96xf32> to vector<16x32xf32>
    %10 = vector.extract_strided_slice %8 {offsets = [0, 32], sizes = [16, 64], strides = [1, 1]} : vector<16x96xf32> to vector<16x64xf32>
    %c0_9 = arith.constant 0 : index
    %c96 = arith.constant 96 : index
    %11 = vector.load %arg5[%c0_9, %c96] : memref<32x320xf32, #tpu.memory_space<vmem>>, vector<32x32xf32>
    %c1 = arith.constant 1 : index
    %c0_10 = arith.constant 0 : index
    %12 = vector.load %arg7[%c1, %c0_10] : memref<13x128xf32, #tpu.memory_space<vmem>>, vector<1x32xf32>
    %c0_11 = arith.constant 0 : index
    %c0_12 = arith.constant 0 : index
    %c0_13 = arith.constant 0 : index
    %13 = vector.load %arg3[%c0_11, %c0_12, %c0_13] : memref<2x8x8xf32, #tpu.memory_space<vmem>>, vector<2x8x8xf32>
    %cst_14 = arith.constant 5.000000e-01 : f32
    %14 = vector.broadcast %cst_14 : f32 to vector<2x8x8xf32>
    %15 = arith.cmpf ogt, %13, %14 : vector<2x8x8xf32>
    %16 = vector.extract_strided_slice %9 {offsets = [0, 0], sizes = [16, 16], strides = [1, 1]} : vector<16x32xf32> to vector<16x16xf32>
    %17 = vector.shape_cast %16 : vector<16x16xf32> to vector<2x8x16xf32>
    %18 = vector.extract_strided_slice %10 {offsets = [0, 0], sizes = [16, 16], strides = [1, 1]} : vector<16x64xf32> to vector<16x16xf32>
    %19 = vector.shape_cast %18 : vector<16x16xf32> to vector<2x8x16xf32>
    %20 = vector.extract_strided_slice %10 {offsets = [0, 32], sizes = [16, 16], strides = [1, 1]} : vector<16x64xf32> to vector<16x16xf32>
    %21 = vector.shape_cast %20 : vector<16x16xf32> to vector<2x8x16xf32>
    "tpu.trace_start"() <{level = 10 : i32, message = "bqe,bke->bqk"}> : () -> ()
    %cst_15 = arith.constant dense<0.000000e+00> : vector<2x8x8xf32>
    %22 = tpu.matmul %17, %19, %cst_15 {dimension_numbers = #tpu.dot_dimension_numbers<[2], [2], [1], [1], [0, 0, 0, 1, 1, 1], [0], [0]>, precision = #tpu.contract_precision<fp32>} : vector<2x8x16xf32>, vector<2x8x16xf32>, vector<2x8x8xf32> -> vector<2x8x8xf32>
    %cst_16 = arith.constant -1.000000e+09 : f32
    "tpu.trace_stop"() : () -> ()
    %23 = vector.broadcast %cst_16 : f32 to vector<2x8x8xf32>
    %24 = arith.select %15, %23, %22 : vector<2x8x8xi1>, vector<2x8x8xf32>
    %cst_17 = arith.constant dense<0xFF800000> : vector<2x8xf32>
    %25 = vector.multi_reduction <maximumf>, %24, %cst_17 [2] : vector<2x8x8xf32> to vector<2x8xf32>
    %26 = vector.shape_cast %25 : vector<2x8xf32> to vector<2x8x1xf32>
    %27 = vector.broadcast %26 : vector<2x8x1xf32> to vector<2x8x8xf32>
    %28 = arith.subf %24, %27 : vector<2x8x8xf32>
    %29 = math.exp %28 : vector<2x8x8xf32>
    %cst_18 = arith.constant dense<0.000000e+00> : vector<2x8xf32>
    %30 = vector.multi_reduction <add>, %29, %cst_18 [2] : vector<2x8x8xf32> to vector<2x8xf32>
    %31 = vector.shape_cast %30 : vector<2x8xf32> to vector<2x8x1xf32>
    %32 = tpu.reciprocal %31 {approx = true} : vector<2x8x1xf32> -> vector<2x8x1xf32>
    %33 = vector.broadcast %32 : vector<2x8x1xf32> to vector<2x8x8xf32>
    %34 = arith.mulf %29, %33 : vector<2x8x8xf32>
    %35 = vector.shape_cast %34 : vector<2x8x8xf32> to vector<2x1x8x8xf32>
    %c0_19 = arith.constant 0 : index
    %c0_20 = arith.constant 0 : index
    %c0_21 = arith.constant 0 : index
    %c0_22 = arith.constant 0 : index
    %36 = vector.load %arg9[%c0_19, %c0_20, %c0_21, %c0_22] : memref<2x2x8x8xf32, #tpu.memory_space<vmem>>, vector<2x1x8x8xf32>
    tpu.vector_store %arg9[%c0_19, %c0_20, %c0_21, %c0_22], %35 {strides = array<i32>} : memref<2x2x8x8xf32, #tpu.memory_space<vmem>>, vector<2x1x8x8xf32>,
    "tpu.trace_start"() <{level = 10 : i32, message = "bqk,bke->bqe"}> : () -> ()
    %cst_23 = arith.constant dense<0.000000e+00> : vector<2x8x16xf32>
    %37 = tpu.matmul %34, %21, %cst_23 {dimension_numbers = #tpu.dot_dimension_numbers<[2], [1], [1], [2], [0, 0, 0, 1, 1, 2], [0], [0]>, precision = #tpu.contract_precision<fp32>} : vector<2x8x8xf32>, vector<2x8x16xf32>, vector<2x8x16xf32> -> vector<2x8x16xf32>
    "tpu.trace_stop"() : () -> ()
    %38 = vector.shape_cast %37 : vector<2x8x16xf32> to vector<16x16xf32>
    %39 = vector.extract_strided_slice %11 {offsets = [0, 0], sizes = [16, 32], strides = [1, 1]} : vector<32x32xf32> to vector<16x32xf32>
    %cst_24 = arith.constant dense<0.000000e+00> : vector<16x32xf32>
    %40 = tpu.matmul %38, %39, %cst_24 {dimension_numbers = #tpu.dot_dimension_numbers<[1], [0], [0], [1], [0, 0, 1, 1], [], []>, precision = #tpu.contract_precision<fp32>} : vector<16x16xf32>, vector<16x32xf32>, vector<16x32xf32> -> vector<16x32xf32>
    %41 = vector.extract_strided_slice %9 {offsets = [0, 16], sizes = [16, 16], strides = [1, 1]} : vector<16x32xf32> to vector<16x16xf32>
    %42 = vector.shape_cast %41 : vector<16x16xf32> to vector<2x8x16xf32>
    %43 = vector.extract_strided_slice %10 {offsets = [0, 16], sizes = [16, 16], strides = [1, 1]} : vector<16x64xf32> to vector<16x16xf32>
    %44 = vector.shape_cast %43 : vector<16x16xf32> to vector<2x8x16xf32>
    %45 = vector.extract_strided_slice %10 {offsets = [0, 48], sizes = [16, 16], strides = [1, 1]} : vector<16x64xf32> to vector<16x16xf32>
    %46 = vector.shape_cast %45 : vector<16x16xf32> to vector<2x8x16xf32>
    "tpu.trace_start"() <{level = 10 : i32, message = "bqe,bke->bqk"}> : () -> ()
    %cst_25 = arith.constant dense<0.000000e+00> : vector<2x8x8xf32>
    %47 = tpu.matmul %42, %44, %cst_25 {dimension_numbers = #tpu.dot_dimension_numbers<[2], [2], [1], [1], [0, 0, 0, 1, 1, 1], [0], [0]>, precision = #tpu.contract_precision<fp32>} : vector<2x8x16xf32>, vector<2x8x16xf32>, vector<2x8x8xf32> -> vector<2x8x8xf32>
    %cst_26 = arith.constant -1.000000e+09 : f32
    "tpu.trace_stop"() : () -> ()
    %48 = vector.broadcast %cst_26 : f32 to vector<2x8x8xf32>
    %49 = arith.select %15, %48, %47 : vector<2x8x8xi1>, vector<2x8x8xf32>
    %cst_27 = arith.constant dense<0xFF800000> : vector<2x8xf32>
    %50 = vector.multi_reduction <maximumf>, %49, %cst_27 [2] : vector<2x8x8xf32> to vector<2x8xf32>
    %51 = vector.shape_cast %50 : vector<2x8xf32> to vector<2x8x1xf32>
    %52 = vector.broadcast %51 : vector<2x8x1xf32> to vector<2x8x8xf32>
    %53 = arith.subf %49, %52 : vector<2x8x8xf32>
    %54 = math.exp %53 : vector<2x8x8xf32>
    %cst_28 = arith.constant dense<0.000000e+00> : vector<2x8xf32>
    %55 = vector.multi_reduction <add>, %54, %cst_28 [2] : vector<2x8x8xf32> to vector<2x8xf32>
    %56 = vector.shape_cast %55 : vector<2x8xf32> to vector<2x8x1xf32>
    %57 = tpu.reciprocal %56 {approx = true} : vector<2x8x1xf32> -> vector<2x8x1xf32>
    %58 = vector.broadcast %57 : vector<2x8x1xf32> to vector<2x8x8xf32>
    %59 = arith.mulf %54, %58 : vector<2x8x8xf32>
    %60 = vector.shape_cast %59 : vector<2x8x8xf32> to vector<2x1x8x8xf32>
    %c0_29 = arith.constant 0 : index
    %c1_30 = arith.constant 1 : index
    %c0_31 = arith.constant 0 : index
    %c0_32 = arith.constant 0 : index
    %61 = vector.load %arg9[%c0_29, %c1_30, %c0_31, %c0_32] : memref<2x2x8x8xf32, #tpu.memory_space<vmem>>, vector<2x1x8x8xf32>
    tpu.vector_store %arg9[%c0_29, %c1_30, %c0_31, %c0_32], %60 {strides = array<i32>} : memref<2x2x8x8xf32, #tpu.memory_space<vmem>>, vector<2x1x8x8xf32>,
    "tpu.trace_start"() <{level = 10 : i32, message = "bqk,bke->bqe"}> : () -> ()
    %cst_33 = arith.constant dense<0.000000e+00> : vector<2x8x16xf32>
    %62 = tpu.matmul %59, %46, %cst_33 {dimension_numbers = #tpu.dot_dimension_numbers<[2], [1], [1], [2], [0, 0, 0, 1, 1, 2], [0], [0]>, precision = #tpu.contract_precision<fp32>} : vector<2x8x8xf32>, vector<2x8x16xf32>, vector<2x8x16xf32> -> vector<2x8x16xf32>
    "tpu.trace_stop"() : () -> ()
    %63 = vector.shape_cast %62 : vector<2x8x16xf32> to vector<16x16xf32>
    %64 = vector.extract_strided_slice %11 {offsets = [16, 0], sizes = [16, 32], strides = [1, 1]} : vector<32x32xf32> to vector<16x32xf32>
    %cst_34 = arith.constant dense<0.000000e+00> : vector<16x32xf32>
    %65 = tpu.matmul %63, %64, %cst_34 {dimension_numbers = #tpu.dot_dimension_numbers<[1], [0], [0], [1], [0, 0, 1, 1], [], []>, precision = #tpu.contract_precision<fp32>} : vector<16x16xf32>, vector<16x32xf32>, vector<16x32xf32> -> vector<16x32xf32>
    %66 = arith.addf %40, %65 : vector<16x32xf32>
    %67 = vector.broadcast %12 : vector<1x32xf32> to vector<16x32xf32>
    %68 = arith.addf %66, %67 : vector<16x32xf32>
    %c5 = arith.constant 5 : index
    %c0_35 = arith.constant 0 : index
    %69 = vector.load %arg7[%c5, %c0_35] : memref<13x128xf32, #tpu.memory_space<vmem>>, vector<1x32xf32>
    %c6 = arith.constant 6 : index
    %c0_36 = arith.constant 0 : index
    %70 = vector.load %arg7[%c6, %c0_36] : memref<13x128xf32, #tpu.memory_space<vmem>>, vector<1x32xf32>
    %71 = arith.addf %68, %1 : vector<16x32xf32>
    %cst_37 = arith.constant dense<0.000000e+00> : vector<16xf32>
    %72 = vector.multi_reduction <add>, %71, %cst_37 [1] : vector<16x32xf32> to vector<16xf32>
    %73 = vector.shape_cast %72 : vector<16xf32> to vector<16x1xf32>
    %cst_38 = arith.constant 3.200000e+01 : f32
    %74 = vector.broadcast %cst_38 : f32 to vector<16x1xf32>
    %75 = arith.divf %73, %74 : vector<16x1xf32>
    %76 = vector.broadcast %75 : vector<16x1xf32> to vector<16x32xf32>
    %77 = arith.subf %71, %76 : vector<16x32xf32>
    %78 = arith.mulf %77, %77 : vector<16x32xf32>
    %cst_39 = arith.constant dense<0.000000e+00> : vector<16xf32>
    %79 = vector.multi_reduction <add>, %78, %cst_39 [1] : vector<16x32xf32> to vector<16xf32>
    %80 = vector.shape_cast %79 : vector<16xf32> to vector<16x1xf32>
    %cst_40 = arith.constant 3.200000e+01 : f32
    %81 = vector.broadcast %cst_40 : f32 to vector<16x1xf32>
    %82 = arith.divf %80, %81 : vector<16x1xf32>
    %cst_41 = arith.constant 9.99999997E-7 : f32
    %83 = vector.broadcast %cst_41 : f32 to vector<16x1xf32>
    %84 = arith.addf %82, %83 : vector<16x1xf32>
    %85 = math.rsqrt %84 : vector<16x1xf32>
    %86 = vector.broadcast %85 : vector<16x1xf32> to vector<16x32xf32>
    %87 = arith.mulf %77, %86 : vector<16x32xf32>
    %88 = vector.broadcast %69 : vector<1x32xf32> to vector<16x32xf32>
    %89 = arith.mulf %87, %88 : vector<16x32xf32>
    %90 = vector.broadcast %70 : vector<1x32xf32> to vector<16x32xf32>
    %91 = arith.addf %89, %90 : vector<16x32xf32>
    %c0_42 = arith.constant 0 : index
    %c128 = arith.constant 128 : index
    %92 = vector.load %arg5[%c0_42, %c128] : memref<32x320xf32, #tpu.memory_space<vmem>>, vector<32x32xf32>
    %cst_43 = arith.constant dense<0.000000e+00> : vector<16x32xf32>
    %93 = tpu.matmul %91, %92, %cst_43 {dimension_numbers = #tpu.dot_dimension_numbers<[1], [0], [0], [1], [0, 0, 1, 1], [], []>, precision = #tpu.contract_precision<fp32>} : vector<16x32xf32>, vector<32x32xf32>, vector<16x32xf32> -> vector<16x32xf32>
    %c2 = arith.constant 2 : index
    %c0_44 = arith.constant 0 : index
    %94 = vector.load %arg7[%c2, %c0_44] : memref<13x128xf32, #tpu.memory_space<vmem>>, vector<1x32xf32>
    %95 = vector.broadcast %94 : vector<1x32xf32> to vector<16x32xf32>
    %96 = arith.addf %93, %95 : vector<16x32xf32>
    %c0_45 = arith.constant 0 : index
    %c160 = arith.constant 160 : index
    %97 = vector.load %arg5[%c0_45, %c160] : memref<32x320xf32, #tpu.memory_space<vmem>>, vector<32x64xf32>
    %cst_46 = arith.constant dense<0.000000e+00> : vector<32x64xf32>
    %98 = tpu.matmul %3, %97, %cst_46 {dimension_numbers = #tpu.dot_dimension_numbers<[1], [0], [0], [1], [0, 0, 1, 1], [], []>, precision = #tpu.contract_precision<fp32>} : vector<32x32xf32>, vector<32x64xf32>, vector<32x64xf32> -> vector<32x64xf32>
    %c3 = arith.constant 3 : index
    %c0_47 = arith.constant 0 : index
    %99 = vector.load %arg7[%c3, %c0_47] : memref<13x128xf32, #tpu.memory_space<vmem>>, vector<1x64xf32>
    %100 = vector.broadcast %99 : vector<1x64xf32> to vector<32x64xf32>
    %101 = arith.addf %98, %100 : vector<32x64xf32>
    %c0_48 = arith.constant 0 : index
    %c224 = arith.constant 224 : index
    %102 = vector.load %arg5[%c0_48, %c224] : memref<32x320xf32, #tpu.memory_space<vmem>>, vector<32x32xf32>
    %c4 = arith.constant 4 : index
    %c0_49 = arith.constant 0 : index
    %103 = vector.load %arg7[%c4, %c0_49] : memref<13x128xf32, #tpu.memory_space<vmem>>, vector<1x32xf32>
    %c0_50 = arith.constant 0 : index
    %c0_51 = arith.constant 0 : index
    %c0_52 = arith.constant 0 : index
    %104 = vector.load %arg4[%c0_50, %c0_51, %c0_52] : memref<2x8x16xf32, #tpu.memory_space<vmem>>, vector<2x8x16xf32>
    %cst_53 = arith.constant 5.000000e-01 : f32
    %105 = vector.broadcast %cst_53 : f32 to vector<2x8x16xf32>
    %106 = arith.cmpf ogt, %104, %105 : vector<2x8x16xf32>
    %107 = vector.extract_strided_slice %96 {offsets = [0, 0], sizes = [16, 16], strides = [1, 1]} : vector<16x32xf32> to vector<16x16xf32>
    %108 = vector.shape_cast %107 : vector<16x16xf32> to vector<2x8x16xf32>
    %109 = vector.extract_strided_slice %101 {offsets = [0, 0], sizes = [32, 16], strides = [1, 1]} : vector<32x64xf32> to vector<32x16xf32>
    %110 = vector.shape_cast %109 : vector<32x16xf32> to vector<2x16x16xf32>
    %111 = vector.extract_strided_slice %101 {offsets = [0, 32], sizes = [32, 16], strides = [1, 1]} : vector<32x64xf32> to vector<32x16xf32>
    %112 = vector.shape_cast %111 : vector<32x16xf32> to vector<2x16x16xf32>
    "tpu.trace_start"() <{level = 10 : i32, message = "bqe,bke->bqk"}> : () -> ()
    %cst_54 = arith.constant dense<0.000000e+00> : vector<2x8x16xf32>
    %113 = tpu.matmul %108, %110, %cst_54 {dimension_numbers = #tpu.dot_dimension_numbers<[2], [2], [1], [1], [0, 0, 0, 1, 1, 1], [0], [0]>, precision = #tpu.contract_precision<fp32>} : vector<2x8x16xf32>, vector<2x16x16xf32>, vector<2x8x16xf32> -> vector<2x8x16xf32>
    %cst_55 = arith.constant -1.000000e+09 : f32
    "tpu.trace_stop"() : () -> ()
    %114 = vector.broadcast %cst_55 : f32 to vector<2x8x16xf32>
    %115 = arith.select %106, %114, %113 : vector<2x8x16xi1>, vector<2x8x16xf32>
    %cst_56 = arith.constant dense<0xFF800000> : vector<2x8xf32>
    %116 = vector.multi_reduction <maximumf>, %115, %cst_56 [2] : vector<2x8x16xf32> to vector<2x8xf32>
    %117 = vector.shape_cast %116 : vector<2x8xf32> to vector<2x8x1xf32>
    %118 = vector.broadcast %117 : vector<2x8x1xf32> to vector<2x8x16xf32>
    %119 = arith.subf %115, %118 : vector<2x8x16xf32>
    %120 = math.exp %119 : vector<2x8x16xf32>
    %cst_57 = arith.constant dense<0.000000e+00> : vector<2x8xf32>
    %121 = vector.multi_reduction <add>, %120, %cst_57 [2] : vector<2x8x16xf32> to vector<2x8xf32>
    %122 = vector.shape_cast %121 : vector<2x8xf32> to vector<2x8x1xf32>
    %123 = tpu.reciprocal %122 {approx = true} : vector<2x8x1xf32> -> vector<2x8x1xf32>
    %124 = vector.broadcast %123 : vector<2x8x1xf32> to vector<2x8x16xf32>
    %125 = arith.mulf %120, %124 : vector<2x8x16xf32>
    %126 = vector.shape_cast %125 : vector<2x8x16xf32> to vector<2x1x8x16xf32>
    %c0_58 = arith.constant 0 : index
    %c0_59 = arith.constant 0 : index
    %c0_60 = arith.constant 0 : index
    %c0_61 = arith.constant 0 : index
    %127 = vector.load %arg10[%c0_58, %c0_59, %c0_60, %c0_61] : memref<2x2x8x16xf32, #tpu.memory_space<vmem>>, vector<2x1x8x16xf32>
    tpu.vector_store %arg10[%c0_58, %c0_59, %c0_60, %c0_61], %126 {strides = array<i32>} : memref<2x2x8x16xf32, #tpu.memory_space<vmem>>, vector<2x1x8x16xf32>,
    "tpu.trace_start"() <{level = 10 : i32, message = "bqk,bke->bqe"}> : () -> ()
    %cst_62 = arith.constant dense<0.000000e+00> : vector<2x8x16xf32>
    %128 = tpu.matmul %125, %112, %cst_62 {dimension_numbers = #tpu.dot_dimension_numbers<[2], [1], [1], [2], [0, 0, 0, 1, 1, 2], [0], [0]>, precision = #tpu.contract_precision<fp32>} : vector<2x8x16xf32>, vector<2x16x16xf32>, vector<2x8x16xf32> -> vector<2x8x16xf32>
    "tpu.trace_stop"() : () -> ()
    %129 = vector.shape_cast %128 : vector<2x8x16xf32> to vector<16x16xf32>
    %130 = vector.extract_strided_slice %102 {offsets = [0, 0], sizes = [16, 32], strides = [1, 1]} : vector<32x32xf32> to vector<16x32xf32>
    %cst_63 = arith.constant dense<0.000000e+00> : vector<16x32xf32>
    %131 = tpu.matmul %129, %130, %cst_63 {dimension_numbers = #tpu.dot_dimension_numbers<[1], [0], [0], [1], [0, 0, 1, 1], [], []>, precision = #tpu.contract_precision<fp32>} : vector<16x16xf32>, vector<16x32xf32>, vector<16x32xf32> -> vector<16x32xf32>
    %132 = vector.extract_strided_slice %96 {offsets = [0, 16], sizes = [16, 16], strides = [1, 1]} : vector<16x32xf32> to vector<16x16xf32>
    %133 = vector.shape_cast %132 : vector<16x16xf32> to vector<2x8x16xf32>
    %134 = vector.extract_strided_slice %101 {offsets = [0, 16], sizes = [32, 16], strides = [1, 1]} : vector<32x64xf32> to vector<32x16xf32>
    %135 = vector.shape_cast %134 : vector<32x16xf32> to vector<2x16x16xf32>
    %136 = vector.extract_strided_slice %101 {offsets = [0, 48], sizes = [32, 16], strides = [1, 1]} : vector<32x64xf32> to vector<32x16xf32>
    %137 = vector.shape_cast %136 : vector<32x16xf32> to vector<2x16x16xf32>
    "tpu.trace_start"() <{level = 10 : i32, message = "bqe,bke->bqk"}> : () -> ()
    %cst_64 = arith.constant dense<0.000000e+00> : vector<2x8x16xf32>
    %138 = tpu.matmul %133, %135, %cst_64 {dimension_numbers = #tpu.dot_dimension_numbers<[2], [2], [1], [1], [0, 0, 0, 1, 1, 1], [0], [0]>, precision = #tpu.contract_precision<fp32>} : vector<2x8x16xf32>, vector<2x16x16xf32>, vector<2x8x16xf32> -> vector<2x8x16xf32>
    %cst_65 = arith.constant -1.000000e+09 : f32
    "tpu.trace_stop"() : () -> ()
    %139 = vector.broadcast %cst_65 : f32 to vector<2x8x16xf32>
    %140 = arith.select %106, %139, %138 : vector<2x8x16xi1>, vector<2x8x16xf32>
    %cst_66 = arith.constant dense<0xFF800000> : vector<2x8xf32>
    %141 = vector.multi_reduction <maximumf>, %140, %cst_66 [2] : vector<2x8x16xf32> to vector<2x8xf32>
    %142 = vector.shape_cast %141 : vector<2x8xf32> to vector<2x8x1xf32>
    %143 = vector.broadcast %142 : vector<2x8x1xf32> to vector<2x8x16xf32>
    %144 = arith.subf %140, %143 : vector<2x8x16xf32>
    %145 = math.exp %144 : vector<2x8x16xf32>
    %cst_67 = arith.constant dense<0.000000e+00> : vector<2x8xf32>
    %146 = vector.multi_reduction <add>, %145, %cst_67 [2] : vector<2x8x16xf32> to vector<2x8xf32>
    %147 = vector.shape_cast %146 : vector<2x8xf32> to vector<2x8x1xf32>
    %148 = tpu.reciprocal %147 {approx = true} : vector<2x8x1xf32> -> vector<2x8x1xf32>
    %149 = vector.broadcast %148 : vector<2x8x1xf32> to vector<2x8x16xf32>
    %150 = arith.mulf %145, %149 : vector<2x8x16xf32>
    %151 = vector.shape_cast %150 : vector<2x8x16xf32> to vector<2x1x8x16xf32>
    %c0_68 = arith.constant 0 : index
    %c1_69 = arith.constant 1 : index
    %c0_70 = arith.constant 0 : index
    %c0_71 = arith.constant 0 : index
    %152 = vector.load %arg10[%c0_68, %c1_69, %c0_70, %c0_71] : memref<2x2x8x16xf32, #tpu.memory_space<vmem>>, vector<2x1x8x16xf32>
    tpu.vector_store %arg10[%c0_68, %c1_69, %c0_70, %c0_71], %151 {strides = array<i32>} : memref<2x2x8x16xf32, #tpu.memory_space<vmem>>, vector<2x1x8x16xf32>,
    "tpu.trace_start"() <{level = 10 : i32, message = "bqk,bke->bqe"}> : () -> ()
    %cst_72 = arith.constant dense<0.000000e+00> : vector<2x8x16xf32>
    %153 = tpu.matmul %150, %137, %cst_72 {dimension_numbers = #tpu.dot_dimension_numbers<[2], [1], [1], [2], [0, 0, 0, 1, 1, 2], [0], [0]>, precision = #tpu.contract_precision<fp32>} : vector<2x8x16xf32>, vector<2x16x16xf32>, vector<2x8x16xf32> -> vector<2x8x16xf32>
    "tpu.trace_stop"() : () -> ()
    %154 = vector.shape_cast %153 : vector<2x8x16xf32> to vector<16x16xf32>
    %155 = vector.extract_strided_slice %102 {offsets = [16, 0], sizes = [16, 32], strides = [1, 1]} : vector<32x32xf32> to vector<16x32xf32>
    %cst_73 = arith.constant dense<0.000000e+00> : vector<16x32xf32>
    %156 = tpu.matmul %154, %155, %cst_73 {dimension_numbers = #tpu.dot_dimension_numbers<[1], [0], [0], [1], [0, 0, 1, 1], [], []>, precision = #tpu.contract_precision<fp32>} : vector<16x16xf32>, vector<16x32xf32>, vector<16x32xf32> -> vector<16x32xf32>
    %157 = arith.addf %131, %156 : vector<16x32xf32>
    %158 = vector.broadcast %103 : vector<1x32xf32> to vector<16x32xf32>
    %159 = arith.addf %157, %158 : vector<16x32xf32>
    %c7 = arith.constant 7 : index
    %c0_74 = arith.constant 0 : index
    %160 = vector.load %arg7[%c7, %c0_74] : memref<13x128xf32, #tpu.memory_space<vmem>>, vector<1x32xf32>
    %c8 = arith.constant 8 : index
    %c0_75 = arith.constant 0 : index
    %161 = vector.load %arg7[%c8, %c0_75] : memref<13x128xf32, #tpu.memory_space<vmem>>, vector<1x32xf32>
    %162 = arith.addf %159, %91 : vector<16x32xf32>
    %cst_76 = arith.constant dense<0.000000e+00> : vector<16xf32>
    %163 = vector.multi_reduction <add>, %162, %cst_76 [1] : vector<16x32xf32> to vector<16xf32>
    %164 = vector.shape_cast %163 : vector<16xf32> to vector<16x1xf32>
    %cst_77 = arith.constant 3.200000e+01 : f32
    %165 = vector.broadcast %cst_77 : f32 to vector<16x1xf32>
    %166 = arith.divf %164, %165 : vector<16x1xf32>
    %167 = vector.broadcast %166 : vector<16x1xf32> to vector<16x32xf32>
    %168 = arith.subf %162, %167 : vector<16x32xf32>
    %169 = arith.mulf %168, %168 : vector<16x32xf32>
    %cst_78 = arith.constant dense<0.000000e+00> : vector<16xf32>
    %170 = vector.multi_reduction <add>, %169, %cst_78 [1] : vector<16x32xf32> to vector<16xf32>
    %171 = vector.shape_cast %170 : vector<16xf32> to vector<16x1xf32>
    %cst_79 = arith.constant 3.200000e+01 : f32
    %172 = vector.broadcast %cst_79 : f32 to vector<16x1xf32>
    %173 = arith.divf %171, %172 : vector<16x1xf32>
    %cst_80 = arith.constant 9.99999997E-7 : f32
    %174 = vector.broadcast %cst_80 : f32 to vector<16x1xf32>
    %175 = arith.addf %173, %174 : vector<16x1xf32>
    %176 = math.rsqrt %175 : vector<16x1xf32>
    %177 = vector.broadcast %176 : vector<16x1xf32> to vector<16x32xf32>
    %178 = arith.mulf %168, %177 : vector<16x32xf32>
    %179 = vector.broadcast %160 : vector<1x32xf32> to vector<16x32xf32>
    %180 = arith.mulf %178, %179 : vector<16x32xf32>
    %181 = vector.broadcast %161 : vector<1x32xf32> to vector<16x32xf32>
    %182 = arith.addf %180, %181 : vector<16x32xf32>
    %c0_81 = arith.constant 0 : index
    %c256 = arith.constant 256 : index
    %183 = vector.load %arg5[%c0_81, %c256] : memref<32x320xf32, #tpu.memory_space<vmem>>, vector<32x64xf32>
    %cst_82 = arith.constant dense<0.000000e+00> : vector<16x64xf32>
    %184 = tpu.matmul %182, %183, %cst_82 {dimension_numbers = #tpu.dot_dimension_numbers<[1], [0], [0], [1], [0, 0, 1, 1], [], []>, precision = #tpu.contract_precision<fp32>} : vector<16x32xf32>, vector<32x64xf32>, vector<16x64xf32> -> vector<16x64xf32>
    %c11 = arith.constant 11 : index
    %c0_83 = arith.constant 0 : index
    %185 = vector.load %arg7[%c11, %c0_83] : memref<13x128xf32, #tpu.memory_space<vmem>>, vector<1x64xf32>
    %186 = vector.broadcast %185 : vector<1x64xf32> to vector<16x64xf32>
    %187 = arith.addf %184, %186 : vector<16x64xf32>
    %cst_84 = arith.constant 5.000000e-01 : f32
    %188 = vector.broadcast %cst_84 : f32 to vector<16x64xf32>
    %189 = arith.mulf %188, %187 : vector<16x64xf32>
    %cst_85 = arith.constant 4.471500e-02 : f32
    %190 = vector.broadcast %cst_85 : f32 to vector<16x64xf32>
    %191 = arith.mulf %190, %187 : vector<16x64xf32>
    %192 = arith.mulf %191, %187 : vector<16x64xf32>
    %193 = arith.mulf %192, %187 : vector<16x64xf32>
    %194 = arith.addf %187, %193 : vector<16x64xf32>
    %cst_86 = arith.constant 0.797884583 : f32
    %195 = vector.broadcast %cst_86 : f32 to vector<16x64xf32>
    %196 = arith.mulf %195, %194 : vector<16x64xf32>
    %197 = math.tanh %196 : vector<16x64xf32>
    %cst_87 = arith.constant 1.000000e+00 : f32
    %198 = vector.broadcast %cst_87 : f32 to vector<16x64xf32>
    %199 = arith.addf %198, %197 : vector<16x64xf32>
    %200 = arith.mulf %189, %199 : vector<16x64xf32>
    %c0_88 = arith.constant 0 : index
    %c0_89 = arith.constant 0 : index
    %201 = vector.load %arg6[%c0_88, %c0_89] : memref<64x32xf32, #tpu.memory_space<vmem>>, vector<64x32xf32>
    %cst_90 = arith.constant dense<0.000000e+00> : vector<16x32xf32>
    %202 = tpu.matmul %200, %201, %cst_90 {dimension_numbers = #tpu.dot_dimension_numbers<[1], [0], [0], [1], [0, 0, 1, 1], [], []>, precision = #tpu.contract_precision<fp32>} : vector<16x64xf32>, vector<64x32xf32>, vector<16x32xf32> -> vector<16x32xf32>
    %c12 = arith.constant 12 : index
    %c0_91 = arith.constant 0 : index
    %203 = vector.load %arg7[%c12, %c0_91] : memref<13x128xf32, #tpu.memory_space<vmem>>, vector<1x32xf32>
    %204 = vector.broadcast %203 : vector<1x32xf32> to vector<16x32xf32>
    %205 = arith.addf %202, %204 : vector<16x32xf32>
    %c9 = arith.constant 9 : index
    %c0_92 = arith.constant 0 : index
    %206 = vector.load %arg7[%c9, %c0_92] : memref<13x128xf32, #tpu.memory_space<vmem>>, vector<1x32xf32>
    %c10 = arith.constant 10 : index
    %c0_93 = arith.constant 0 : index
    %207 = vector.load %arg7[%c10, %c0_93] : memref<13x128xf32, #tpu.memory_space<vmem>>, vector<1x32xf32>
    %208 = arith.addf %205, %182 : vector<16x32xf32>
    %cst_94 = arith.constant dense<0.000000e+00> : vector<16xf32>
    %209 = vector.multi_reduction <add>, %208, %cst_94 [1] : vector<16x32xf32> to vector<16xf32>
    %210 = vector.shape_cast %209 : vector<16xf32> to vector<16x1xf32>
    %cst_95 = arith.constant 3.200000e+01 : f32
    %211 = vector.broadcast %cst_95 : f32 to vector<16x1xf32>
    %212 = arith.divf %210, %211 : vector<16x1xf32>
    %213 = vector.broadcast %212 : vector<16x1xf32> to vector<16x32xf32>
    %214 = arith.subf %208, %213 : vector<16x32xf32>
    %215 = arith.mulf %214, %214 : vector<16x32xf32>
    %cst_96 = arith.constant dense<0.000000e+00> : vector<16xf32>
    %216 = vector.multi_reduction <add>, %215, %cst_96 [1] : vector<16x32xf32> to vector<16xf32>
    %217 = vector.shape_cast %216 : vector<16xf32> to vector<16x1xf32>
    %cst_97 = arith.constant 3.200000e+01 : f32
    %218 = vector.broadcast %cst_97 : f32 to vector<16x1xf32>
    %219 = arith.divf %217, %218 : vector<16x1xf32>
    %cst_98 = arith.constant 9.99999997E-7 : f32
    %220 = vector.broadcast %cst_98 : f32 to vector<16x1xf32>
    %221 = arith.addf %219, %220 : vector<16x1xf32>
    %222 = math.rsqrt %221 : vector<16x1xf32>
    %223 = vector.broadcast %222 : vector<16x1xf32> to vector<16x32xf32>
    %224 = arith.mulf %214, %223 : vector<16x32xf32>
    %225 = vector.broadcast %206 : vector<1x32xf32> to vector<16x32xf32>
    %226 = arith.mulf %224, %225 : vector<16x32xf32>
    %227 = vector.broadcast %207 : vector<1x32xf32> to vector<16x32xf32>
    %228 = arith.addf %226, %227 : vector<16x32xf32>
    %229 = vector.shape_cast %228 : vector<16x32xf32> to vector<2x8x32xf32>
    %c0_99 = arith.constant 0 : index
    %c0_100 = arith.constant 0 : index
    %c0_101 = arith.constant 0 : index
    %230 = vector.load %arg8[%c0_99, %c0_100, %c0_101] : memref<2x8x32xf32, #tpu.memory_space<vmem>>, vector<2x8x32xf32>
    tpu.vector_store %arg8[%c0_99, %c0_100, %c0_101], %229 {strides = array<i32>} : memref<2x8x32xf32, #tpu.memory_space<vmem>>, vector<2x8x32xf32>,
    return
  }
  func.func @transform_0(%arg0: i32) -> (i32, i32, i32) {
    %c0_i32 = arith.constant 0 : i32
    %c0_i32_0 = arith.constant 0 : i32
    %c0_i32_1 = arith.constant 0 : i32
    return %arg0, %c0_i32, %c0_i32_0 : i32, i32, i32
  }
  func.func @transform_1(%arg0: i32) -> (i32, i32, i32) {
    %c0_i32 = arith.constant 0 : i32
    %c0_i32_0 = arith.constant 0 : i32
    %c0_i32_1 = arith.constant 0 : i32
    return %arg0, %c0_i32, %c0_i32_0 : i32, i32, i32
  }
  func.func @transform_2(%arg0: i32) -> (i32, i32, i32) {
    %c0_i32 = arith.constant 0 : i32
    %c0_i32_0 = arith.constant 0 : i32
    %c0_i32_1 = arith.constant 0 : i32
    return %arg0, %c0_i32, %c0_i32_0 : i32, i32, i32
  }
  func.func @transform_3(%arg0: i32) -> (i32, i32, i32) {
    %c0_i32 = arith.constant 0 : i32
    %c0_i32_0 = arith.constant 0 : i32
    %c0_i32_1 = arith.constant 0 : i32
    return %arg0, %c0_i32, %c0_i32_0 : i32, i32, i32
  }
  func.func @transform_4(%arg0: i32) -> (i32, i32) {
    %c0_i32 = arith.constant 0 : i32
    %c0_i32_0 = arith.constant 0 : i32
    %c0_i32_1 = arith.constant 0 : i32
    return %c0_i32, %c0_i32_0 : i32, i32
  }
  func.func @transform_5(%arg0: i32) -> (i32, i32) {
    %c0_i32 = arith.constant 0 : i32
    %c0_i32_0 = arith.constant 0 : i32
    %c0_i32_1 = arith.constant 0 : i32
    return %c0_i32, %c0_i32_0 : i32, i32
  }
  func.func @transform_6(%arg0: i32) -> (i32, i32) {
    %c0_i32 = arith.constant 0 : i32
    %c0_i32_0 = arith.constant 0 : i32
    %c0_i32_1 = arith.constant 0 : i32
    return %c0_i32, %c0_i32_0 : i32, i32
  }
  func.func @transform_7(%arg0: i32) -> (i32, i32, i32) {
    %c0_i32 = arith.constant 0 : i32
    %c0_i32_0 = arith.constant 0 : i32
    %c0_i32_1 = arith.constant 0 : i32
    return %arg0, %c0_i32, %c0_i32_0 : i32, i32, i32
  }
  func.func @transform_8(%arg0: i32) -> (i32, i32, i32, i32) {
    %c0_i32 = arith.constant 0 : i32
    %c0_i32_0 = arith.constant 0 : i32
    %c0_i32_1 = arith.constant 0 : i32
    %c0_i32_2 = arith.constant 0 : i32
    return %arg0, %c0_i32, %c0_i32_0, %c0_i32_1 : i32, i32, i32, i32
  }
  func.func @transform_9(%arg0: i32) -> (i32, i32, i32, i32) {
    %c0_i32 = arith.constant 0 : i32
    %c0_i32_0 = arith.constant 0 : i32
    %c0_i32_1 = arith.constant 0 : i32
    %c0_i32_2 = arith.constant 0 : i32
    return %arg0, %c0_i32, %c0_i32_0, %c0_i32_1 : i32, i32, i32, i32
  }
}

</mosaic_0001>

<bundles_post_ra>
// kernel: tpu_custom_call.1
= control target key start
LH: loop header
LB: loop body
LE: loop exit
PB: predicated region body
PF: predicated region fallthrough
CT: control target
= control target key end

     0   :  { %15 = vsyncpa [#allocation3], 0  ;;  %s16744_s0 = inlined_call_operand.hbm [shape: f32[2,8,32], index: 0, kind: input, shape index: {}]   ;;  %s16745_s1 = inlined_call_operand.hbm [shape: f32[2,16,32], index: 1, kind: input, shape index: {}]   ;;  %s16746_s2 = inlined_call_operand.hbm [shape: f32[2,8,8], index: 2, kind: input, shape index: {}]   ;;  %s16747_s3 = inlined_call_operand.hbm [shape: f32[2,8,16], index: 3, kind: input, shape index: {}]   ;;  %s16748_s4 = inlined_call_operand.vmem [shape: f32[32,320], index: 4, kind: input, shape index: {}]   ;;  %s16749_s5 = inlined_call_operand.vmem [shape: f32[64,32], index: 5, kind: input, shape index: {}]   ;;  %s16750_s6 = inlined_call_operand.vmem [shape: f32[13,128], index: 6, kind: input, shape index: {}]   ;;  %s16751_s7 = inlined_call_operand.hbm [shape: f32[2,8,32], index: 7, kind: output, shape index: {0}]   ;;  %s16752_s8 = inlined_call_operand.hbm [shape: f32[2,2,8,8], index: 8, kind: output, shape index: {1}]   ;;  %s16753_s9 = inlined_call_operand.hbm [shape: f32[2,2,8,16], index: 9, kind: output, shape index: {2}]  }
   0x1   :  { %16 = vsyncpa [#allocation6], 0 }
   0x2   :  { %17 = vsyncpa [#allocation9], 0 }
   0x3   :  { %18 = vsyncpa [#allocation4], 0 }
   0x4   :  { %19 = vsyncpa [#allocation12], 0  ;;  %s15473_s30 = smov [#allocation5]   ;;  %s15474_s11 = smov [#allocation2]  }
   0x5   :  { %s37_s10 = sshll.u32 %s15473_s30, 4  ;;  %s25_s12 = sshll.u32 %s15474_s11, 4  ;;  %s38_s10 = int_to_ptr.vmem [resolvable:$true] %s37_s10  ;;  %s15541_s12 = int_to_ptr.vmem [resolvable:$true] %s25_s12 }
   0x6   :  { %s15309_s15 = scalar_lea.hbm %s16745_s1, 512 }
   0x7   :  { %p15310_p0 = scmp.ne.s32.totalorder %s16745_s1, %s15309_s15  ;;  %p15313_p1 = scmp.lt.u32.totalorder %s15309_s15, %s16745_s1 }
   0x9   :  { %p15315_p2 = pnand %p15313_p1, %p15310_p0 }
   0xb   :  { %15318 = shalt.err (!%p15315_p2)
}
   0xc   :  { %s15319_s20 = scalar_lea.vmem %s38_s10, 512  ;;  %p15324_p4 = scmp.lt.s32.totalorder %s38_s10, %s38_s10 }
   0xd   :  { %p15320_p3 = scmp.ne.s32.totalorder %s38_s10, %s15319_s20  ;;  %p15325_p5 = scmp.lt.s32.totalorder %s15319_s20, %s15319_s20 }
   0xf   :  { %p15326_p6 = por %p15325_p5, %p15324_p4 }
  0x11   :  { %p15327_p7 = pnand %p15326_p6, %p15320_p3 }
  0x13   :  { %15330 = shalt.err (!%p15327_p7)
}
  0x14   :  { %s15475_s21 = smov 128   ;;  %s15476_s22 = smov 8  }
  0x15   :  { %43 = dma.hbm_to_vmem [thread:$0]  %s16745_s1, 512, %s38_s10, [#allocation6], %s15475_s21, %s15475_s21, %s15476_s22  }
  0x16   :  { %s15331_s27 = scalar_lea.hbm %s16744_s0, 256 }
  0x17   :  { %p15332_p8 = scmp.ne.s32.totalorder %s16744_s0, %s15331_s27  ;;  %p15335_p9 = scmp.lt.u32.totalorder %s15331_s27, %s16744_s0 }
  0x19   :  { %p15337_p10 = pnand %p15335_p9, %p15332_p8 }
  0x1b   :  { %15340 = shalt.err (!%p15337_p10)
}
  0x1c   :  { %s15341_s13 = scalar_lea.vmem %s15541_s12, 256  ;;  %p15346_p12 = scmp.lt.s32.totalorder %s15541_s12, %s15541_s12 }
  0x1d   :  { %p15342_p11 = scmp.ne.s32.totalorder %s15541_s12, %s15341_s13  ;;  %p15347_p13 = scmp.lt.s32.totalorder %s15341_s13, %s15341_s13 }
  0x1f   :  { %p15348_p0 = por %p15347_p13, %p15346_p12 }
  0x21   :  { %p15349_p1 = pnand %p15348_p0, %p15342_p11 }
  0x23   :  { %15352 = shalt.err (!%p15349_p1)
}
  0x24   :  { %31 = dma.hbm_to_vmem [thread:$0]  %s16744_s0, 256, %s15541_s12, [#allocation3], %s15475_s21, %s15475_s21, %s15476_s22  }
  0x25   :  { %s15477_s14 = smov [#allocation7]   ;;  %s15478_s16 = smov [#allocation8]  }
  0x26   :  { %s49_s15 = sshll.u32 %s15477_s14, 4  ;;  %s61_s17 = sshll.u32 %s15478_s16, 4  ;;  %s50_s15 = int_to_ptr.vmem [resolvable:$true] %s49_s15  ;;  %s15578_s17 = int_to_ptr.vmem [resolvable:$true] %s61_s17 }
  0x27   :  { %s15353_s20 = scalar_lea.hbm %s16746_s2, 256 }
  0x28   :  { %p15354_p2 = scmp.ne.s32.totalorder %s16746_s2, %s15353_s20  ;;  %p15357_p3 = scmp.lt.u32.totalorder %s15353_s20, %s16746_s2 }
  0x2a   :  { %p15359_p4 = pnand %p15357_p3, %p15354_p2 }
  0x2c   :  { %15362 = shalt.err (!%p15359_p4)
}
  0x2d   :  { %s15363_s0 = scalar_lea.vmem %s50_s15, 256  ;;  %p15368_p6 = scmp.lt.s32.totalorder %s50_s15, %s50_s15 }
  0x2e   :  { %p15364_p5 = scmp.ne.s32.totalorder %s50_s15, %s15363_s0  ;;  %p15369_p7 = scmp.lt.s32.totalorder %s15363_s0, %s15363_s0 }
  0x30   :  { %p15370_p8 = por %p15369_p7, %p15368_p6 }
  0x32   :  { %p15371_p9 = pnand %p15370_p8, %p15364_p5 }
  0x34   :  { %15374 = shalt.err (!%p15371_p9)
}
  0x35   :  { %55 = dma.hbm_to_vmem [thread:$0]  %s16746_s2, 256, %s50_s15, [#allocation6], %s15475_s21, %s15475_s21, %s15476_s22  }
  0x36   :  { %s15375_s30 = scalar_lea.hbm %s16747_s3, 256 }
  0x37   :  { %p15376_p10 = scmp.ne.s32.totalorder %s16747_s3, %s15375_s30  ;;  %p15379_p11 = scmp.lt.u32.totalorder %s15375_s30, %s16747_s3 }
  0x39   :  { %p15381_p12 = pnand %p15379_p11, %p15376_p10 }
  0x3b   :  { %15384 = shalt.err (!%p15381_p12)
}
  0x3c   :  { %s15385_s14 = scalar_lea.vmem %s15578_s17, 256  ;;  %p15390_p0 = scmp.lt.s32.totalorder %s15578_s17, %s15578_s17 }
  0x3d   :  { %p15386_p13 = scmp.ne.s32.totalorder %s15578_s17, %s15385_s14  ;;  %p15391_p1 = scmp.lt.s32.totalorder %s15385_s14, %s15385_s14 }
  0x3f   :  { %p15392_p2 = por %p15391_p1, %p15390_p0 }
  0x41   :  { %p15393_p3 = pnand %p15392_p2, %p15386_p13 }
  0x43   :  { %15396 = shalt.err (!%p15393_p3)
}
  0x44   :  { %67 = dma.hbm_to_vmem [thread:$0]  %s16747_s3, 256, %s15578_s17, [#allocation9], %s15475_s21, %s15475_s21, %s15476_s22  }
  0x45   :  { %15463 = dma.done.wait [#allocation3], 256  }
  0x46   :  { %15464 = vsyncadd [#allocation3], 4294967040 }
  0x47   :  { %15465 = dma.done.wait [#allocation6], 768  }
  0x48   :  { %15466 = vsyncadd [#allocation6], 4294966528 }
  0x49   :  { %15467 = dma.done.wait [#allocation9], 256  }
  0x4a   :  { %15468 = vsyncadd [#allocation9], 4294967040  ;;  %vm101_vm0 = vcmask 261120   ;;  %v15618_v0 = vld [vmem:[%s16748_s4] sm:$0xff]  ;;  %v15623_v1 = vld [vmem:[%s16748_s4 + $0x18] sm:$0xff]  ;;  %v15479_v46 = vmov 0.0  }
  0x4b   :  { %v15628_v2 = vld [vmem:[%s16748_s4 + $0x30] sm:$0xff]  ;;  %v109_v3 = vand.u32 4294901760, %v15618_v0  ;;  %v112_v4 = vand.u32 4294901760, %v15623_v1  ;;  %v15635_v5 = vld [vmem:[%s16748_s4 + $0x48] sm:$0xff]  ;;  %v86_v7 = vld [vmem:[#allocation2] sm:$0xff]  ;;  %13359 = vmatprep.subr.mxu1 %v15479_v46  ;;  %vm15480_vm1 = vmmov 0  }
  0x4c   :  { %v115_v6 = vand.u32 4294901760, %v15628_v2  ;;  %v87_v8 = vld [vmem:[#allocation2 + $0x8] sm:$0xff]  ;;  %v118_v9 = vand.u32 4294901760, %v15635_v5  ;;  %v103_v10 = vsel %vm101_vm0, %v86_v7, 0  ;;  %13361 = vmatprep.mubr.msk.f32.mxu1 %vm15480_vm1, %v15479_v46  ;;  %v12728_v47 = vld [vmem:[%s16750_s6] ss:$0 sm:$0xff] }
  0x4d   :  { %v106_v11 = vsel %vm101_vm0, %v87_v8, 0  ;;  %v15641_v12 = vpack.c.bf16 %v112_v4, %v109_v3  ;;  %v15643_v13 = vand.u32 4294901760, %v103_v10  ;;  %v199_v15 = vsub.f32 %v15618_v0, %v109_v3  ;;  %s15481_s0 = smov 96   ;;  %s15482_s12 = smov 64  }
  0x4e   :  { %v15645_v14 = vand.u32 4294901760, %v106_v11  ;;  %v15648_v16 = vpack.c.bf16 %v118_v9, %v115_v6  ;;  %v206_v17 = vsub.f32 %v15623_v1, %v112_v4  ;;  %v213_v18 = vsub.f32 %v15628_v2, %v115_v6  ;;  %s15483_s27 = smov 80   ;;  %s15484_s28 = smov 112  }
  0x4f   :  { %v220_v19 = vsub.f32 %v15635_v5, %v118_v9  ;;  %14434 = vmatprep.subr.bf16.mxu0 %v15641_v12  ;;  %v178_v20 = vsub.f32 %v103_v10, %v15643_v13  ;;  %v200_v22 = vand.u32 4294901760, %v199_v15  ;;  %vm644_vm2 = vcmask 130048   ;;  %s15485_s29 = smov 48   ;;  %s15486_s30 = smov 32  }
  0x50   :  { %v188_v21 = vsub.f32 %v106_v11, %v15645_v14  ;;  %14436 = vmatpush3.bf16.msra.mxu0 %v15641_v12  ;;  %v207_v23 = vand.u32 4294901760, %v206_v17  ;;  %v214_v24 = vand.u32 4294901760, %v213_v18  ;;  %v14449_v42 = vpack.c.bf16 %v206_v17, %v199_v15  ;;  %s15488_s24 = smov [#allocation11]  }
  0x51   :  { %v221_v25 = vand.u32 4294901760, %v220_v19  ;;  %14438 = vmatprep.subr.bf16.mxu0 %v15648_v16  ;;  %v179_v26 = vand.u32 4294901760, %v178_v20  ;;  %v201_v28 = vsub.f32 %v199_v15, %v200_v22  ;;  %v14453_v43 = vpack.c.bf16 %v220_v19, %v213_v18 }
  0x52   :  { %v189_v27 = vand.u32 4294901760, %v188_v21  ;;  %v208_v29 = vsub.f32 %v206_v17, %v207_v23  ;;  %v215_v30 = vsub.f32 %v213_v18, %v214_v24  ;;  %v14465_v44 = vpack.c.bf16 %v207_v23, %v200_v22  ;;  %v15732_v18 = vld [vmem:[#allocation7] sm:$0xff]  ;;  %v15738_v23 = vld [vmem:[#allocation7 + $0x8] sm:$0xff] }
  0x53   :  { %v222_v31 = vsub.f32 %v220_v19, %v221_v25  ;;  %v180_v32 = vsub.f32 %v178_v20, %v179_v26  ;;  %v202_v34 = vand.u32 4294901760, %v201_v28  ;;  %v14469_v45 = vpack.c.bf16 %v221_v25, %v214_v24 }
  0x54   :  { %v190_v33 = vsub.f32 %v188_v21, %v189_v27  ;;  %14440 = vmatpush3.bf16.msra.mxu0 %v15648_v16  ;;  %v209_v35 = vand.u32 4294901760, %v208_v29  ;;  %v216_v36 = vand.u32 4294901760, %v215_v30  ;;  %vm639_vm3 = vcmp.gt.f32.partialorder %v15732_v18, 0.5 }
  0x55   :  { %v223_v37 = vand.u32 4294901760, %v222_v31  ;;  %v181_v38 = vand.u32 4294901760, %v180_v32  ;;  %vm1550_vm4 = vcmask 64512   ;;  %vm640_vm5 = vcmp.gt.f32.partialorder %v15738_v23, 0.5 }
  0x56   :  { %v191_v39 = vand.u32 4294901760, %v190_v33  ;;  %v14441_v40 = vpack.c.bf16 %v209_v35, %v202_v34  ;;  %vm12047_vm8 = vcmask 523264  }
  0x57   :  { %v14445_v41 = vpack.c.bf16 %v223_v37, %v216_v36  ;;  %13301 = vmatprep.mubr.f32.mxu0 %v181_v38 }
  0x58   :  { %13302 = vmatmul.mubr.f32.vlgmr.msra.gmra.mrb[0].mxu0 %v191_v39  ;;  %14442 = vmatprep.subr.bf16.mxu0 %v14441_v40 }
  0x59   :  { %14444 = vmatpush3.bf16.msra.mxu0 %v14441_v40  ;;  %13312 = vmatprep.mubr.f32.mxu0 %v15643_v13 }
  0x5a   :  { %14446 = vmatprep.subr.bf16.mxu0 %v14445_v41 }
  0x5d   :  { %14448 = vmatpush3.bf16.msra.mxu0 %v14445_v41 }
  0x5e   :  { %14450 = vmatprep.subr.bf16.mxu0 %v14449_v42 }
  0x60   :  { %13313 = vmatmul.mubr.f32.vlgmr.msra.gmra.mrb[0].mxu0 %v15645_v14 }
  0x61   :  { %14452 = vmatpush3.bf16.msra.mxu0 %v14449_v42  ;;  %13323 = vmatprep.mubr.f32.mxu0 %v178_v20 }
  0x62   :  { %14454 = vmatprep.subr.bf16.mxu0 %v14453_v43 }
  0x65   :  { %14456 = vmatpush3.bf16.msra.mxu0 %v14453_v43 }
  0x66   :  { %14458 = vmatprep.subr.bf16.mxu0 %v15641_v12 }
  0x68   :  { %13324 = vmatmul.mubr.f32.vlgmr.msra.gmra.mrb[0].mxu0 %v188_v21 }
  0x69   :  { %14460 = vmatpush3.bf16.msra.mxu0 %v15641_v12  ;;  %13334 = vmatprep.mubr.f32.mxu0 %v179_v26 }
  0x6a   :  { %14462 = vmatprep.subr.bf16.mxu0 %v15648_v16 }
  0x6d   :  { %14464 = vmatpush3.bf16.msra.mxu0 %v15648_v16 }
  0x6e   :  { %14466 = vmatprep.subr.bf16.mxu0 %v14465_v44 }
  0x70   :  { %13335 = vmatmul.mubr.f32.vlgmr.msra.gmra.mrb[0].mxu0 %v189_v27 }
  0x71   :  { %14468 = vmatpush3.bf16.msra.mxu0 %v14465_v44  ;;  %13345 = vmatprep.mubr.f32.mxu0 %v15643_v13 }
  0x72   :  { %14470 = vmatprep.subr.bf16.mxu0 %v14469_v45 }
  0x75   :  { %14472 = vmatpush3.bf16.msra.mxu0 %v14469_v45 }
  0x76   :  { %14474 = vmatprep.subr.bf16.mxu0 %v15641_v12 }
  0x78   :  { %13346 = vmatmul.mubr.f32.vlgmr.msra.gmra.mrb[0].mxu0 %v15645_v14 }
  0x79   :  { %14476 = vmatpush3.bf16.msra.mxu0 %v15641_v12  ;;  %13356 = vmatprep.mubr.f32.mxu0 %v15643_v13 }
  0x7a   :  { %14478 = vmatprep.subr.bf16.mxu0 %v15648_v16 }
  0x7d   :  { %14480 = vmatpush3.bf16.msra.mxu0 %v15648_v16 }
  0x7e   :  { %13419 = vmatprep.subr.mxu0 %v15479_v46 }
  0x80   :  { %13357 = vmatmul.mubr.f32.vlgmr.msra.gmra.mrb[0].mxu0 %v15645_v14 }
  0x81   :  { %13421 = vmatprep.mubr.msk.f32.mxu0 %vm15480_vm1, %v15479_v46 }
 0x153   :  { %v13358_v48 = vpop.f32.mrb[0].mxu0 }
 0x154   :  { %v626_v49 = vpop.f32.mrb[1].mxu0  ;;  %v15686_v51 = vadd.f32 %v13358_v48, %v12728_v47 }
 0x155   :  { %v15682_v50 = vadd.f32 %v12728_v47, %v626_v49 }
 0x156   :  { %v1098_v6 = vsel %vm644_vm2, %v15686_v51, 0 }
 0x157   :  { %642 = vrot.lane.b32.xlu0 %v15682_v50, %s15481_s0  ;;  %v645_v52 = vsel %vm644_vm2, %v15682_v50, 0  ;;  %v1168_v8 = vand.u32 4294901760, %v1098_v6 }
 0x158   :  { %v715_v53 = vand.u32 4294901760, %v645_v52 }
 0x159   :  { %v1169_v10 = vsub.f32 %v1098_v6, %v1168_v8 }
 0x15a   :  { %v716_v54 = vsub.f32 %v645_v52, %v715_v53 }
 0x15b   :  { %1096 = vrot.lane.b32.xlu0 %v15686_v51, %s15481_s0  ;;  %v1170_v12 = vand.u32 4294901760, %v1169_v10 }
 0x15c   :  { %v717_v55 = vand.u32 4294901760, %v716_v54 }
 0x15d   :  { %v1171_v14 = vsub.f32 %v1169_v10, %v1170_v12 }
 0x15e   :  { %v718_v58 = vsub.f32 %v716_v54, %v717_v55 }
 0x15f   :  { %v1172_v16 = vand.u32 4294901760, %v1171_v14 }
 0x160   :  { %v719_v61 = vand.u32 4294901760, %v718_v58 }
 0x1c9   :  { %v643_v56 = vpop.permute.xlu0 %642 }
 0x1ca   :  { %v647_v57 = vsel %vm644_vm2, %v643_v56, 0 }
 0x1cb   :  { %v650_v59 = vand.u32 4294901760, %v647_v57 }
 0x1cd   :  { %v727_v60 = vsub.f32 %v647_v57, %v650_v59  ;;  %13360 = vmatpush3.xpose.msra.mxu1 %v650_v59  ;;  %v1097_v4 = vpop.permute.xlu0 %1096 }
 0x1ce   :  { %13364 = vmatprep.subr.mxu1 %v15479_v46  ;;  %v1100_v7 = vsel %vm644_vm2, %v1097_v4, 0 }
 0x1cf   :  { %v728_v62 = vand.u32 4294901760, %v727_v60  ;;  %v1103_v9 = vand.u32 4294901760, %v1100_v7 }
 0x1d0   :  { %13362 = vmatmul.mubr.f32.vlgmr.msra.gmra.mrb[0].mxu1 %v719_v61 }
 0x1d1   :  { %v729_v63 = vsub.f32 %v727_v60, %v728_v62  ;;  %13366 = vmatprep.mubr.msk.f32.mxu1 %vm15480_vm1, %v15479_v46  ;;  %v1180_v11 = vsub.f32 %v1100_v7, %v1103_v9 }
 0x1d3   :  { %v730_v3 = vand.u32 4294901760, %v729_v63  ;;  %v1181_v13 = vand.u32 4294901760, %v1180_v11 }
 0x1d5   :  { %13365 = vmatpush3.xpose.msra.mxu1 %v730_v3  ;;  %v1182_v15 = vsub.f32 %v1180_v11, %v1181_v13 }
 0x1d6   :  { %13369 = vmatprep.subr.mxu1 %v15479_v46 }
 0x1d7   :  { %v1183_v17 = vand.u32 4294901760, %v1182_v15 }
 0x1d8   :  { %13367 = vmatmul.mubr.f32.vlgmr.msra.gmra.mrb[0].mxu1 %v715_v53 }
 0x1d9   :  { %13370 = vmatpush3.xpose.msra.mxu1 %v727_v60  ;;  %13371 = vmatprep.mubr.msk.f32.mxu1 %vm15480_vm1, %v15479_v46 }
 0x1da   :  { %13374 = vmatprep.subr.mxu1 %v15479_v46 }
 0x1e0   :  { %13372 = vmatmul.mubr.f32.vlgmr.msra.gmra.mrb[0].mxu1 %v716_v54 }
 0x1e1   :  { %13375 = vmatpush3.xpose.msra.mxu1 %v650_v59  ;;  %13376 = vmatprep.mubr.msk.f32.mxu1 %vm15480_vm1, %v15479_v46 }
 0x1e2   :  { %13379 = vmatprep.subr.mxu1 %v15479_v46 }
 0x1e8   :  { %13377 = vmatmul.mubr.f32.vlgmr.msra.gmra.mrb[0].mxu1 %v717_v55 }
 0x1e9   :  { %13380 = vmatpush3.xpose.msra.mxu1 %v728_v62  ;;  %13381 = vmatprep.mubr.msk.f32.mxu1 %vm15480_vm1, %v15479_v46 }
 0x1ea   :  { %13384 = vmatprep.subr.mxu1 %v15479_v46 }
 0x1f0   :  { %13382 = vmatmul.mubr.f32.vlgmr.msra.gmra.mrb[0].mxu1 %v715_v53 }
 0x1f1   :  { %13385 = vmatpush3.xpose.msra.mxu1 %v650_v59  ;;  %13386 = vmatprep.mubr.msk.f32.mxu1 %vm15480_vm1, %v15479_v46 }
 0x1f2   :  { %13389 = vmatprep.subr.mxu1 %v15479_v46 }
 0x1f8   :  { %13387 = vmatmul.mubr.f32.vlgmr.msra.gmra.mrb[0].mxu1 %v715_v53 }
 0x1f9   :  { %13390 = vmatpush3.xpose.msra.mxu1 %v1103_v9  ;;  %13391 = vmatprep.mubr.msk.f32.mxu1 %vm15480_vm1, %v15479_v46 }
 0x1fa   :  { %13394 = vmatprep.subr.mxu1 %v15479_v46 }
 0x1fc   :  { %13392 = vmatmul.mubr.f32.vlgmr.msra.gmra.mrb[2].mxu1 %v1172_v16 }
 0x1fd   :  { %13395 = vmatpush3.xpose.msra.mxu1 %v1183_v17  ;;  %13396 = vmatprep.mubr.msk.f32.mxu1 %vm15480_vm1, %v15479_v46 }
 0x1fe   :  { %13399 = vmatprep.subr.mxu1 %v15479_v46 }
 0x204   :  { %13397 = vmatmul.mubr.f32.vlgmr.msra.gmra.mrb[2].mxu1 %v1168_v8 }
 0x205   :  { %13400 = vmatpush3.xpose.msra.mxu1 %v1180_v11  ;;  %13401 = vmatprep.mubr.msk.f32.mxu1 %vm15480_vm1, %v15479_v46 }
 0x206   :  { %13404 = vmatprep.subr.mxu1 %v15479_v46 }
 0x20c   :  { %13402 = vmatmul.mubr.f32.vlgmr.msra.gmra.mrb[2].mxu1 %v1169_v10 }
 0x20d   :  { %13405 = vmatpush3.xpose.msra.mxu1 %v1103_v9  ;;  %13406 = vmatprep.mubr.msk.f32.mxu1 %vm15480_vm1, %v15479_v46 }
 0x20e   :  { %13409 = vmatprep.subr.mxu1 %v15479_v46 }
 0x214   :  { %13407 = vmatmul.mubr.f32.vlgmr.msra.gmra.mrb[2].mxu1 %v1170_v12 }
 0x215   :  { %13410 = vmatpush3.xpose.msra.mxu1 %v1181_v13  ;;  %13411 = vmatprep.mubr.msk.f32.mxu1 %vm15480_vm1, %v15479_v46 }
 0x216   :  { %13414 = vmatprep.subr.mxu1 %v15479_v46 }
 0x21c   :  { %13412 = vmatmul.mubr.f32.vlgmr.msra.gmra.mrb[2].mxu1 %v1168_v8 }
 0x21d   :  { %13415 = vmatpush3.xpose.msra.mxu1 %v1103_v9  ;;  %13416 = vmatprep.mubr.msk.f32.mxu1 %vm15480_vm1, %v15479_v46 }
 0x21e   :  { %13449 = vmatprep.subr.mxu1 %v15479_v46 }
 0x224   :  { %13417 = vmatmul.mubr.f32.vlgmr.msra.gmra.mrb[2].mxu1 %v1168_v8 }
 0x225   :  { %13451 = vmatprep.mubr.msk.f32.mxu1 %vm15480_vm1, %v15479_v46 }
 0x2cb   :  { %v1091_v19 = vpop.f32.mrb[0].mxu1 }
 0x2cc   :  { %v1548_v20 = vsel %vm639_vm3, -1e+09, %v1091_v19  ;;  %v13388_v21 = vpop.f32.mrb[1].mxu1 }
 0x2cd   :  { %v1551_v22 = vsel %vm1550_vm4, %v1548_v20, -inf }
 0x2ce   :  { %1552 = vmax.xlane.f32.xlu1 %v1551_v22 }
 0x2f7   :  { %v1544_v24 = vpop.f32.mrb[2].mxu1 }
 0x2f8   :  { %v1549_v25 = vsel %vm640_vm5, -1e+09, %v1544_v24  ;;  %v13418_v26 = vpop.f32.mrb[3].mxu1 }
 0x2f9   :  { %v1554_v27 = vsel %vm1550_vm4, %v1549_v25, -inf }
 0x2fa   :  { %1555 = vmax.xlane.f32.xlu1 %v1554_v27 }
 0x30b   :  { %1575 = vrot.lane.b32.xlu1 %v15682_v50, %s15482_s12 }
 0x35b   :  { %v1553_v28 = vpop.xlane.xlu1 %1552 }
 0x35c   :  { %v1557_v29 = vsub.f32 %v1548_v20, %v1553_v28 }
 0x35e   :  { %v1559_v30 = vmul.f32 1.442695, %v1557_v29 }
 0x360   :  { %15255 = vpow2.f32 %v1559_v30 }
 0x36a   :  { %v15256_v31 = vpop.eup %15255 }
 0x36b   :  { %v1563_v32 = vsel %vm1550_vm4, %v15256_v31, 0.0 }
 0x36c   :  { %1564 = vadd.xlane.f32.xlu0 %v1563_v32 }
 0x382   :  { %2481 = vrot.lane.b32.xlu0 %v15682_v50, %s15483_s27 }
 0x387   :  { %v1556_v33 = vpop.xlane.xlu1 %1555 }
 0x388   :  { %v1558_v34 = vsub.f32 %v1549_v25, %v1556_v33 }
 0x38a   :  { %v1561_v35 = vmul.f32 1.442695, %v1558_v34 }
 0x38b   :  { %v1576_v36 = vpop.permute.xlu1 %1575 }
 0x38c   :  { %15257 = vpow2.f32 %v1561_v35  ;;  %v1582_v37 = vand.u32 4294901760, %v1576_v36 }
 0x38e   :  { %13420 = vmatpush3.msra.mxu0 %v1582_v37  ;;  %v1659_v42 = vsub.f32 %v1576_v36, %v1582_v37 }
 0x38f   :  { %13424 = vmatprep.subr.mxu0 %v15479_v46 }
 0x390   :  { %v1660_v47 = vand.u32 4294901760, %v1659_v42 }
 0x392   :  { %v1661_v52 = vsub.f32 %v1659_v42, %v1660_v47 }
 0x394   :  { %v1662_v55 = vand.u32 4294901760, %v1661_v52 }
 0x396   :  { %v15258_v38 = vpop.eup %15257 }
 0x397   :  { %v1566_v39 = vsel %vm1550_vm4, %v15258_v38, 0.0 }
 0x398   :  { %1567 = vadd.xlane.f32.xlu1 %v1566_v39 }
 0x3a9   :  { %2027 = vrot.lane.b32.xlu1 %v15686_v51, %s15482_s12 }
 0x3ad   :  { %2479 = vrot.lane.b32.xlu1 %v15682_v50, %s15484_s28 }
 0x3b1   :  { %2933 = vrot.lane.b32.xlu1 %v15686_v51, %s15484_s28 }
 0x3b5   :  { %2935 = vrot.lane.b32.xlu1 %v15686_v51, %s15483_s27 }
 0x3f9   :  { %v1565_v40 = vpop.xlane.xlu0 %1564 }
 0x3fa   :  { %15259 = vrcp.f32 %v1565_v40 }
 0x3fd   :  { %v2482_v57 = vpop.permute.xlu0 %2481 }
 0x3fe   :  { %v2485_v59 = vsel %vm644_vm2, %v2482_v57, 0 }
 0x3ff   :  { %v15775_v61 = vand.u32 4294901760, %v2485_v59 }
 0x401   :  { %v2565_v6 = vsub.f32 %v2485_v59, %v15775_v61 }
 0x403   :  { %v2566_v13 = vand.u32 4294901760, %v2565_v6 }
 0x404   :  { %v15260_v41 = vpop.eup %15259 }
 0x405   :  { %v1571_v43 = vmul.f32 %v15260_v41, %v15256_v31  ;;  %v2567_v19 = vsub.f32 %v2565_v6, %v2566_v13 }
 0x407   :  { %1573 = vst.msk [vmem:[#allocation11] sm:$0xff] %vm1550_vm4, %v1571_v43  ;;  %v1579_v44 = vsel %vm1550_vm4, %v1571_v43, 0  ;;  %v2568_v25 = vand.u32 4294901760, %v2567_v19 }
 0x408   :  { %v1647_v45 = vand.u32 4294901760, %v1579_v44 }
 0x40a   :  { %v1648_v48 = vsub.f32 %v1579_v44, %v1647_v45 }
 0x40c   :  { %v1649_v49 = vand.u32 4294901760, %v1648_v48 }
 0x40e   :  { %v1650_v53 = vsub.f32 %v1648_v48, %v1649_v49 }
 0x410   :  { %v1651_v54 = vand.u32 4294901760, %v1650_v53 }
 0x412   :  { %13422 = vmatmul.mubr.f32.vlgmr.msra.gmra.mrb[2].mxu0 %v1651_v54 }
 0x413   :  { %13425 = vmatpush3.msra.mxu0 %v1662_v55  ;;  %13426 = vmatprep.mubr.msk.f32.mxu0 %vm15480_vm1, %v15479_v46 }
 0x414   :  { %13429 = vmatprep.subr.mxu0 %v15479_v46 }
 0x41a   :  { %13427 = vmatmul.mubr.f32.vlgmr.msra.gmra.mrb[2].mxu0 %v1647_v45 }
 0x41b   :  { %13430 = vmatpush3.msra.mxu0 %v1659_v42  ;;  %13431 = vmatprep.mubr.msk.f32.mxu0 %vm15480_vm1, %v15479_v46 }
 0x41c   :  { %13434 = vmatprep.subr.mxu0 %v15479_v46 }
 0x422   :  { %13432 = vmatmul.mubr.f32.vlgmr.msra.gmra.mrb[2].mxu0 %v1648_v48 }
 0x423   :  { %13435 = vmatpush3.msra.mxu0 %v1582_v37  ;;  %13436 = vmatprep.mubr.msk.f32.mxu0 %vm15480_vm1, %v15479_v46 }
 0x424   :  { %13439 = vmatprep.subr.mxu0 %v15479_v46 }
 0x425   :  { %v1568_v56 = vpop.xlane.xlu1 %1567 }
 0x426   :  { %15261 = vrcp.f32 %v1568_v56 }
 0x429   :  { %v2028_v58 = vpop.permute.xlu1 %2027 }
 0x42a   :  { %v15769_v60 = vand.u32 4294901760, %v2028_v58  ;;  %13437 = vmatmul.mubr.f32.vlgmr.msra.gmra.mrb[2].mxu0 %v1649_v49 }
 0x42b   :  { %13440 = vmatpush3.msra.mxu0 %v1660_v47  ;;  %13441 = vmatprep.mubr.msk.f32.mxu0 %vm15480_vm1, %v15479_v46 }
 0x42c   :  { %13450 = vmatpush3.msra.mxu1 %v15769_v60  ;;  %13444 = vmatprep.subr.mxu0 %v15479_v46  ;;  %v2111_v8 = vsub.f32 %v2028_v58, %v15769_v60 }
 0x42d   :  { %v2480_v62 = vpop.permute.xlu1 %2479  ;;  %13454 = vmatprep.subr.mxu1 %v15479_v46 }
 0x42e   :  { %v2483_v63 = vsel %vm644_vm2, %v2480_v62, 0  ;;  %v2112_v14 = vand.u32 4294901760, %v2111_v8 }
 0x42f   :  { %v15779_v3 = vand.u32 4294901760, %v2483_v63 }
 0x430   :  { %v15262_v4 = vpop.eup %15261  ;;  %v2113_v20 = vsub.f32 %v2111_v8, %v2112_v14 }
 0x431   :  { %v1572_v7 = vmul.f32 %v15262_v4, %v15258_v38  ;;  %v2554_v9 = vsub.f32 %v2483_v63, %v15779_v3  ;;  %v2934_v27 = vpop.permute.xlu1 %2933 }
 0x432   :  { %13442 = vmatmul.mubr.f32.vlgmr.msra.gmra.mrb[2].mxu0 %v1647_v45  ;;  %v2114_v26 = vand.u32 4294901760, %v2113_v20  ;;  %v2937_v29 = vsel %vm644_vm2, %v2934_v27, 0 }
 0x433   :  { %1574 = vst.msk [vmem:[#allocation11 + $0x10] sm:$0xff] %vm1550_vm4, %v1572_v7  ;;  %13445 = vmatpush3.msra.mxu0 %v1582_v37  ;;  %13446 = vmatprep.mubr.msk.f32.mxu0 %vm15480_vm1, %v15479_v46  ;;  %v2031_v10 = vsel %vm1550_vm4, %v1572_v7, 0  ;;  %v2555_v11 = vand.u32 4294901760, %v2554_v9  ;;  %v3007_v31 = vand.u32 4294901760, %v2937_v29 }
 0x434   :  { %13479 = vmatprep.subr.mxu0 %v15479_v46  ;;  %v15789_v12 = vand.u32 4294901760, %v2031_v10 }
 0x435   :  { %v2556_v16 = vsub.f32 %v2554_v9, %v2555_v11  ;;  %v2936_v28 = vpop.permute.xlu1 %2935  ;;  %v3008_v33 = vsub.f32 %v2937_v29, %v3007_v31 }
 0x436   :  { %v2100_v15 = vsub.f32 %v2031_v10, %v15789_v12  ;;  %v2939_v30 = vsel %vm644_vm2, %v2936_v28, 0 }
 0x437   :  { %v2557_v22 = vand.u32 4294901760, %v2556_v16  ;;  %v2942_v32 = vand.u32 4294901760, %v2939_v30  ;;  %v3009_v35 = vand.u32 4294901760, %v3008_v33 }
 0x438   :  { %v2101_v17 = vand.u32 4294901760, %v2100_v15 }
 0x439   :  { %v3019_v34 = vsub.f32 %v2939_v30, %v2942_v32  ;;  %v3010_v37 = vsub.f32 %v3008_v33, %v3009_v35 }
 0x43a   :  { %13447 = vmatmul.mubr.f32.vlgmr.msra.gmra.mrb[2].mxu0 %v1647_v45  ;;  %v2102_v21 = vsub.f32 %v2100_v15, %v2101_v17 }
 0x43b   :  { %13480 = vmatpush3.xpose.msra.mxu0 %v15775_v61  ;;  %13481 = vmatprep.mubr.msk.f32.mxu0 %vm15480_vm1, %v15479_v46  ;;  %v3020_v36 = vand.u32 4294901760, %v3019_v34  ;;  %v3011_v39 = vand.u32 4294901760, %v3010_v37 }
 0x43c   :  { %13484 = vmatprep.subr.mxu0 %v15479_v46  ;;  %v2103_v24 = vand.u32 4294901760, %v2102_v21 }
 0x43d   :  { %v3021_v38 = vsub.f32 %v3019_v34, %v3020_v36 }
 0x43e   :  { %13452 = vmatmul.mubr.f32.vlgmr.msra.gmra.mrb[4].mxu1 %v2103_v24  ;;  %13482 = vmatmul.mubr.f32.vlgmr.msra.gmra.mrb[4].mxu0 %v2557_v22 }
 0x43f   :  { %13455 = vmatpush3.msra.mxu1 %v2114_v26  ;;  %13485 = vmatpush3.xpose.msra.mxu0 %v2568_v25  ;;  %v3022_v40 = vand.u32 4294901760, %v3021_v38 }
 0x440   :  { %13456 = vmatprep.mubr.msk.f32.mxu1 %vm15480_vm1, %v15479_v46  ;;  %13459 = vmatprep.subr.mxu1 %v15479_v46 }
 0x441   :  { %13486 = vmatprep.mubr.msk.f32.mxu0 %vm15480_vm1, %v15479_v46  ;;  %13489 = vmatprep.subr.mxu0 %v15479_v46 }
 0x446   :  { %13457 = vmatmul.mubr.f32.vlgmr.msra.gmra.mrb[4].mxu1 %v15789_v12  ;;  %13487 = vmatmul.mubr.f32.vlgmr.msra.gmra.mrb[4].mxu0 %v15779_v3 }
 0x447   :  { %13460 = vmatpush3.msra.mxu1 %v2111_v8  ;;  %13490 = vmatpush3.xpose.msra.mxu0 %v2565_v6 }
 0x448   :  { %13461 = vmatprep.mubr.msk.f32.mxu1 %vm15480_vm1, %v15479_v46  ;;  %13464 = vmatprep.subr.mxu1 %v15479_v46 }
 0x449   :  { %13491 = vmatprep.mubr.msk.f32.mxu0 %vm15480_vm1, %v15479_v46  ;;  %13494 = vmatprep.subr.mxu0 %v15479_v46 }
 0x44e   :  { %13462 = vmatmul.mubr.f32.vlgmr.msra.gmra.mrb[4].mxu1 %v2100_v15  ;;  %13492 = vmatmul.mubr.f32.vlgmr.msra.gmra.mrb[4].mxu0 %v2554_v9 }
 0x44f   :  { %13465 = vmatpush3.msra.mxu1 %v15769_v60  ;;  %13495 = vmatpush3.xpose.msra.mxu0 %v15775_v61 }
 0x450   :  { %13466 = vmatprep.mubr.msk.f32.mxu1 %vm15480_vm1, %v15479_v46  ;;  %13469 = vmatprep.subr.mxu1 %v15479_v46 }
 0x451   :  { %13496 = vmatprep.mubr.msk.f32.mxu0 %vm15480_vm1, %v15479_v46  ;;  %13499 = vmatprep.subr.mxu0 %v15479_v46 }
 0x456   :  { %13467 = vmatmul.mubr.f32.vlgmr.msra.gmra.mrb[4].mxu1 %v2101_v17  ;;  %13497 = vmatmul.mubr.f32.vlgmr.msra.gmra.mrb[4].mxu0 %v2555_v11 }
 0x457   :  { %13470 = vmatpush3.msra.mxu1 %v2112_v14  ;;  %13500 = vmatpush3.xpose.msra.mxu0 %v2566_v13 }
 0x458   :  { %13471 = vmatprep.mubr.msk.f32.mxu1 %vm15480_vm1, %v15479_v46  ;;  %13474 = vmatprep.subr.mxu1 %v15479_v46 }
 0x459   :  { %13501 = vmatprep.mubr.msk.f32.mxu0 %vm15480_vm1, %v15479_v46  ;;  %13504 = vmatprep.subr.mxu0 %v15479_v46 }
 0x45e   :  { %13472 = vmatmul.mubr.f32.vlgmr.msra.gmra.mrb[4].mxu1 %v15789_v12  ;;  %13502 = vmatmul.mubr.f32.vlgmr.msra.gmra.mrb[4].mxu0 %v15779_v3 }
 0x45f   :  { %13475 = vmatpush3.msra.mxu1 %v15769_v60  ;;  %13505 = vmatpush3.xpose.msra.mxu0 %v15775_v61 }
 0x460   :  { %13476 = vmatprep.mubr.msk.f32.mxu1 %vm15480_vm1, %v15479_v46  ;;  %13506 = vmatprep.mubr.msk.f32.mxu0 %vm15480_vm1, %v15479_v46 }
 0x461   :  { %13509 = vmatprep.subr.mxu1 %v15479_v46  ;;  %13539 = vmatprep.subr.mxu0 %v15479_v46 }
 0x466   :  { %13477 = vmatmul.mubr.f32.vlgmr.msra.gmra.mrb[4].mxu1 %v15789_v12  ;;  %13507 = vmatmul.mubr.f32.vlgmr.msra.gmra.mrb[4].mxu0 %v15779_v3 }
 0x467   :  { %13510 = vmatpush3.xpose.msra.mxu1 %v2942_v32  ;;  %13511 = vmatprep.mubr.msk.f32.mxu1 %vm15480_vm1, %v15479_v46 }
 0x468   :  { %13514 = vmatprep.subr.mxu1 %v15479_v46  ;;  %13541 = vmatprep.mubr.msk.f32.mxu0 %vm15480_vm1, %v15479_v46 }
 0x46a   :  { %13512 = vmatmul.mubr.f32.vlgmr.msra.gmra.mrb[6].mxu1 %v3011_v39 }
 0x46b   :  { %13515 = vmatpush3.xpose.msra.mxu1 %v3022_v40  ;;  %13516 = vmatprep.mubr.msk.f32.mxu1 %vm15480_vm1, %v15479_v46 }
 0x46c   :  { %13519 = vmatprep.subr.mxu1 %v15479_v46 }
 0x472   :  { %13517 = vmatmul.mubr.f32.vlgmr.msra.gmra.mrb[6].mxu1 %v3007_v31 }
 0x473   :  { %13520 = vmatpush3.xpose.msra.mxu1 %v3019_v34  ;;  %13521 = vmatprep.mubr.msk.f32.mxu1 %vm15480_vm1, %v15479_v46 }
 0x474   :  { %13524 = vmatprep.subr.mxu1 %v15479_v46 }
 0x47a   :  { %13522 = vmatmul.mubr.f32.vlgmr.msra.gmra.mrb[6].mxu1 %v3008_v33 }
 0x47b   :  { %13525 = vmatpush3.xpose.msra.mxu1 %v2942_v32  ;;  %13526 = vmatprep.mubr.msk.f32.mxu1 %vm15480_vm1, %v15479_v46 }
 0x47c   :  { %13529 = vmatprep.subr.mxu1 %v15479_v46 }
 0x482   :  { %13527 = vmatmul.mubr.f32.vlgmr.msra.gmra.mrb[6].mxu1 %v3009_v35 }
 0x483   :  { %13530 = vmatpush3.xpose.msra.mxu1 %v3020_v36  ;;  %13531 = vmatprep.mubr.msk.f32.mxu1 %vm15480_vm1, %v15479_v46 }
 0x484   :  { %13534 = vmatprep.subr.mxu1 %v15479_v46 }
 0x48a   :  { %13532 = vmatmul.mubr.f32.vlgmr.msra.gmra.mrb[6].mxu1 %v3007_v31 }
 0x48b   :  { %13535 = vmatpush3.xpose.msra.mxu1 %v2942_v32  ;;  %13536 = vmatprep.mubr.msk.f32.mxu1 %vm15480_vm1, %v15479_v46 }
 0x48c   :  { %13569 = vmatprep.subr.mxu1 %v15479_v46 }
 0x492   :  { %13537 = vmatmul.mubr.f32.vlgmr.msra.gmra.mrb[6].mxu1 %v3007_v31 }
 0x493   :  { %13571 = vmatprep.mubr.msk.f32.mxu1 %vm15480_vm1, %v15479_v46 }
 0x50d   :  { %v15860_v41 = vpop.f32.mrb[2].mxu0 }
 0x50e   :  { %v13448_v42 = vpop.f32.mrb[3].mxu0 }
 0x539   :  { %v15862_v43 = vpop.f32.mrb[4].mxu1  ;;  %v2929_v44 = vpop.f32.mrb[4].mxu0 }
 0x53a   :  { %v3387_v45 = vsel %vm639_vm3, -1e+09, %v2929_v44  ;;  %v13478_v47 = vpop.f32.mrb[5].mxu1  ;;  %v13508_v48 = vpop.f32.mrb[5].mxu0 }
 0x53b   :  { %v3389_v49 = vsel %vm1550_vm4, %v3387_v45, -inf }
 0x53c   :  { %3390 = vmax.xlane.f32.xlu1 %v3389_v49 }
 0x565   :  { %v3383_v52 = vpop.f32.mrb[6].mxu1 }
 0x566   :  { %v3388_v53 = vsel %vm640_vm5, -1e+09, %v3383_v52  ;;  %v13538_v54 = vpop.f32.mrb[7].mxu1 }
 0x567   :  { %v3392_v55 = vsel %vm1550_vm4, %v3388_v53, -inf }
 0x568   :  { %3393 = vmax.xlane.f32.xlu0 %v3392_v55 }
 0x57e   :  { %3866 = vrot.lane.b32.xlu0 %v15686_v51, %s15485_s29 }
 0x582   :  { %4836 = vrot.lane.b32.xlu0 %v15618_v0, %s15486_s30 }
 0x5c9   :  { %v3391_v56 = vpop.xlane.xlu1 %3390 }
 0x5ca   :  { %v3395_v57 = vsub.f32 %v3387_v45, %v3391_v56 }
 0x5cc   :  { %v3397_v18 = vmul.f32 1.442695, %v3395_v57 }
 0x5ce   :  { %15263 = vpow2.f32 %v3397_v18 }
 0x5d8   :  { %v15264_v58 = vpop.eup %15263 }
 0x5d9   :  { %v3401_v59 = vsel %vm1550_vm4, %v15264_v58, 0.0 }
 0x5da   :  { %3402 = vadd.xlane.f32.xlu1 %v3401_v59 }
 0x5f5   :  { %v3394_v60 = vpop.xlane.xlu0 %3393 }
 0x5f6   :  { %v3396_v61 = vsub.f32 %v3388_v53, %v3394_v60 }
 0x5f8   :  { %v3399_v62 = vmul.f32 1.442695, %v3396_v61 }
 0x5f9   :  { %v3867_v23 = vpop.permute.xlu0 %3866 }
 0x5fa   :  { %15265 = vpow2.f32 %v3399_v62  ;;  %v15872_v63 = vand.u32 4294901760, %v3867_v23 }
 0x5fc   :  { %13570 = vmatpush3.msra.mxu1 %v15872_v63  ;;  %v3950_v16 = vsub.f32 %v3867_v23, %v15872_v63 }
 0x5fd   :  { %13574 = vmatprep.subr.mxu1 %v15479_v46 }
 0x5fe   :  { %v3951_v22 = vand.u32 4294901760, %v3950_v16 }
 0x600   :  { %v3952_v26 = vsub.f32 %v3950_v16, %v3951_v22 }
 0x602   :  { %v3953_v29 = vand.u32 4294901760, %v3952_v26 }
 0x604   :  { %v15266_v51 = vpop.eup %15265 }
 0x605   :  { %v3404_v3 = vsel %vm1550_vm4, %v15266_v51, 0.0 }
 0x606   :  { %3405 = vadd.xlane.f32.xlu1 %v3404_v3 }
 0x617   :  { %3414 = vrot.lane.b32.xlu1 %v15682_v50, %s15485_s29 }
 0x61b   :  { %4320 = vrot.lane.b32.xlu1 %v15628_v2, %s15486_s30 }
 0x61f   :  { %4322 = vrot.lane.b32.xlu1 %v15635_v5, %s15486_s30 }
 0x623   :  { %4838 = vrot.lane.b32.xlu1 %v15623_v1, %s15486_s30 }
 0x667   :  { %v3403_v4 = vpop.xlane.xlu1 %3402 }
 0x668   :  { %15267 = vrcp.f32 %v3403_v4  ;;  %v4837_v4 = vpop.permute.xlu0 %4836 }
 0x672   :  { %v15268_v6 = vpop.eup %15267 }
 0x673   :  { %v3409_v7 = vmul.f32 %v15268_v6, %v15264_v58 }
 0x675   :  { %3412 = vst.msk [vmem:[#allocation11 + $0x8] sm:$0xff] %vm1550_vm4, %v3409_v7  ;;  %v3418_v50 = vsel %vm1550_vm4, %v3409_v7, 0  ;;  %v4849_v7 = vand.u32 4294901760, %v4837_v4 }
 0x676   :  { %v3486_v8 = vand.u32 4294901760, %v3418_v50 }
 0x678   :  { %v3487_v9 = vsub.f32 %v3418_v50, %v3486_v8  ;;  %v4843_v50 = vsel %vm644_vm2, %v15860_v41, 0 }
 0x67a   :  { %v3488_v2 = vand.u32 4294901760, %v3487_v9 }
 0x67c   :  { %v3489_v0 = vsub.f32 %v3487_v9, %v3488_v2 }
 0x67e   :  { %v3490_v5 = vand.u32 4294901760, %v3489_v0 }
 0x693   :  { %v3406_v10 = vpop.xlane.xlu1 %3405 }
 0x694   :  { %15269 = vrcp.f32 %v3406_v10 }
 0x697   :  { %v3415_v11 = vpop.permute.xlu1 %3414 }
 0x698   :  { %v3421_v12 = vand.u32 4294901760, %v3415_v11 }
 0x69a   :  { %v3498_v13 = vsub.f32 %v3415_v11, %v3421_v12  ;;  %13540 = vmatpush3.msra.mxu0 %v3421_v12 }
 0x69b   :  { %13542 = vmatmul.mubr.f32.vlgmr.msra.gmra.mrb[6].mxu0 %v3490_v5  ;;  %13544 = vmatprep.subr.mxu0 %v15479_v46  ;;  %v4321_v30 = vpop.permute.xlu1 %4320 }
 0x69c   :  { %v3499_v1 = vand.u32 4294901760, %v3498_v13  ;;  %13546 = vmatprep.mubr.msk.f32.mxu0 %vm15480_vm1, %v15479_v46  ;;  %v4333_v31 = vand.u32 4294901760, %v4321_v30 }
 0x69e   :  { %v15270_v14 = vpop.eup %15269  ;;  %v3500_v15 = vsub.f32 %v3498_v13, %v3499_v1  ;;  %v4421_v32 = vsub.f32 %v4321_v30, %v4333_v31 }
 0x69f   :  { %v3410_v17 = vmul.f32 %v15270_v14, %v15266_v51  ;;  %v4323_v33 = vpop.permute.xlu1 %4322 }
 0x6a0   :  { %v3501_v19 = vand.u32 4294901760, %v3500_v15  ;;  %v4336_v34 = vand.u32 4294901760, %v4323_v33  ;;  %v4422_v35 = vand.u32 4294901760, %v4421_v32 }
 0x6a1   :  { %3413 = vst.msk [vmem:[#allocation11 + $0x18] sm:$0xff] %vm1550_vm4, %v3410_v17  ;;  %v3870_v20 = vsel %vm1550_vm4, %v3410_v17, 0 }
 0x6a2   :  { %13545 = vmatpush3.msra.mxu0 %v3501_v19  ;;  %v3938_v21 = vand.u32 4294901760, %v3870_v20  ;;  %v15922_v36 = vpack.c.bf16 %v4336_v34, %v4333_v31  ;;  %v4428_v37 = vsub.f32 %v4323_v33, %v4336_v34  ;;  %v4423_v39 = vsub.f32 %v4421_v32, %v4422_v35  ;;  %v15304_v34 = vld [vmem:[#allocation2] sm:$0xff] }
 0x6a3   :  { %13547 = vmatmul.mubr.f32.vlgmr.msra.gmra.mrb[6].mxu0 %v3486_v8  ;;  %13549 = vmatprep.subr.mxu0 %v15479_v46  ;;  %v4839_v3 = vpop.permute.xlu1 %4838 }
 0x6a4   :  { %13550 = vmatpush3.msra.mxu0 %v3498_v13  ;;  %13551 = vmatprep.mubr.msk.f32.mxu0 %vm15480_vm1, %v15479_v46  ;;  %v3939_v24 = vsub.f32 %v3870_v20, %v3938_v21  ;;  %v4429_v38 = vand.u32 4294901760, %v4428_v37  ;;  %v14489_v42 = vpack.c.bf16 %v4428_v37, %v4421_v32  ;;  %v4424_v44 = vand.u32 4294901760, %v4423_v39  ;;  %v15303_v32 = vld [vmem:[#allocation2 + $0x8] sm:$0xff]  ;;  %v5400_v39 = vld [vmem:[%s16748_s4 + $0x20] sm:$0xff] }
 0x6a5   :  { %13554 = vmatprep.subr.mxu0 %v15479_v46  ;;  %v4852_v6 = vand.u32 4294901760, %v4839_v3 }
 0x6a6   :  { %v3940_v25 = vand.u32 4294901760, %v3939_v24  ;;  %v4430_v40 = vsub.f32 %v4428_v37, %v4429_v38  ;;  %v14497_v47 = vpack.c.bf16 %v4429_v38, %v4422_v35  ;;  %v5399_v38 = vld [vmem:[%s16748_s4 + $0x8] sm:$0xff] }
 0x6a8   :  { %v3941_v27 = vsub.f32 %v3939_v24, %v3940_v25  ;;  %v4431_v45 = vand.u32 4294901760, %v4430_v40  ;;  %v5415_v40 = vand.u32 4294901760, %v5399_v38 }
 0x6aa   :  { %v3942_v28 = vand.u32 4294901760, %v3941_v27  ;;  %v14485_v48 = vpack.c.bf16 %v4431_v45, %v4424_v44  ;;  %v12729_v27 = vld [vmem:[%s16750_s6 + $0x1] ss:$0 sm:$0xff]  ;;  %v5401_v44 = vld [vmem:[%s16748_s4 + $0x38] sm:$0xff] }
 0x6ab   :  { %13552 = vmatmul.mubr.f32.vlgmr.msra.gmra.mrb[6].mxu0 %v3487_v9  ;;  %v4937_v9 = vsub.f32 %v4837_v4, %v4849_v7 }
 0x6ac   :  { %13555 = vmatpush3.msra.mxu0 %v3421_v12  ;;  %13572 = vmatmul.mubr.f32.vlgmr.msra.gmra.mrb[8].mxu1 %v3942_v28 }
 0x6ad   :  { %13575 = vmatpush3.msra.mxu1 %v3953_v29  ;;  %13556 = vmatprep.mubr.msk.f32.mxu0 %vm15480_vm1, %v15479_v46  ;;  %v4938_v0 = vand.u32 4294901760, %v4937_v9 }
 0x6ae   :  { %13559 = vmatprep.subr.mxu0 %v15479_v46  ;;  %13576 = vmatprep.mubr.msk.f32.mxu1 %vm15480_vm1, %v15479_v46 }
 0x6af   :  { %13579 = vmatprep.subr.mxu1 %v15479_v46  ;;  %v4939_v14 = vsub.f32 %v4937_v9, %v4938_v0 }
 0x6b3   :  { %13557 = vmatmul.mubr.f32.vlgmr.msra.gmra.mrb[6].mxu0 %v3488_v2  ;;  %v4915_v2 = vand.u32 4294901760, %v4843_v50 }
 0x6b4   :  { %13560 = vmatpush3.msra.mxu0 %v3499_v1  ;;  %13577 = vmatmul.mubr.f32.vlgmr.msra.gmra.mrb[8].mxu1 %v3938_v21  ;;  %v14505_v1 = vpack.c.bf16 %v4852_v6, %v4849_v7  ;;  %v5505_v7 = vsub.f32 %v5399_v38, %v5415_v40 }
 0x6b5   :  { %13580 = vmatpush3.msra.mxu1 %v3950_v16  ;;  %13561 = vmatprep.mubr.msk.f32.mxu0 %vm15480_vm1, %v15479_v46  ;;  %v4916_v11 = vsub.f32 %v4843_v50, %v4915_v2  ;;  %v4940_v16 = vand.u32 4294901760, %v4939_v14 }
 0x6b6   :  { %13564 = vmatprep.subr.mxu0 %v15479_v46  ;;  %13581 = vmatprep.mubr.msk.f32.mxu1 %vm15480_vm1, %v15479_v46 }
 0x6b7   :  { %13584 = vmatprep.subr.mxu1 %v15479_v46  ;;  %v4917_v15 = vand.u32 4294901760, %v4916_v11 }
 0x6b9   :  { %v4918_v19 = vsub.f32 %v4916_v11, %v4917_v15 }
 0x6bb   :  { %13562 = vmatmul.mubr.f32.vlgmr.msra.gmra.mrb[6].mxu0 %v3486_v8 }
 0x6bc   :  { %13565 = vmatpush3.msra.mxu0 %v3421_v12  ;;  %13582 = vmatmul.mubr.f32.vlgmr.msra.gmra.mrb[8].mxu1 %v3939_v24  ;;  %v4846_v12 = vsel %vm644_vm2, %v15862_v43, 0 }
 0x6bd   :  { %13585 = vmatpush3.msra.mxu1 %v15872_v63  ;;  %13566 = vmatprep.mubr.msk.f32.mxu0 %vm15480_vm1, %v15479_v46  ;;  %v4925_v5 = vand.u32 4294901760, %v4846_v12 }
 0x6be   :  { %13586 = vmatprep.mubr.msk.f32.mxu1 %vm15480_vm1, %v15479_v46  ;;  %13589 = vmatprep.subr.mxu1 %v15479_v46 }
 0x6bf   :  { %14482 = vmatprep.subr.bf16.mxu0 %v15922_v36  ;;  %v4926_v41 = vsub.f32 %v4846_v12, %v4925_v5 }
 0x6c1   :  { %v4927_v20 = vand.u32 4294901760, %v4926_v41 }
 0x6c3   :  { %13567 = vmatmul.mubr.f32.vlgmr.msra.gmra.mrb[6].mxu0 %v3486_v8  ;;  %v4944_v8 = vsub.f32 %v4839_v3, %v4852_v6  ;;  %v4928_v43 = vsub.f32 %v4926_v41, %v4927_v20 }
 0x6c4   :  { %13587 = vmatmul.mubr.f32.vlgmr.msra.gmra.mrb[8].mxu1 %v3940_v25  ;;  %14484 = vmatpush3.bf16.msra.mxu0 %v15922_v36 }
 0x6c5   :  { %13590 = vmatpush3.msra.mxu1 %v3951_v22  ;;  %13591 = vmatprep.mubr.msk.f32.mxu1 %vm15480_vm1, %v15479_v46  ;;  %v4945_v10 = vand.u32 4294901760, %v4944_v8  ;;  %v4919_v22 = vand.u32 4294901760, %v4918_v19  ;;  %v4929_v24 = vand.u32 4294901760, %v4928_v43  ;;  %v14513_v25 = vpack.c.bf16 %v4944_v8, %v4937_v9 }
 0x6c6   :  { %13594 = vmatprep.subr.mxu1 %v15479_v46  ;;  %14486 = vmatprep.subr.bf16.mxu0 %v14485_v48 }
 0x6c7   :  { %v4946_v13 = vsub.f32 %v4944_v8, %v4945_v10  ;;  %v14521_v26 = vpack.c.bf16 %v4945_v10, %v4938_v0 }
 0x6c9   :  { %v4947_v17 = vand.u32 4294901760, %v4946_v13 }
 0x6cc   :  { %13592 = vmatmul.mubr.f32.vlgmr.msra.gmra.mrb[8].mxu1 %v3938_v21 }
 0x6cd   :  { %13595 = vmatpush3.msra.mxu1 %v15872_v63  ;;  %13596 = vmatprep.mubr.msk.f32.mxu1 %vm15480_vm1, %v15479_v46 }
 0x6d4   :  { %13597 = vmatmul.mubr.f32.vlgmr.msra.gmra.mrb[8].mxu1 %v3938_v21  ;;  %v14509_v21 = vpack.c.bf16 %v4947_v17, %v4940_v16 }
 0x796   :  { %v3862_v49 = vpop.f32.mrb[6].mxu0 }
 0x797   :  { %v4327_v52 = vsel %vm644_vm2, %v3862_v49, 0  ;;  %v13568_v53 = vpop.f32.mrb[7].mxu0 }
 0x798   :  { %v4399_v54 = vand.u32 4294901760, %v4327_v52 }
 0x79a   :  { %v4400_v55 = vsub.f32 %v4327_v52, %v4399_v54 }
 0x79c   :  { %v4401_v56 = vand.u32 4294901760, %v4400_v55 }
 0x79e   :  { %v4402_v57 = vsub.f32 %v4400_v55, %v4401_v56 }
 0x7a0   :  { %v4403_v18 = vand.u32 4294901760, %v4402_v57 }
 0x7a2   :  { %13603 = vmatprep.mubr.f32.mxu0 %v4403_v18 }
 0x7a7   :  { %v4314_v58 = vpop.f32.mrb[8].mxu1 }
 0x7a8   :  { %v4330_v59 = vsel %vm644_vm2, %v4314_v58, 0  ;;  %v13598_v60 = vpop.f32.mrb[9].mxu1 }
 0x7a9   :  { %v4409_v61 = vand.u32 4294901760, %v4330_v59 }
 0x7ab   :  { %v4410_v62 = vsub.f32 %v4330_v59, %v4409_v61 }
 0x7ad   :  { %v4411_v23 = vand.u32 4294901760, %v4410_v62 }
 0x7af   :  { %v4412_v63 = vsub.f32 %v4410_v62, %v4411_v23 }
 0x7b1   :  { %v4413_v51 = vand.u32 4294901760, %v4412_v63 }
 0x7b3   :  { %13604 = vmatmul.mubr.f32.vlgmr.msra.gmra.mrb[8].mxu0 %v4413_v51 }
 0x7b4   :  { %14488 = vmatpush3.bf16.msra.mxu0 %v14485_v48  ;;  %13610 = vmatprep.mubr.f32.mxu0 %v4399_v54  ;;  %v5402_v48 = vld [vmem:[%s16748_s4 + $0x50] sm:$0xff] }
 0x7b5   :  { %14490 = vmatprep.subr.bf16.mxu0 %v14489_v42  ;;  %v5424_v49 = vand.u32 4294901760, %v5402_v48 }
 0x7b7   :  { %v5526_v9 = vsub.f32 %v5402_v48, %v5424_v49 }
 0x7bb   :  { %13611 = vmatmul.mubr.f32.vlgmr.msra.gmra.mrb[8].mxu0 %v4409_v61 }
 0x7bc   :  { %14492 = vmatpush3.bf16.msra.mxu0 %v14489_v42  ;;  %13617 = vmatprep.mubr.f32.mxu0 %v4400_v55  ;;  %v5418_v42 = vand.u32 4294901760, %v5400_v39 }
 0x7bd   :  { %14494 = vmatprep.subr.bf16.mxu0 %v15922_v36 }
 0x7be   :  { %v15951_v45 = vpack.c.bf16 %v5418_v42, %v5415_v40  ;;  %v5512_v50 = vsub.f32 %v5400_v39, %v5418_v42 }
 0x7c0   :  { %14530 = vmatprep.subr.bf16.mxu1 %v15951_v45  ;;  %v5513_v10 = vand.u32 4294901760, %v5512_v50 }
 0x7c1   :  { %14532 = vmatpush3.bf16.msra.mxu1 %v15951_v45 }
 0x7c3   :  { %13618 = vmatmul.mubr.f32.vlgmr.msra.gmra.mrb[8].mxu0 %v4410_v62  ;;  %v88_v62 = vld [vmem:[#allocation5] sm:$0xff] }
 0x7c4   :  { %14496 = vmatpush3.bf16.msra.mxu0 %v15922_v36  ;;  %13624 = vmatprep.mubr.f32.mxu0 %v4401_v56 }
 0x7c5   :  { %14498 = vmatprep.subr.bf16.mxu0 %v14497_v47 }
 0x7cb   :  { %13625 = vmatmul.mubr.f32.vlgmr.msra.gmra.mrb[8].mxu0 %v4411_v23  ;;  %v5964_v23 = vsel %vm101_vm0, %v88_v62, 0 }
 0x7cc   :  { %14500 = vmatpush3.bf16.msra.mxu0 %v14497_v47  ;;  %13631 = vmatprep.mubr.f32.mxu0 %v4399_v54  ;;  %v5421_v47 = vand.u32 4294901760, %v5401_v44  ;;  %v15975_v63 = vand.u32 4294901760, %v5964_v23 }
 0x7cd   :  { %14502 = vmatprep.subr.bf16.mxu0 %v15922_v36 }
 0x7ce   :  { %v15960_v52 = vpack.c.bf16 %v5424_v49, %v5421_v47  ;;  %v15979_v51 = vsub.f32 %v5964_v23, %v15975_v63  ;;  %v5519_v8 = vsub.f32 %v5401_v44, %v5421_v47 }
 0x7d0   :  { %14534 = vmatprep.subr.bf16.mxu1 %v15960_v52  ;;  %v6046_v3 = vand.u32 4294901760, %v15979_v51  ;;  %v5520_v13 = vand.u32 4294901760, %v5519_v8 }
 0x7d1   :  { %14536 = vmatpush3.bf16.msra.mxu1 %v15960_v52 }
 0x7d2   :  { %v6047_v4 = vsub.f32 %v15979_v51, %v6046_v3 }
 0x7d3   :  { %13632 = vmatmul.mubr.f32.vlgmr.msra.gmra.mrb[8].mxu0 %v4409_v61 }
 0x7d4   :  { %14504 = vmatpush3.bf16.msra.mxu0 %v15922_v36  ;;  %13638 = vmatprep.mubr.f32.mxu0 %v4399_v54  ;;  %v6048_v6 = vand.u32 4294901760, %v6047_v4 }
 0x7d5   :  { %14506 = vmatprep.subr.bf16.mxu0 %v14505_v1 }
 0x7db   :  { %13639 = vmatmul.mubr.f32.vlgmr.msra.gmra.mrb[8].mxu0 %v4409_v61 }
 0x7dc   :  { %13645 = vmatprep.mubr.f32.mxu0 %v4919_v22  ;;  %14508 = vmatpush3.bf16.msra.mxu0 %v14505_v1 }
 0x7dd   :  { %14510 = vmatprep.subr.bf16.mxu0 %v14509_v21 }
 0x7e3   :  { %13646 = vmatmul.mubr.f32.vlgmr.msra.gmra.mrb[8].mxu0 %v4929_v24 }
 0x7e4   :  { %14512 = vmatpush3.bf16.msra.mxu0 %v14509_v21  ;;  %13652 = vmatprep.mubr.f32.mxu0 %v4915_v2  ;;  %v15992_v21 = vpack.c.bf16 %v5526_v9, %v5519_v8 }
 0x7e5   :  { %14514 = vmatprep.subr.bf16.mxu0 %v14513_v25 }
 0x7eb   :  { %13653 = vmatmul.mubr.f32.vlgmr.msra.gmra.mrb[8].mxu0 %v4925_v5 }
 0x7ec   :  { %14516 = vmatpush3.bf16.msra.mxu0 %v14513_v25  ;;  %13659 = vmatprep.mubr.f32.mxu0 %v4916_v11  ;;  %v5514_v11 = vsub.f32 %v5512_v50, %v5513_v10 }
 0x7ed   :  { %14518 = vmatprep.subr.bf16.mxu0 %v14505_v1 }
 0x7f3   :  { %13660 = vmatmul.mubr.f32.vlgmr.msra.gmra.mrb[8].mxu0 %v4926_v41 }
 0x7f4   :  { %14520 = vmatpush3.bf16.msra.mxu0 %v14505_v1  ;;  %13666 = vmatprep.mubr.f32.mxu0 %v4917_v15  ;;  %v5521_v15 = vsub.f32 %v5519_v8, %v5520_v13 }
 0x7f5   :  { %14522 = vmatprep.subr.bf16.mxu0 %v14521_v26 }
 0x7f6   :  { %v5522_v16 = vand.u32 4294901760, %v5521_v15 }
 0x7fb   :  { %13667 = vmatmul.mubr.f32.vlgmr.msra.gmra.mrb[8].mxu0 %v4927_v20  ;;  %v15990_v20 = vpack.c.bf16 %v5512_v50, %v5505_v7 }
 0x7fc   :  { %14524 = vmatpush3.bf16.msra.mxu0 %v14521_v26  ;;  %13673 = vmatprep.mubr.f32.mxu0 %v4915_v2  ;;  %v89_v26 = vld [vmem:[#allocation5 + $0x8] sm:$0xff] }
 0x7fd   :  { %14526 = vmatprep.subr.bf16.mxu0 %v14505_v1 }
 0x803   :  { %13674 = vmatmul.mubr.f32.vlgmr.msra.gmra.mrb[8].mxu0 %v4925_v5 }
 0x804   :  { %14528 = vmatpush3.bf16.msra.mxu0 %v14505_v1  ;;  %13680 = vmatprep.mubr.f32.mxu0 %v4915_v2  ;;  %v5506_v2 = vand.u32 4294901760, %v5505_v7  ;;  %v5527_v1 = vand.u32 4294901760, %v5526_v9 }
 0x806   :  { %v5507_v0 = vsub.f32 %v5505_v7, %v5506_v2  ;;  %v5528_v41 = vsub.f32 %v5526_v9, %v5527_v1  ;;  %v15994_v22 = vpack.c.bf16 %v5513_v10, %v5506_v2  ;;  %v15996_v43 = vpack.c.bf16 %v5527_v1, %v5520_v13  ;;  %v12730_v1 = vld [vmem:[%s16750_s6 + $0x5] ss:$0 sm:$0xff] }
 0x808   :  { %v5508_v12 = vand.u32 4294901760, %v5507_v0  ;;  %v5529_v17 = vand.u32 4294901760, %v5528_v41 }
 0x80a   :  { %v15988_v19 = vpack.c.bf16 %v5529_v17, %v5522_v16 }
 0x80b   :  { %13681 = vmatmul.mubr.f32.vlgmr.msra.gmra.mrb[8].mxu0 %v4925_v5  ;;  %v5515_v5 = vand.u32 4294901760, %v5514_v11 }
 0x80c   :  { %13757 = vmatprep.mubr.f32.mxu0 %v6048_v6 }
 0x80d   :  { %v15985_v14 = vpack.c.bf16 %v5515_v5, %v5508_v12 }
 0x80f   :  { %14538 = vmatprep.subr.bf16.mxu1 %v15985_v14 }
 0x8de   :  { %v13682_v28 = vpop.f32.mrb[8].mxu0 }
 0x8df   :  { %v5355_v29 = vadd.f32 %v13682_v28, %v12729_v27  ;;  %v5340_v30 = vpop.f32.mrb[9].mxu0  ;;  %v90_v28 = vld [vmem:[#allocation5 + $0x10] sm:$0xff] }
 0x8e0   :  { %v5354_v31 = vadd.f32 %v12729_v27, %v5340_v30  ;;  %v5967_v30 = vsel %vm101_vm0, %v89_v26, 0 }
 0x8e1   :  { %v5359_v33 = vadd.f32 %v15303_v32, %v5355_v29 }
 0x8e2   :  { %v5358_v35 = vadd.f32 %v15304_v34, %v5354_v31  ;;  %v91_v34 = vld [vmem:[#allocation5 + $0x18] sm:$0xff] }
 0x8e3   :  { %v5363_v36 = vsel %vm101_vm0, %v5359_v33, 0.0  ;;  %v5973_v40 = vsel %vm101_vm0, %v91_v34, 0 }
 0x8e4   :  { %5364 = vadd.xlane.f32.xlu1 %v5363_v36  ;;  %v5360_v37 = vsel %vm101_vm0, %v5358_v35, 0.0 }
 0x8e5   :  { %5361 = vadd.xlane.f32.xlu0 %v5360_v37  ;;  %v16000_v37 = vand.u32 4294901760, %v5967_v30 }
 0x8f5   :  { %5951 = vrot.lane.b32.xlu1 %v5399_v38, %s15481_s0 }
 0x8f9   :  { %5955 = vrot.lane.b32.xlu1 %v5401_v44, %s15481_s0 }
 0x8fd   :  { %5957 = vrot.lane.b32.xlu1 %v5402_v48, %s15481_s0 }
 0x971   :  { %v5365_v53 = vpop.xlane.xlu1 %5364 }
 0x972   :  { %v5368_v54 = vmul.f32 0.03125, %v5365_v53  ;;  %v5362_v55 = vpop.xlane.xlu0 %5361  ;;  %v16012_v53 = vsub.f32 %v5967_v30, %v16000_v37 }
 0x973   :  { %v5367_v56 = vmul.f32 0.03125, %v5362_v55 }
 0x974   :  { %v15964_v57 = vsub.f32 %v5359_v33, %v5368_v54  ;;  %v5970_v33 = vsel %vm101_vm0, %v90_v28, 0  ;;  %v16014_v54 = vand.u32 4294901760, %v5973_v40  ;;  %v6056_v23 = vand.u32 4294901760, %v16012_v53  ;;  %v12731_v28 = vld [vmem:[%s16750_s6 + $0x6] ss:$0 sm:$0xff] }
 0x975   :  { %v15966_v18 = vsub.f32 %v5358_v35, %v5367_v56  ;;  %v5952_v24 = vpop.permute.xlu1 %5951 }
 0x976   :  { %v5372_v60 = vmul.f32 %v15964_v57, %v15964_v57  ;;  %v5976_v29 = vand.u32 4294901760, %v5952_v24  ;;  %v16024_v4 = vsub.f32 %v5973_v40, %v16014_v54  ;;  %v6057_v11 = vsub.f32 %v16012_v53, %v6056_v23 }
 0x977   :  { %v5371_v58 = vmul.f32 %v15966_v18, %v15966_v18 }
 0x978   :  { %v5376_v61 = vsel %vm101_vm0, %v5372_v60, 0.0  ;;  %v16002_v38 = vsub.f32 %v5952_v24, %v5976_v29  ;;  %v6076_v12 = vand.u32 4294901760, %v16024_v4 }
 0x979   :  { %v5373_v59 = vsel %vm101_vm0, %v5371_v58, 0.0  ;;  %v5956_v25 = vpop.permute.xlu1 %5955 }
 0x97a   :  { %5374 = vadd.xlane.f32.xlu0 %v5373_v59  ;;  %v5982_v31 = vand.u32 4294901760, %v5956_v25  ;;  %v6087_v55 = vand.u32 4294901760, %v16002_v38 }
 0x97c   :  { %v16007_v44 = vsub.f32 %v5956_v25, %v5982_v31  ;;  %v6088_v6 = vsub.f32 %v16002_v38, %v6087_v55  ;;  %v6058_v25 = vand.u32 4294901760, %v6057_v11 }
 0x97d   :  { %v5958_v27 = vpop.permute.xlu1 %5957 }
 0x97e   :  { %5377 = vadd.xlane.f32.xlu0 %v5376_v61  ;;  %v5985_v32 = vand.u32 4294901760, %v5958_v27  ;;  %v6101_v59 = vand.u32 4294901760, %v16007_v44  ;;  %v6089_v41 = vand.u32 4294901760, %v6088_v6 }
 0x980   :  { %v16009_v47 = vsub.f32 %v5958_v27, %v5985_v32  ;;  %v16029_v7 = vpack.c.bf16 %v5985_v32, %v5982_v31  ;;  %v6102_v8 = vsub.f32 %v16007_v44, %v6101_v59  ;;  %v6077_v27 = vsub.f32 %v16024_v4, %v6076_v12 }
 0x982   :  { %v6108_v60 = vand.u32 4294901760, %v16009_v47  ;;  %v6103_v16 = vand.u32 4294901760, %v6102_v8  ;;  %v14597_v6 = vpack.c.bf16 %v16009_v47, %v16007_v44 }
 0x984   :  { %v6109_v10 = vsub.f32 %v16009_v47, %v6108_v60 }
 0x986   :  { %v6110_v17 = vand.u32 4294901760, %v6109_v10 }
 0x994   :  { %5953 = vrot.lane.b32.xlu0 %v5400_v39, %s15481_s0  ;;  %v16004_v39 = vand.u32 4294901760, %v5970_v33 }
 0x996   :  { %v16018_v56 = vsub.f32 %v5970_v33, %v16004_v39  ;;  %v14589_v33 = vpack.c.bf16 %v6110_v17, %v6103_v16 }
 0x998   :  { %v6066_v50 = vand.u32 4294901760, %v16018_v56 }
 0x99a   :  { %v6067_v5 = vsub.f32 %v16018_v56, %v6066_v50 }
 0xa07   :  { %v5375_v35 = vpop.xlane.xlu0 %5374 }
 0xa08   :  { %v5379_v36 = vmul.f32 0.03125, %v5375_v35  ;;  %v6078_v35 = vand.u32 4294901760, %v6077_v27 }
 0xa0a   :  { %v5381_v42 = vadd.f32 1e-06, %v5379_v36 }
 0xa0b   :  { %v5378_v48 = vpop.xlane.xlu0 %5377 }
 0xa0c   :  { %15271 = vrsqrt.f32 %v5381_v42  ;;  %v5380_v49 = vmul.f32 0.03125, %v5378_v48 }
 0xa0e   :  { %v5382_v58 = vadd.f32 1e-06, %v5380_v49 }
 0xa0f   :  { %v5954_v61 = vpop.permute.xlu0 %5953 }
 0xa10   :  { %15273 = vrsqrt.f32 %v5382_v58  ;;  %v5979_v62 = vand.u32 4294901760, %v5954_v61 }
 0xa12   :  { %v16035_v9 = vpack.c.bf16 %v5979_v62, %v5976_v29  ;;  %v16037_v2 = vsub.f32 %v5954_v61, %v5979_v62  ;;  %v6068_v29 = vand.u32 4294901760, %v6067_v5 }
 0xa14   :  { %v6094_v0 = vand.u32 4294901760, %v16037_v2  ;;  %14578 = vmatprep.subr.bf16.mxu0 %v16035_v9 }
 0xa15   :  { %14580 = vmatpush3.bf16.msra.mxu0 %v16035_v9 }
 0xa16   :  { %v15272_v13 = vpop.eup %15271  ;;  %v6095_v15 = vsub.f32 %v16037_v2, %v6094_v0  ;;  %14582 = vmatprep.subr.bf16.mxu0 %v16029_v7 }
 0xa17   :  { %v5385_v24 = vmul.f32 %v15272_v13, %v15966_v18 }
 0xa18   :  { %v6096_v26 = vand.u32 4294901760, %v6095_v15  ;;  %v14609_v15 = vpack.c.bf16 %v6094_v0, %v6087_v55 }
 0xa19   :  { %14584 = vmatpush3.bf16.msra.mxu0 %v16029_v7  ;;  %v5391_v30 = vmul.f32 %v12730_v1, %v5385_v24 }
 0xa1a   :  { %v15274_v31 = vpop.eup %15273  ;;  %v14585_v32 = vpack.c.bf16 %v6096_v26, %v6089_v41 }
 0xa1b   :  { %v5386_v34 = vmul.f32 %v15274_v31, %v15964_v57  ;;  %v16068_v18 = vadd.f32 %v12731_v28, %v5391_v30  ;;  %v14593_v57 = vpack.c.bf16 %v16037_v2, %v16002_v38 }
 0xa1c   :  { %13758 = vmatmul.mubr.f32.vlgmr.msra.gmra.mrb[10].mxu0 %v6058_v25  ;;  %14586 = vmatprep.subr.bf16.mxu0 %v14585_v32 }
 0xa1d   :  { %v5392_v36 = vmul.f32 %v12730_v1, %v5386_v34  ;;  %14588 = vmatpush3.bf16.msra.mxu0 %v14585_v32  ;;  %13760 = vmatprep.mubr.f32.mxu0 %v6068_v29  ;;  %v5409_v40 = vsel %vm101_vm0, %v16068_v18, 0 }
 0xa1e   :  { %14590 = vmatprep.subr.bf16.mxu0 %v14589_v33  ;;  %v16072_v42 = vand.u32 4294901760, %v5409_v40 }
 0xa1f   :  { %v16074_v48 = vadd.f32 %v12731_v28, %v5392_v36 }
 0xa20   :  { %13761 = vmatmul.mubr.f32.gmra.mrb[12].mxu0 %v6078_v35  ;;  %v5484_v49 = vsub.f32 %v5409_v40, %v16072_v42 }
 0xa21   :  { %14592 = vmatpush3.bf16.msra.mxu0 %v14589_v33  ;;  %13771 = vmatprep.mubr.f32.mxu0 %v15975_v63  ;;  %v5412_v58 = vsel %vm101_vm0, %v16074_v48, 0 }
 0xa22   :  { %14594 = vmatprep.subr.bf16.mxu0 %v14593_v57  ;;  %v5485_v61 = vand.u32 4294901760, %v5484_v49  ;;  %v16082_v62 = vand.u32 4294901760, %v5412_v58 }
 0xa24   :  { %13772 = vmatmul.mubr.f32.vlgmr.msra.gmra.mrb[10].mxu0 %v16000_v37  ;;  %v5486_v8 = vsub.f32 %v5484_v49, %v5485_v61  ;;  %v5494_v10 = vsub.f32 %v5412_v58, %v16082_v62 }
 0xa25   :  { %14596 = vmatpush3.bf16.msra.mxu0 %v14593_v57  ;;  %13774 = vmatprep.mubr.f32.mxu0 %v16004_v39 }
 0xa26   :  { %14598 = vmatprep.subr.bf16.mxu0 %v14597_v6  ;;  %v5487_v11 = vand.u32 4294901760, %v5486_v8  ;;  %v5495_v5 = vand.u32 4294901760, %v5494_v10 }
 0xa28   :  { %13691 = vmatprep.mubr.f32.mxu1 %v5487_v11  ;;  %13775 = vmatmul.mubr.f32.gmra.mrb[12].mxu0 %v16014_v54  ;;  %v5496_v13 = vsub.f32 %v5494_v10, %v5495_v5 }
 0xa29   :  { %14600 = vmatpush3.bf16.msra.mxu0 %v14597_v6  ;;  %13785 = vmatprep.mubr.f32.mxu0 %v15979_v51 }
 0xa2a   :  { %14602 = vmatprep.subr.bf16.mxu0 %v16035_v9  ;;  %v5497_v1 = vand.u32 4294901760, %v5496_v13 }
 0xa2c   :  { %13692 = vmatmul.mubr.f32.vlgmr.msra.gmra.mrb[10].mxu1 %v5497_v1  ;;  %13786 = vmatmul.mubr.f32.vlgmr.msra.gmra.mrb[10].mxu0 %v16012_v53 }
 0xa2d   :  { %14540 = vmatpush3.bf16.msra.mxu1 %v15985_v14  ;;  %13702 = vmatprep.mubr.f32.mxu1 %v16072_v42  ;;  %v14613_v14 = vpack.c.bf16 %v6108_v60, %v6101_v59 }
 0xa2e   :  { %14604 = vmatpush3.bf16.msra.mxu0 %v16035_v9  ;;  %13788 = vmatprep.mubr.f32.mxu0 %v16018_v56 }
 0xa2f   :  { %14606 = vmatprep.subr.bf16.mxu0 %v16029_v7  ;;  %14542 = vmatprep.subr.bf16.mxu1 %v15988_v19 }
 0xa30   :  { %13789 = vmatmul.mubr.f32.gmra.mrb[12].mxu0 %v16024_v4 }
 0xa31   :  { %14544 = vmatpush3.bf16.msra.mxu1 %v15988_v19  ;;  %13799 = vmatprep.mubr.f32.mxu0 %v6046_v3 }
 0xa32   :  { %14608 = vmatpush3.bf16.msra.mxu0 %v16029_v7  ;;  %14546 = vmatprep.subr.bf16.mxu1 %v15990_v20 }
 0xa33   :  { %14610 = vmatprep.subr.bf16.mxu0 %v14609_v15 }
 0xa34   :  { %13703 = vmatmul.mubr.f32.vlgmr.msra.gmra.mrb[10].mxu1 %v16082_v62 }
 0xa35   :  { %13800 = vmatmul.mubr.f32.vlgmr.msra.gmra.mrb[10].mxu0 %v6056_v23  ;;  %14548 = vmatpush3.bf16.msra.mxu1 %v15990_v20 }
 0xa36   :  { %13713 = vmatprep.mubr.f32.mxu1 %v5484_v49  ;;  %14612 = vmatpush3.bf16.msra.mxu0 %v14609_v15  ;;  %v16265_v15 = vld [vmem:[#allocation8 + $0x8] sm:$0xff] }
 0xa37   :  { %14614 = vmatprep.subr.bf16.mxu0 %v14613_v14  ;;  %13802 = vmatprep.mubr.f32.mxu0 %v6066_v50  ;;  %v12732_v50 = vld [vmem:[%s16750_s6 + $0x2] ss:$0 sm:$0xff]  ;;  %vm6593_vm6 = vcmp.gt.f32.partialorder %v16265_v15, 0.5 }
 0xa38   :  { %14550 = vmatprep.subr.bf16.mxu1 %v15992_v21 }
 0xa39   :  { %13803 = vmatmul.mubr.f32.gmra.mrb[12].mxu0 %v6076_v12  ;;  %14552 = vmatpush3.bf16.msra.mxu1 %v15992_v21 }
 0xa3a   :  { %14616 = vmatpush3.bf16.msra.mxu0 %v14613_v14  ;;  %13813 = vmatprep.mubr.f32.mxu0 %v15975_v63  ;;  %v16267_v14 = vld [vmem:[#allocation8] sm:$0xff] }
 0xa3b   :  { %14618 = vmatprep.subr.bf16.mxu0 %v16035_v9  ;;  %14554 = vmatprep.subr.bf16.mxu1 %v15951_v45  ;;  %vm6592_vm7 = vcmp.gt.f32.partialorder %v16267_v14, 0.5 }
 0xa3c   :  { %13714 = vmatmul.mubr.f32.vlgmr.msra.gmra.mrb[10].mxu1 %v5494_v10 }
 0xa3d   :  { %13814 = vmatmul.mubr.f32.vlgmr.msra.gmra.mrb[10].mxu0 %v16000_v37  ;;  %14556 = vmatpush3.bf16.msra.mxu1 %v15951_v45 }
 0xa3e   :  { %13724 = vmatprep.mubr.f32.mxu1 %v5485_v61  ;;  %14620 = vmatpush3.bf16.msra.mxu0 %v16035_v9 }
 0xa3f   :  { %14622 = vmatprep.subr.bf16.mxu0 %v16029_v7  ;;  %13816 = vmatprep.mubr.f32.mxu0 %v16004_v39 }
 0xa40   :  { %14558 = vmatprep.subr.bf16.mxu1 %v15960_v52 }
 0xa41   :  { %13817 = vmatmul.mubr.f32.gmra.mrb[12].mxu0 %v16014_v54  ;;  %14560 = vmatpush3.bf16.msra.mxu1 %v15960_v52 }
 0xa42   :  { %14624 = vmatpush3.bf16.msra.mxu0 %v16029_v7  ;;  %13827 = vmatprep.mubr.f32.mxu0 %v15975_v63  ;;  %v15487_v63 = vmov 0.0|0.0  }
 0xa43   :  { %14562 = vmatprep.subr.bf16.mxu1 %v15994_v22  ;;  %14643 = vmatprep.subr.bf16.mxu0 %v15487_v63 }
 0xa44   :  { %13725 = vmatmul.mubr.f32.vlgmr.msra.gmra.mrb[10].mxu1 %v5495_v5 }
 0xa45   :  { %13828 = vmatmul.mubr.f32.vlgmr.msra.gmra.mrb[10].mxu0 %v16000_v37  ;;  %14564 = vmatpush3.bf16.msra.mxu1 %v15994_v22 }
 0xa46   :  { %13735 = vmatprep.mubr.f32.mxu1 %v16072_v42  ;;  %13830 = vmatprep.mubr.f32.mxu0 %v16004_v39 }
 0xa47   :  { %14566 = vmatprep.subr.bf16.mxu1 %v15996_v43 }
 0xa49   :  { %13831 = vmatmul.mubr.f32.gmra.mrb[12].mxu0 %v16014_v54  ;;  %14568 = vmatpush3.bf16.msra.mxu1 %v15996_v43 }
 0xa4a   :  { %14570 = vmatprep.subr.bf16.mxu1 %v15951_v45  ;;  %13879 = vmatprep.mubr.msk.f32.mxu0 %vm15480_vm1, %v15479_v46 }
 0xa4c   :  { %13736 = vmatmul.mubr.f32.vlgmr.msra.gmra.mrb[10].mxu1 %v16082_v62 }
 0xa4d   :  { %14572 = vmatpush3.bf16.msra.mxu1 %v15951_v45  ;;  %13746 = vmatprep.mubr.f32.mxu1 %v16072_v42  ;;  %v12733_v45 = vld [vmem:[%s16750_s6 + $0x3] ss:$0 sm:$0xff] }
 0xa4e   :  { %14574 = vmatprep.subr.bf16.mxu1 %v15960_v52 }
 0xa51   :  { %14576 = vmatpush3.bf16.msra.mxu1 %v15960_v52 }
 0xa52   :  { %14625 = vmatprep.subr.bf16.mxu1 %v15487_v63 }
 0xa54   :  { %13747 = vmatmul.mubr.f32.vlgmr.msra.gmra.mrb[10].mxu1 %v16082_v62 }
 0xa55   :  { %13837 = vmatprep.mubr.msk.f32.mxu1 %vm15480_vm1, %v15479_v46 }
 0xb18   :  { %v13829_v51 = vpop.f32.mrb[10].mxu0 }
 0xb19   :  { %v16160_v3 = vadd.f32 %v13829_v51, %v12733_v45  ;;  %v6567_v19 = vpop.f32.mrb[11].mxu0 }
 0xb1a   :  { %v16162_v20 = vadd.f32 %v12733_v45, %v6567_v19 }
 0xb1b   :  { %v6601_v52 = vsel %vm644_vm2, %v16160_v3, 0 }
 0xb1c   :  { %v6607_v21 = vand.u32 4294901760, %v6601_v52  ;;  %v6598_v22 = vsel %vm644_vm2, %v16162_v20, 0  ;;  %v13832_v43 = vpop.f32.mrb[12].mxu0 }
 0xb1d   :  { %v6604_v37 = vand.u32 4294901760, %v6598_v22  ;;  %v16168_v38 = vadd.f32 %v13832_v43, %v12733_v45  ;;  %v6579_v39 = vpop.f32.mrb[13].mxu0 }
 0xb1e   :  { %v16170_v44 = vadd.f32 %v12733_v45, %v6579_v39  ;;  %v16186_v4 = vsub.f32 %v6601_v52, %v6607_v21 }
 0xb1f   :  { %v7069_v47 = vsel %vm644_vm2, %v16168_v38, 0  ;;  %v16174_v53 = vpack.c.bf16 %v6607_v21, %v6604_v37  ;;  %v16188_v7 = vsub.f32 %v6598_v22, %v6604_v37 }
 0xb20   :  { %v7075_v54 = vand.u32 4294901760, %v7069_v47  ;;  %v7066_v55 = vsel %vm644_vm2, %v16170_v44, 0  ;;  %v6690_v24 = vand.u32 4294901760, %v16186_v4 }
 0xb21   :  { %v7072_v56 = vand.u32 4294901760, %v7066_v55  ;;  %14627 = vmatpush3.bf16.xpose.msra.mxu1 %v16174_v53  ;;  %v6683_v17 = vand.u32 4294901760, %v16188_v7  ;;  %v14632_v5 = vpack.c.bf16 %v16186_v4, %v16188_v7 }
 0xb22   :  { %14628 = vmatprep.subr.bf16.mxu1 %v15487_v63  ;;  %v16182_v60 = vsub.f32 %v7069_v47, %v7075_v54  ;;  %v6691_v33 = vsub.f32 %v16186_v4, %v6690_v24 }
 0xb23   :  { %v16180_v59 = vpack.c.bf16 %v7075_v54, %v7072_v56  ;;  %v16184_v23 = vsub.f32 %v7066_v55, %v7072_v56  ;;  %v6684_v32 = vsub.f32 %v16188_v7, %v6683_v17  ;;  %v14638_v1 = vpack.c.bf16 %v6690_v24, %v6683_v17 }
 0xb24   :  { %v7158_v41 = vand.u32 4294901760, %v16182_v60  ;;  %v6692_v58 = vand.u32 4294901760, %v6691_v33 }
 0xb25   :  { %14645 = vmatpush3.bf16.xpose.msra.mxu0 %v16180_v59  ;;  %v7151_v12 = vand.u32 4294901760, %v16184_v23  ;;  %v6685_v49 = vand.u32 4294901760, %v6684_v32  ;;  %v14650_v11 = vpack.c.bf16 %v16182_v60, %v16184_v23 }
 0xb26   :  { %14646 = vmatprep.subr.bf16.mxu0 %v15487_v63  ;;  %v7159_v30 = vsub.f32 %v16182_v60, %v7158_v41 }
 0xb27   :  { %v13748_v9 = vpop.f32.mrb[10].mxu1  ;;  %v7152_v29 = vsub.f32 %v16184_v23, %v7151_v12  ;;  %v14629_v10 = vpack.c.bf16 %v6692_v58, %v6685_v49  ;;  %v14656_v13 = vpack.c.bf16 %v7158_v41, %v7151_v12 }
 0xb28   :  { %v16195_v2 = vadd.f32 %v13748_v9, %v12732_v50  ;;  %v5932_v0 = vpop.f32.mrb[11].mxu1  ;;  %v7160_v42 = vand.u32 4294901760, %v7159_v30 }
 0xb29   :  { %v16199_v16 = vadd.f32 %v12732_v50, %v5932_v0  ;;  %v7153_v40 = vand.u32 4294901760, %v7152_v29 }
 0xb2a   :  { %v7063_v25 = vsel %vm644_vm2, %v16195_v2, 0 }
 0xb2b   :  { %v16205_v26 = vand.u32 4294901760, %v7063_v25  ;;  %v6595_v27 = vsel %vm644_vm2, %v16199_v16, 0  ;;  %v14647_v6 = vpack.c.bf16 %v7160_v42, %v7153_v40 }
 0xb2c   :  { %v16209_v28 = vand.u32 4294901760, %v6595_v27 }
 0xb2d   :  { %v7139_v31 = vsub.f32 %v7063_v25, %v16205_v26 }
 0xb2e   :  { %v6671_v34 = vsub.f32 %v6595_v27, %v16209_v28 }
 0xb2f   :  { %v7140_v35 = vand.u32 4294901760, %v7139_v31 }
 0xb30   :  { %v6672_v36 = vand.u32 4294901760, %v6671_v34 }
 0xb31   :  { %v7141_v57 = vsub.f32 %v7139_v31, %v7140_v35 }
 0xb32   :  { %v6673_v61 = vsub.f32 %v6671_v34, %v6672_v36 }
 0xb33   :  { %v7142_v62 = vand.u32 4294901760, %v7141_v57 }
 0xb34   :  { %v6674_v8 = vand.u32 4294901760, %v6673_v61 }
 0xb35   :  { %13880 = vmatmul.mubr.f32.vlgmr.msra.gmra.mrb[14].mxu0 %v7142_v62 }
 0xb36   :  { %14648 = vmatpush3.bf16.xpose.msra.mxu0 %v14647_v6  ;;  %13838 = vmatmul.mubr.f32.vlgmr.msra.gmra.mrb[12].mxu1 %v6674_v8 }
 0xb37   :  { %14630 = vmatpush3.bf16.xpose.msra.mxu1 %v14629_v10  ;;  %13886 = vmatprep.mubr.msk.f32.mxu0 %vm15480_vm1, %v15479_v46 }
 0xb38   :  { %14649 = vmatprep.subr.bf16.mxu0 %v15487_v63  ;;  %13844 = vmatprep.mubr.msk.f32.mxu1 %vm15480_vm1, %v15479_v46 }
 0xb39   :  { %14631 = vmatprep.subr.bf16.mxu1 %v15487_v63 }
 0xb3d   :  { %13887 = vmatmul.mubr.f32.vlgmr.msra.gmra.mrb[14].mxu0 %v16205_v26 }
 0xb3e   :  { %14651 = vmatpush3.bf16.xpose.msra.mxu0 %v14650_v11  ;;  %13845 = vmatmul.mubr.f32.vlgmr.msra.gmra.mrb[12].mxu1 %v16209_v28 }
 0xb3f   :  { %14633 = vmatpush3.bf16.xpose.msra.mxu1 %v14632_v5  ;;  %13893 = vmatprep.mubr.msk.f32.mxu0 %vm15480_vm1, %v15479_v46 }
 0xb40   :  { %14652 = vmatprep.subr.bf16.mxu0 %v15487_v63  ;;  %13851 = vmatprep.mubr.msk.f32.mxu1 %vm15480_vm1, %v15479_v46 }
 0xb41   :  { %14634 = vmatprep.subr.bf16.mxu1 %v15487_v63 }
 0xb45   :  { %13894 = vmatmul.mubr.f32.vlgmr.msra.gmra.mrb[14].mxu0 %v7139_v31 }
 0xb46   :  { %14654 = vmatpush3.bf16.xpose.msra.mxu0 %v16180_v59  ;;  %13852 = vmatmul.mubr.f32.vlgmr.msra.gmra.mrb[12].mxu1 %v6671_v34 }
 0xb47   :  { %14636 = vmatpush3.bf16.xpose.msra.mxu1 %v16174_v53  ;;  %13900 = vmatprep.mubr.msk.f32.mxu0 %vm15480_vm1, %v15479_v46 }
 0xb48   :  { %14655 = vmatprep.subr.bf16.mxu0 %v15487_v63  ;;  %13858 = vmatprep.mubr.msk.f32.mxu1 %vm15480_vm1, %v15479_v46 }
 0xb49   :  { %14637 = vmatprep.subr.bf16.mxu1 %v15487_v63 }
 0xb4d   :  { %13901 = vmatmul.mubr.f32.vlgmr.msra.gmra.mrb[14].mxu0 %v7140_v35 }
 0xb4e   :  { %14657 = vmatpush3.bf16.xpose.msra.mxu0 %v14656_v13  ;;  %13859 = vmatmul.mubr.f32.vlgmr.msra.gmra.mrb[12].mxu1 %v6672_v36 }
 0xb4f   :  { %14639 = vmatpush3.bf16.xpose.msra.mxu1 %v14638_v1  ;;  %13907 = vmatprep.mubr.msk.f32.mxu0 %vm15480_vm1, %v15479_v46 }
 0xb50   :  { %14658 = vmatprep.subr.bf16.mxu0 %v15487_v63  ;;  %13865 = vmatprep.mubr.msk.f32.mxu1 %vm15480_vm1, %v15479_v46 }
 0xb51   :  { %14640 = vmatprep.subr.bf16.mxu1 %v15487_v63 }
 0xb55   :  { %13908 = vmatmul.mubr.f32.vlgmr.msra.gmra.mrb[14].mxu0 %v16205_v26 }
 0xb56   :  { %14660 = vmatpush3.bf16.xpose.msra.mxu0 %v16180_v59  ;;  %13866 = vmatmul.mubr.f32.vlgmr.msra.gmra.mrb[12].mxu1 %v16209_v28 }
 0xb57   :  { %14642 = vmatpush3.bf16.xpose.msra.mxu1 %v16174_v53  ;;  %13914 = vmatprep.mubr.msk.f32.mxu0 %vm15480_vm1, %v15479_v46 }
 0xb58   :  { %13872 = vmatprep.mubr.msk.f32.mxu1 %vm15480_vm1, %v15479_v46  ;;  %14661 = vmatprep.subr.bf16.mxu1 %v15487_v63 }
 0xb59   :  { %14697 = vmatprep.subr.bf16.mxu0 %v15487_v63 }
 0xb5d   :  { %13915 = vmatmul.mubr.f32.vlgmr.msra.gmra.mrb[14].mxu0 %v16205_v26 }
 0xb5e   :  { %13873 = vmatmul.mubr.f32.vlgmr.msra.gmra.mrb[12].mxu1 %v16209_v28  ;;  %14005 = vmatprep.mubr.msk.f32.mxu0 %vm15480_vm1, %v15479_v46 }
 0xb5f   :  { %13921 = vmatprep.mubr.msk.f32.mxu1 %vm15480_vm1, %v15479_v46 }
 0xc30   :  { %v7526_v45 = vpop.f32.mrb[14].mxu0 }
 0xc31   :  { %v7531_v51 = vsel %vm6593_vm6, -1e+09, %v7526_v45  ;;  %v7058_v19 = vpop.f32.mrb[12].mxu1  ;;  %v13916_v52 = vpop.f32.mrb[15].mxu0 }
 0xc32   :  { %v7530_v21 = vsel %vm6592_vm7, -1e+09, %v7058_v19  ;;  %v13874_v22 = vpop.f32.mrb[13].mxu1  ;;  %v7535_v43 = vsel %vm644_vm2, %v7531_v51, -inf }
 0xc33   :  { %7536 = vmax.xlane.f32.xlu1 %v7535_v43  ;;  %v7532_v37 = vsel %vm644_vm2, %v7530_v21, -inf }
 0xc34   :  { %7533 = vmax.xlane.f32.xlu0 %v7532_v37 }
 0xc44   :  { %7558 = vrot.lane.b32.xlu1 %v16160_v3, %s15481_s0 }
 0xcc0   :  { %v7537_v39 = vpop.xlane.xlu1 %7536 }
 0xcc1   :  { %v7539_v47 = vsub.f32 %v7531_v51, %v7537_v39  ;;  %v7534_v53 = vpop.xlane.xlu0 %7533 }
 0xcc2   :  { %v7538_v54 = vsub.f32 %v7530_v21, %v7534_v53 }
 0xcc3   :  { %v7542_v55 = vmul.f32 1.442695, %v7539_v47 }
 0xcc4   :  { %v7540_v56 = vmul.f32 1.442695, %v7538_v54  ;;  %v7559_v7 = vpop.permute.xlu1 %7558 }
 0xcc5   :  { %15275 = vpow2.f32 %v7542_v55  ;;  %v7569_v12 = vand.u32 4294901760, %v7559_v7 }
 0xcc6   :  { %15277 = vpow2.f32 %v7540_v56 }
 0xcc7   :  { %v16307_v26 = vsub.f32 %v7559_v7, %v7569_v12 }
 0xcc9   :  { %v7652_v32 = vand.u32 4294901760, %v16307_v26 }
 0xccb   :  { %v7653_v57 = vsub.f32 %v16307_v26, %v7652_v32 }
 0xccd   :  { %v7654_v11 = vand.u32 4294901760, %v7653_v57 }
 0xccf   :  { %v15276_v59 = vpop.eup %15275 }
 0xcd0   :  { %v15278_v60 = vpop.eup %15277  ;;  %v7547_v23 = vsel %vm644_vm2, %v15276_v59, 0.0 }
 0xcd1   :  { %7548 = vadd.xlane.f32.xlu1 %v7547_v23  ;;  %v7544_v4 = vsel %vm644_vm2, %v15278_v60, 0.0 }
 0xcd2   :  { %7545 = vadd.xlane.f32.xlu0 %v7544_v4 }
 0xce8   :  { %7556 = vrot.lane.b32.xlu0 %v16162_v20, %s15481_s0 }
 0xcec   :  { %8024 = vrot.lane.b32.xlu0 %v16170_v44, %s15481_s0 }
 0xcf0   :  { %8026 = vrot.lane.b32.xlu0 %v16168_v38, %s15481_s0 }
 0xcf4   :  { %8494 = vrot.lane.b32.xlu0 %v16162_v20, %s15484_s28 }
 0xcf8   :  { %8496 = vrot.lane.b32.xlu0 %v16160_v3, %s15484_s28 }
 0xcfc   :  { %8492 = vrot.lane.b32.xlu0 %v16199_v16, %s15484_s28 }
 0xd00   :  { %8965 = vrot.lane.b32.xlu0 %v16170_v44, %s15484_s28 }
 0xd04   :  { %8967 = vrot.lane.b32.xlu0 %v16168_v38, %s15484_s28 }
 0xd08   :  { %8963 = vrot.lane.b32.xlu0 %v16195_v2, %s15484_s28 }
 0xd5e   :  { %v7549_v50 = vpop.xlane.xlu1 %7548 }
 0xd5f   :  { %15279 = vrcp.f32 %v7549_v50  ;;  %v7546_v9 = vpop.xlane.xlu0 %7545 }
 0xd60   :  { %15281 = vrcp.f32 %v7546_v9 }
 0xd63   :  { %v7557_v0 = vpop.permute.xlu0 %7556 }
 0xd64   :  { %v7566_v41 = vand.u32 4294901760, %v7557_v0 }
 0xd66   :  { %v16299_v17 = vpack.c.bf16 %v7569_v12, %v7566_v41  ;;  %v16303_v24 = vsub.f32 %v7557_v0, %v7566_v41 }
 0xd67   :  { %v16301_v16 = vpop.permute.xlu0 %8024 }
 0xd68   :  { %14663 = vmatpush3.bf16.msra.mxu1 %v16299_v17  ;;  %v7645_v30 = vand.u32 4294901760, %v16303_v24  ;;  %v14668_v55 = vpack.c.bf16 %v16307_v26, %v16303_v24  ;;  %v8034_v9 = vand.u32 4294901760, %v16301_v16 }
 0xd69   :  { %v15280_v25 = vpop.eup %15279  ;;  %14664 = vmatprep.subr.bf16.mxu1 %v15487_v63 }
 0xd6a   :  { %v15282_v2 = vpop.eup %15281  ;;  %v16309_v27 = vmul.f32 %v15280_v25, %v15276_v59  ;;  %v7646_v35 = vsub.f32 %v16303_v24, %v7645_v30  ;;  %v14674_v7 = vpack.c.bf16 %v7652_v32, %v7645_v30  ;;  %v8112_v41 = vsub.f32 %v16301_v16, %v8034_v9 }
 0xd6b   :  { %v7552_v28 = vmul.f32 %v15282_v2, %v15278_v60  ;;  %v16311_v29 = vpop.permute.xlu0 %8026 }
 0xd6c   :  { %7555 = vst.msk [vmem:[#allocation13 + $0x10] sm:$0xff] %vm644_vm2, %v16309_v27  ;;  %v7647_v61 = vand.u32 4294901760, %v7646_v35  ;;  %v8037_v4 = vand.u32 4294901760, %v16311_v29  ;;  %v8031_v50 = vsel %vm644_vm2, %v16309_v27, 0  ;;  %v8113_v2 = vand.u32 4294901760, %v8112_v41 }
 0xd6d   :  { %7554 = vst.msk [vmem:[#allocation13] sm:$0xff] %vm644_vm2, %v7552_v28  ;;  %v7563_v31 = vsel %vm644_vm2, %v7552_v28, 0  ;;  %v16366_v0 = vand.u32 4294901760, %v8031_v50 }
 0xd6e   :  { %v16319_v33 = vand.u32 4294901760, %v7563_v31  ;;  %v14665_v52 = vpack.c.bf16 %v7654_v11, %v7647_v61  ;;  %v8119_v12 = vsub.f32 %v16311_v29, %v8037_v4  ;;  %v8114_v16 = vsub.f32 %v8112_v41, %v8113_v2 }
 0xd6f   :  { %v8495_v34 = vpop.permute.xlu0 %8494  ;;  %v8101_v24 = vsub.f32 %v8031_v50, %v16366_v0  ;;  %v14680_v30 = vpack.c.bf16 %v8037_v4, %v8034_v9 }
 0xd70   :  { %v8500_v36 = vsel %vm644_vm2, %v8495_v34, 0  ;;  %v7633_v42 = vsub.f32 %v7563_v31, %v16319_v33  ;;  %v8120_v25 = vand.u32 4294901760, %v8119_v12 }
 0xd71   :  { %v8505_v40 = vand.u32 4294901760, %v8500_v36  ;;  %v8102_v27 = vand.u32 4294901760, %v8101_v24 }
 0xd72   :  { %v7634_v58 = vand.u32 4294901760, %v7633_v42  ;;  %v8121_v28 = vsub.f32 %v8119_v12, %v8120_v25 }
 0xd73   :  { %v8497_v49 = vpop.permute.xlu0 %8496  ;;  %v16325_v62 = vsub.f32 %v8500_v36, %v8505_v40  ;;  %v8103_v29 = vsub.f32 %v8101_v24, %v8102_v27 }
 0xd74   :  { %v8502_v6 = vsel %vm644_vm2, %v8497_v49, 0  ;;  %v7635_v10 = vsub.f32 %v7633_v42, %v7634_v58  ;;  %v8122_v31 = vand.u32 4294901760, %v8121_v28  ;;  %v15307_v28 = vld [vmem:[%s16748_s4 + $0x8] sm:$0xff] }
 0xd75   :  { %v8508_v8 = vand.u32 4294901760, %v8502_v6  ;;  %v8584_v51 = vand.u32 4294901760, %v16325_v62  ;;  %v8104_v32 = vand.u32 4294901760, %v8103_v29 }
 0xd76   :  { %v7636_v45 = vand.u32 4294901760, %v7635_v10 }
 0xd77   :  { %v16328_v5 = vpack.c.bf16 %v8508_v8, %v8505_v40  ;;  %v8590_v13 = vsub.f32 %v8502_v6, %v8508_v8  ;;  %v8493_v1 = vpop.permute.xlu0 %8492  ;;  %v8585_v39 = vsub.f32 %v16325_v62, %v8584_v51  ;;  %v14692_v40 = vpack.c.bf16 %v8120_v25, %v8113_v2 }
 0xd78   :  { %v8498_v19 = vsel %vm644_vm2, %v8493_v1, 0  ;;  %13922 = vmatmul.mubr.f32.vlgmr.msra.gmra.mrb[14].mxu1 %v7636_v45 }
 0xd79   :  { %v8591_v21 = vand.u32 4294901760, %v8590_v13  ;;  %v16332_v22 = vand.u32 4294901760, %v8498_v19  ;;  %14699 = vmatpush3.bf16.xpose.msra.mxu0 %v16328_v5  ;;  %14666 = vmatpush3.bf16.msra.mxu1 %v14665_v52  ;;  %v8586_v56 = vand.u32 4294901760, %v8585_v39  ;;  %v14704_v23 = vpack.c.bf16 %v8590_v13, %v16325_v62 }
 0xd7a   :  { %13928 = vmatprep.mubr.msk.f32.mxu1 %vm15480_vm1, %v15479_v46  ;;  %14667 = vmatprep.subr.bf16.mxu1 %v15487_v63 }
 0xd7b   :  { %v8592_v43 = vsub.f32 %v8590_v13, %v8591_v21  ;;  %v8572_v37 = vsub.f32 %v8498_v19, %v16332_v22  ;;  %14700 = vmatprep.subr.bf16.mxu0 %v15487_v63  ;;  %v14710_v26 = vpack.c.bf16 %v8591_v21, %v8584_v51  ;;  %v8966_v35 = vpop.permute.xlu0 %8965 }
 0xd7c   :  { %v8971_v49 = vsel %vm644_vm2, %v8966_v35, 0 }
 0xd7d   :  { %v8573_v47 = vand.u32 4294901760, %v8572_v37  ;;  %v8593_v53 = vand.u32 4294901760, %v8592_v43  ;;  %v8976_v62 = vand.u32 4294901760, %v8971_v49 }
 0xd7f   :  { %v8574_v54 = vsub.f32 %v8572_v37, %v8573_v47  ;;  %v14701_v60 = vpack.c.bf16 %v8593_v53, %v8586_v56  ;;  %v8968_v36 = vpop.permute.xlu0 %8967  ;;  %v9054_v10 = vsub.f32 %v8971_v49, %v8976_v62 }
 0xd80   :  { %13929 = vmatmul.mubr.f32.vlgmr.msra.gmra.mrb[14].mxu1 %v16319_v33 }
 0xd81   :  { %v8575_v59 = vand.u32 4294901760, %v8574_v54  ;;  %14669 = vmatpush3.bf16.msra.mxu1 %v14668_v55  ;;  %13935 = vmatprep.mubr.msk.f32.mxu1 %vm15480_vm1, %v15479_v46  ;;  %v9055_v13 = vand.u32 4294901760, %v9054_v10 }
 0xd82   :  { %14670 = vmatprep.subr.bf16.mxu1 %v15487_v63 }
 0xd83   :  { %14006 = vmatmul.mubr.f32.vlgmr.msra.gmra.mrb[16].mxu0 %v8575_v59  ;;  %v8964_v57 = vpop.permute.xlu0 %8963  ;;  %v9056_v19 = vsub.f32 %v9054_v10, %v9055_v13 }
 0xd84   :  { %14702 = vmatpush3.bf16.xpose.msra.mxu0 %v14701_v60  ;;  %14012 = vmatprep.mubr.msk.f32.mxu0 %vm15480_vm1, %v15479_v46  ;;  %v8969_v61 = vsel %vm644_vm2, %v8964_v57, 0 }
 0xd85   :  { %14703 = vmatprep.subr.bf16.mxu0 %v15487_v63  ;;  %v9042_v6 = vand.u32 4294901760, %v8969_v61 }
 0xd87   :  { %v9043_v11 = vsub.f32 %v8969_v61, %v9042_v6 }
 0xd88   :  { %13936 = vmatmul.mubr.f32.vlgmr.msra.gmra.mrb[14].mxu1 %v7633_v42  ;;  %v8973_v42 = vsel %vm644_vm2, %v8968_v36, 0 }
 0xd89   :  { %14672 = vmatpush3.bf16.msra.mxu1 %v16299_v17  ;;  %13942 = vmatprep.mubr.msk.f32.mxu1 %vm15480_vm1, %v15479_v46  ;;  %v9044_v1 = vand.u32 4294901760, %v9043_v11 }
 0xd8a   :  { %14673 = vmatprep.subr.bf16.mxu1 %v15487_v63 }
 0xd8b   :  { %14013 = vmatmul.mubr.f32.vlgmr.msra.gmra.mrb[16].mxu0 %v16332_v22  ;;  %v9045_v52 = vsub.f32 %v9043_v11, %v9044_v1 }
 0xd8c   :  { %14705 = vmatpush3.bf16.xpose.msra.mxu0 %v14704_v23  ;;  %14019 = vmatprep.mubr.msk.f32.mxu0 %vm15480_vm1, %v15479_v46 }
 0xd8d   :  { %14706 = vmatprep.subr.bf16.mxu0 %v15487_v63  ;;  %v9046_v43 = vand.u32 4294901760, %v9045_v52 }
 0xd90   :  { %13943 = vmatmul.mubr.f32.vlgmr.msra.gmra.mrb[14].mxu1 %v7634_v58  ;;  %v8979_v58 = vand.u32 4294901760, %v8973_v42 }
 0xd91   :  { %14675 = vmatpush3.bf16.msra.mxu1 %v14674_v7  ;;  %13949 = vmatprep.mubr.msk.f32.mxu1 %vm15480_vm1, %v15479_v46 }
 0xd92   :  { %14676 = vmatprep.subr.bf16.mxu1 %v15487_v63  ;;  %v9061_v8 = vsub.f32 %v8973_v42, %v8979_v58  ;;  %v14716_v45 = vpack.c.bf16 %v8979_v58, %v8976_v62 }
 0xd93   :  { %14020 = vmatmul.mubr.f32.vlgmr.msra.gmra.mrb[16].mxu0 %v8572_v37 }
 0xd94   :  { %14708 = vmatpush3.bf16.xpose.msra.mxu0 %v16328_v5  ;;  %14026 = vmatprep.mubr.msk.f32.mxu0 %vm15480_vm1, %v15479_v46  ;;  %v14722_v39 = vpack.c.bf16 %v9061_v8, %v9054_v10 }
 0xd95   :  { %14709 = vmatprep.subr.bf16.mxu0 %v15487_v63 }
 0xd98   :  { %13950 = vmatmul.mubr.f32.vlgmr.msra.gmra.mrb[14].mxu1 %v16319_v33 }
 0xd99   :  { %14678 = vmatpush3.bf16.msra.mxu1 %v16299_v17  ;;  %13956 = vmatprep.mubr.msk.f32.mxu1 %vm15480_vm1, %v15479_v46  ;;  %v8115_v17 = vand.u32 4294901760, %v8114_v16 }
 0xd9a   :  { %14679 = vmatprep.subr.bf16.mxu1 %v15487_v63 }
 0xd9b   :  { %14027 = vmatmul.mubr.f32.vlgmr.msra.gmra.mrb[16].mxu0 %v8573_v47  ;;  %v14683_v34 = vpack.c.bf16 %v8122_v31, %v8115_v17 }
 0xd9c   :  { %14711 = vmatpush3.bf16.xpose.msra.mxu0 %v14710_v26  ;;  %14033 = vmatprep.mubr.msk.f32.mxu0 %vm15480_vm1, %v15479_v46 }
 0xd9d   :  { %14712 = vmatprep.subr.bf16.mxu0 %v15487_v63 }
 0xda0   :  { %13957 = vmatmul.mubr.f32.vlgmr.msra.gmra.mrb[14].mxu1 %v16319_v33  ;;  %v14686_v33 = vpack.c.bf16 %v8119_v12, %v8112_v41 }
 0xda1   :  { %14681 = vmatpush3.bf16.msra.mxu1 %v14680_v30  ;;  %13963 = vmatprep.mubr.msk.f32.mxu1 %vm15480_vm1, %v15479_v46 }
 0xda2   :  { %14682 = vmatprep.subr.bf16.mxu1 %v15487_v63 }
 0xda3   :  { %14034 = vmatmul.mubr.f32.vlgmr.msra.gmra.mrb[16].mxu0 %v16332_v22 }
 0xda4   :  { %14714 = vmatpush3.bf16.xpose.msra.mxu0 %v16328_v5  ;;  %14040 = vmatprep.mubr.msk.f32.mxu0 %vm15480_vm1, %v15479_v46  ;;  %v9062_v5 = vand.u32 4294901760, %v9061_v8 }
 0xda5   :  { %13964 = vmatmul.mubr.f32.vlgmr.msra.gmra.mrb[16].mxu1 %v8104_v32  ;;  %14733 = vmatprep.subr.bf16.mxu0 %v15487_v63 }
 0xda6   :  { %14684 = vmatpush3.bf16.msra.mxu1 %v14683_v34  ;;  %13970 = vmatprep.mubr.msk.f32.mxu1 %vm15480_vm1, %v15479_v46  ;;  %v9063_v51 = vsub.f32 %v9061_v8, %v9062_v5  ;;  %v14728_v47 = vpack.c.bf16 %v9062_v5, %v9055_v13 }
 0xda7   :  { %14685 = vmatprep.subr.bf16.mxu1 %v15487_v63 }
 0xda8   :  { %v9064_v21 = vand.u32 4294901760, %v9063_v51 }
 0xdab   :  { %14041 = vmatmul.mubr.f32.vlgmr.msra.gmra.mrb[16].mxu0 %v16332_v22  ;;  %v9057_v22 = vand.u32 4294901760, %v9056_v19 }
 0xdac   :  { %14089 = vmatprep.mubr.msk.f32.mxu0 %vm15480_vm1, %v15479_v46 }
 0xdad   :  { %13971 = vmatmul.mubr.f32.vlgmr.msra.gmra.mrb[16].mxu1 %v16366_v0  ;;  %v14719_v37 = vpack.c.bf16 %v9064_v21, %v9057_v22 }
 0xdae   :  { %14687 = vmatpush3.bf16.msra.mxu1 %v14686_v33  ;;  %13977 = vmatprep.mubr.msk.f32.mxu1 %vm15480_vm1, %v15479_v46 }
 0xdaf   :  { %14688 = vmatprep.subr.bf16.mxu1 %v15487_v63 }
 0xdb5   :  { %13978 = vmatmul.mubr.f32.vlgmr.msra.gmra.mrb[16].mxu1 %v8101_v24 }
 0xdb6   :  { %14690 = vmatpush3.bf16.msra.mxu1 %v14680_v30  ;;  %13984 = vmatprep.mubr.msk.f32.mxu1 %vm15480_vm1, %v15479_v46 }
 0xdb7   :  { %14691 = vmatprep.subr.bf16.mxu1 %v15487_v63 }
 0xdbd   :  { %13985 = vmatmul.mubr.f32.vlgmr.msra.gmra.mrb[16].mxu1 %v8102_v27 }
 0xdbe   :  { %14693 = vmatpush3.bf16.msra.mxu1 %v14692_v40  ;;  %13991 = vmatprep.mubr.msk.f32.mxu1 %vm15480_vm1, %v15479_v46 }
 0xdbf   :  { %14694 = vmatprep.subr.bf16.mxu1 %v15487_v63 }
 0xdc5   :  { %13992 = vmatmul.mubr.f32.vlgmr.msra.gmra.mrb[16].mxu1 %v16366_v0 }
 0xdc6   :  { %14696 = vmatpush3.bf16.msra.mxu1 %v14680_v30  ;;  %13998 = vmatprep.mubr.msk.f32.mxu1 %vm15480_vm1, %v15479_v46 }
 0xdc7   :  { %14715 = vmatprep.subr.bf16.mxu1 %v15487_v63 }
 0xdcd   :  { %13999 = vmatmul.mubr.f32.vlgmr.msra.gmra.mrb[16].mxu1 %v16366_v0 }
 0xdce   :  { %14047 = vmatprep.mubr.msk.f32.mxu1 %vm15480_vm1, %v15479_v46 }
 0xdcf   :  { %14717 = vmatpush3.bf16.xpose.msra.mxu1 %v14716_v45 }
 0xdd0   :  { %14718 = vmatprep.subr.bf16.mxu1 %v15487_v63 }
 0xdd6   :  { %14048 = vmatmul.mubr.f32.vlgmr.msra.gmra.mrb[18].mxu1 %v9046_v43 }
 0xdd7   :  { %14720 = vmatpush3.bf16.xpose.msra.mxu1 %v14719_v37  ;;  %14054 = vmatprep.mubr.msk.f32.mxu1 %vm15480_vm1, %v15479_v46 }
 0xdd8   :  { %14721 = vmatprep.subr.bf16.mxu1 %v15487_v63 }
 0xdde   :  { %14055 = vmatmul.mubr.f32.vlgmr.msra.gmra.mrb[18].mxu1 %v9042_v6 }
 0xddf   :  { %14723 = vmatpush3.bf16.xpose.msra.mxu1 %v14722_v39  ;;  %14061 = vmatprep.mubr.msk.f32.mxu1 %vm15480_vm1, %v15479_v46 }
 0xde0   :  { %14724 = vmatprep.subr.bf16.mxu1 %v15487_v63 }
 0xde6   :  { %14062 = vmatmul.mubr.f32.vlgmr.msra.gmra.mrb[18].mxu1 %v9043_v11 }
 0xde7   :  { %14726 = vmatpush3.bf16.xpose.msra.mxu1 %v14716_v45  ;;  %14068 = vmatprep.mubr.msk.f32.mxu1 %vm15480_vm1, %v15479_v46 }
 0xde8   :  { %14727 = vmatprep.subr.bf16.mxu1 %v15487_v63 }
 0xdee   :  { %14069 = vmatmul.mubr.f32.vlgmr.msra.gmra.mrb[18].mxu1 %v9044_v1 }
 0xdef   :  { %14729 = vmatpush3.bf16.xpose.msra.mxu1 %v14728_v47  ;;  %14075 = vmatprep.mubr.msk.f32.mxu1 %vm15480_vm1, %v15479_v46 }
 0xdf0   :  { %14730 = vmatprep.subr.bf16.mxu1 %v15487_v63 }
 0xdf6   :  { %14076 = vmatmul.mubr.f32.vlgmr.msra.gmra.mrb[18].mxu1 %v9042_v6 }
 0xdf7   :  { %14732 = vmatpush3.bf16.xpose.msra.mxu1 %v14716_v45  ;;  %14082 = vmatprep.mubr.msk.f32.mxu1 %vm15480_vm1, %v15479_v46 }
 0xdf8   :  { %14751 = vmatprep.subr.bf16.mxu1 %v15487_v63 }
 0xdfe   :  { %14083 = vmatmul.mubr.f32.vlgmr.msra.gmra.mrb[18].mxu1 %v9042_v6 }
 0xdff   :  { %14131 = vmatprep.mubr.msk.f32.mxu1 %vm15480_vm1, %v15479_v46 }
 0xe73   :  { %v16436_v53 = vpop.f32.mrb[14].mxu1 }
 0xe74   :  { %v13958_v54 = vpop.f32.mrb[15].mxu1 }
 0xe7e   :  { %v8959_v55 = vpop.f32.mrb[16].mxu0 }
 0xe7f   :  { %v9434_v56 = vsel %vm6592_vm7, -1e+09, %v8959_v55  ;;  %v14042_v59 = vpop.f32.mrb[17].mxu0 }
 0xe80   :  { %v9436_v60 = vsel %vm644_vm2, %v9434_v56, -inf }
 0xe81   :  { %9437 = vmax.xlane.f32.xlu0 %v9436_v60 }
 0xe97   :  { %9929 = vrot.lane.b32.xlu0 %v16170_v44, %s15483_s27 }
 0xea0   :  { %v16443_v23 = vpop.f32.mrb[16].mxu1 }
 0xea1   :  { %v14000_v4 = vpop.f32.mrb[17].mxu1 }
 0xed1   :  { %v9430_v7 = vpop.f32.mrb[18].mxu1 }
 0xed2   :  { %v9435_v50 = vsel %vm6593_vm6, -1e+09, %v9430_v7  ;;  %v14084_v9 = vpop.f32.mrb[19].mxu1 }
 0xed3   :  { %v9439_v0 = vsel %vm644_vm2, %v9435_v50, -inf }
 0xed4   :  { %9440 = vmax.xlane.f32.xlu1 %v9439_v0 }
 0xf0e   :  { %v9438_v14 = vpop.xlane.xlu0 %9437 }
 0xf0f   :  { %v9442_v12 = vsub.f32 %v9434_v56, %v9438_v14 }
 0xf11   :  { %v9444_v41 = vmul.f32 1.442695, %v9442_v12 }
 0xf12   :  { %v9930_v19 = vpop.permute.xlu0 %9929 }
 0xf13   :  { %15283 = vpow2.f32 %v9444_v41  ;;  %v9939_v21 = vand.u32 4294901760, %v9930_v19 }
 0xf15   :  { %v10017_v39 = vsub.f32 %v9930_v19, %v9939_v21  ;;  %v10918_v19 = vsel %vm644_vm2, %v16436_v53, 0 }
 0xf17   :  { %v10018_v56 = vand.u32 4294901760, %v10017_v39 }
 0xf1d   :  { %v15284_v24 = vpop.eup %15283 }
 0xf1e   :  { %v9448_v25 = vsel %vm644_vm2, %v15284_v24, 0.0 }
 0xf1f   :  { %9449 = vadd.xlane.f32.xlu1 %v9448_v25 }
 0xf30   :  { %9461 = vrot.lane.b32.xlu1 %v16162_v20, %s15483_s27  ;;  %v15305_v20 = vld [vmem:[%s16748_s4 + $0x38] sm:$0xff] }
 0xf34   :  { %9463 = vrot.lane.b32.xlu1 %v16160_v3, %s15483_s27  ;;  %v15306_v3 = vld [vmem:[%s16748_s4 + $0x50] sm:$0xff] }
 0xf61   :  { %v9441_v44 = vpop.xlane.xlu1 %9440 }
 0xf62   :  { %v9443_v15 = vsub.f32 %v9435_v50, %v9441_v44  ;;  %v10019_v50 = vsub.f32 %v10017_v39, %v10018_v56 }
 0xf64   :  { %v9446_v2 = vmul.f32 1.442695, %v9443_v15  ;;  %v10020_v12 = vand.u32 4294901760, %v10019_v50 }
 0xf66   :  { %15285 = vpow2.f32 %v9446_v2 }
 0xf70   :  { %v16453_v26 = vpop.eup %15285 }
 0xf71   :  { %v9451_v27 = vsel %vm644_vm2, %v16453_v26, 0.0 }
 0xf72   :  { %9452 = vadd.xlane.f32.xlu1 %v9451_v27 }
 0xf83   :  { %9931 = vrot.lane.b32.xlu1 %v16168_v38, %s15483_s27  ;;  %v15308_v38 = vld [vmem:[%s16748_s4 + $0x20] sm:$0xff] }
 0xf87   :  { %10397 = vrot.lane.b32.xlu1 %v15305_v20, %s15486_s30 }
 0xf8b   :  { %10399 = vrot.lane.b32.xlu1 %v15306_v3, %s15486_s30 }
 0xf8f   :  { %10911 = vrot.lane.b32.xlu1 %v15307_v28, %s15486_s30 }
 0xf93   :  { %10913 = vrot.lane.b32.xlu1 %v15308_v38, %s15486_s30 }
 0xfac   :  { %v9450_v16 = vpop.xlane.xlu1 %9449 }
 0xfad   :  { %15287 = vrcp.f32 %v9450_v16 }
 0xfb0   :  { %v9462_v29 = vpop.permute.xlu1 %9461 }
 0xfb1   :  { %v9471_v30 = vand.u32 4294901760, %v9462_v29 }
 0xfb3   :  { %v9549_v32 = vsub.f32 %v9462_v29, %v9471_v30 }
 0xfb4   :  { %v9464_v31 = vpop.permute.xlu1 %9463 }
 0xfb5   :  { %v9474_v17 = vand.u32 4294901760, %v9464_v31  ;;  %v9550_v42 = vand.u32 4294901760, %v9549_v32 }
 0xfb7   :  { %v15288_v34 = vpop.eup %15287  ;;  %v14734_v33 = vpack.c.bf16 %v9474_v17, %v9471_v30  ;;  %v9556_v35 = vsub.f32 %v9464_v31, %v9474_v17  ;;  %v9551_v62 = vsub.f32 %v9549_v32, %v9550_v42 }
 0xfb8   :  { %v9456_v36 = vmul.f32 %v15288_v34, %v15284_v24 }
 0xfb9   :  { %v9557_v40 = vand.u32 4294901760, %v9556_v35  ;;  %14735 = vmatpush3.bf16.msra.mxu0 %v14734_v33  ;;  %v9552_v11 = vand.u32 4294901760, %v9551_v62  ;;  %v14740_v1 = vpack.c.bf16 %v9556_v35, %v9549_v32 }
 0xfba   :  { %9459 = vst.msk [vmem:[#allocation13 + $0x8] sm:$0xff] %vm644_vm2, %v9456_v36  ;;  %14736 = vmatprep.subr.bf16.mxu0 %v15487_v63  ;;  %v9468_v57 = vsel %vm644_vm2, %v9456_v36, 0 }
 0xfbb   :  { %v9537_v49 = vand.u32 4294901760, %v9468_v57  ;;  %v9558_v58 = vsub.f32 %v9556_v35, %v9557_v40  ;;  %v14746_v45 = vpack.c.bf16 %v9557_v40, %v9550_v42 }
 0xfbd   :  { %v9538_v61 = vsub.f32 %v9468_v57, %v9537_v49  ;;  %v9559_v8 = vand.u32 4294901760, %v9558_v58 }
 0xfbf   :  { %v9539_v6 = vand.u32 4294901760, %v9538_v61  ;;  %v14737_v13 = vpack.c.bf16 %v9559_v8, %v9552_v11 }
 0xfc1   :  { %v9540_v10 = vsub.f32 %v9538_v61, %v9539_v6 }
 0xfc3   :  { %v9541_v5 = vand.u32 4294901760, %v9540_v10 }
 0xfc5   :  { %14090 = vmatmul.mubr.f32.vlgmr.msra.gmra.mrb[18].mxu0 %v9541_v5 }
 0xfc6   :  { %14738 = vmatpush3.bf16.msra.mxu0 %v14737_v13  ;;  %14096 = vmatprep.mubr.msk.f32.mxu0 %vm15480_vm1, %v15479_v46 }
 0xfc7   :  { %14739 = vmatprep.subr.bf16.mxu0 %v15487_v63 }
 0xfcd   :  { %14097 = vmatmul.mubr.f32.vlgmr.msra.gmra.mrb[18].mxu0 %v9537_v49 }
 0xfce   :  { %14741 = vmatpush3.bf16.msra.mxu0 %v14740_v1  ;;  %14103 = vmatprep.mubr.msk.f32.mxu0 %vm15480_vm1, %v15479_v46 }
 0xfcf   :  { %14742 = vmatprep.subr.bf16.mxu0 %v15487_v63 }
 0xfd5   :  { %14104 = vmatmul.mubr.f32.vlgmr.msra.gmra.mrb[18].mxu0 %v9538_v61 }
 0xfd6   :  { %14744 = vmatpush3.bf16.msra.mxu0 %v14734_v33  ;;  %14110 = vmatprep.mubr.msk.f32.mxu0 %vm15480_vm1, %v15479_v46 }
 0xfd7   :  { %14745 = vmatprep.subr.bf16.mxu0 %v15487_v63 }
 0xfdd   :  { %14111 = vmatmul.mubr.f32.vlgmr.msra.gmra.mrb[18].mxu0 %v9539_v6 }
 0xfde   :  { %14747 = vmatpush3.bf16.msra.mxu0 %v14746_v45  ;;  %14117 = vmatprep.mubr.msk.f32.mxu0 %vm15480_vm1, %v15479_v46 }
 0xfdf   :  { %14748 = vmatprep.subr.bf16.mxu0 %v15487_v63 }
 0xfe5   :  { %14118 = vmatmul.mubr.f32.vlgmr.msra.gmra.mrb[18].mxu0 %v9537_v49 }
 0xfe6   :  { %14750 = vmatpush3.bf16.msra.mxu0 %v14734_v33  ;;  %14124 = vmatprep.mubr.msk.f32.mxu0 %vm15480_vm1, %v15479_v46 }
 0xfed   :  { %14125 = vmatmul.mubr.f32.vlgmr.msra.gmra.mrb[18].mxu0 %v9537_v49 }
 0xfff   :  { %v9453_v51 = vpop.xlane.xlu1 %9452 }
0x1000   :  { %15289 = vrcp.f32 %v9453_v51 }
0x1003   :  { %v9932_v52 = vpop.permute.xlu1 %9931 }
0x1004   :  { %v9942_v22 = vand.u32 4294901760, %v9932_v52 }
0x1006   :  { %v14752_v43 = vpack.c.bf16 %v9942_v22, %v9939_v21  ;;  %v10024_v37 = vsub.f32 %v9932_v52, %v9942_v22  ;;  %v10990_v22 = vand.u32 4294901760, %v10918_v19 }
0x1007   :  { %v10398_v15 = vpop.permute.xlu1 %10397 }
0x1008   :  { %14753 = vmatpush3.bf16.msra.mxu1 %v14752_v43  ;;  %v10025_v55 = vand.u32 4294901760, %v10024_v37  ;;  %v14758_v25 = vpack.c.bf16 %v10024_v37, %v10017_v39  ;;  %v10410_v2 = vand.u32 4294901760, %v10398_v15  ;;  %v10991_v39 = vsub.f32 %v10918_v19, %v10990_v22 }
0x1009   :  { %14754 = vmatprep.subr.bf16.mxu1 %v15487_v63 }
0x100a   :  { %v15290_v47 = vpop.eup %15289  ;;  %v10026_v4 = vsub.f32 %v10024_v37, %v10025_v55  ;;  %v14764_v44 = vpack.c.bf16 %v10025_v55, %v10018_v56 }
0x100b   :  { %v9457_v54 = vmul.f32 %v15290_v47, %v16453_v26  ;;  %v10498_v26 = vsub.f32 %v10398_v15, %v10410_v2  ;;  %v10400_v27 = vpop.permute.xlu1 %10399  ;;  %v10921_v47 = vsel %vm644_vm2, %v16443_v23, 0 }
0x100c   :  { %v10027_v0 = vand.u32 4294901760, %v10026_v4  ;;  %v10413_v20 = vand.u32 4294901760, %v10400_v27 }
0x100d   :  { %9460 = vst.msk [vmem:[#allocation13 + $0x18] sm:$0xff] %vm644_vm2, %v9457_v54  ;;  %v9936_v59 = vsel %vm644_vm2, %v9457_v54, 0  ;;  %v10499_v38 = vand.u32 4294901760, %v10498_v26  ;;  %v11000_v54 = vand.u32 4294901760, %v10921_v47 }
0x100e   :  { %v10005_v60 = vand.u32 4294901760, %v9936_v59  ;;  %v14755_v24 = vpack.c.bf16 %v10027_v0, %v10020_v12  ;;  %v16510_v3 = vpack.c.bf16 %v10413_v20, %v10410_v2  ;;  %v10505_v28 = vsub.f32 %v10400_v27, %v10413_v20 }
0x100f   :  { %v10500_v16 = vsub.f32 %v10498_v26, %v10499_v38  ;;  %v10912_v5 = vpop.permute.xlu1 %10911  ;;  %v11001_v53 = vsub.f32 %v10921_v47, %v11000_v54 }
0x1010   :  { %v10006_v7 = vsub.f32 %v9936_v59, %v10005_v60  ;;  %14770 = vmatprep.subr.bf16.mxu0 %v16510_v3  ;;  %v14777_v11 = vpack.c.bf16 %v10505_v28, %v10498_v26  ;;  %v10924_v45 = vand.u32 4294901760, %v10912_v5 }
0x1011   :  { %14772 = vmatpush3.bf16.msra.mxu0 %v16510_v3  ;;  %v10501_v30 = vand.u32 4294901760, %v10500_v16 }
0x1012   :  { %v10007_v9 = vand.u32 4294901760, %v10006_v7  ;;  %v11012_v52 = vsub.f32 %v10912_v5, %v10924_v45 }
0x1013   :  { %v10914_v13 = vpop.permute.xlu1 %10913 }
0x1014   :  { %v10008_v14 = vsub.f32 %v10006_v7, %v10007_v9  ;;  %v10927_v51 = vand.u32 4294901760, %v10914_v13 }
0x1016   :  { %v10009_v41 = vand.u32 4294901760, %v10008_v14  ;;  %v11019_v21 = vsub.f32 %v10914_v13, %v10927_v51  ;;  %v14793_v56 = vpack.c.bf16 %v10927_v51, %v10924_v45 }
0x1018   :  { %14132 = vmatmul.mubr.f32.vlgmr.msra.gmra.mrb[20].mxu1 %v10009_v41  ;;  %v11020_v37 = vand.u32 4294901760, %v11019_v21  ;;  %v14801_v41 = vpack.c.bf16 %v11019_v21, %v11012_v52 }
0x1019   :  { %14756 = vmatpush3.bf16.msra.mxu1 %v14755_v24  ;;  %14138 = vmatprep.mubr.msk.f32.mxu1 %vm15480_vm1, %v15479_v46 }
0x101a   :  { %14757 = vmatprep.subr.bf16.mxu1 %v15487_v63  ;;  %v11021_v59 = vsub.f32 %v11019_v21, %v11020_v37 }
0x1020   :  { %14139 = vmatmul.mubr.f32.vlgmr.msra.gmra.mrb[20].mxu1 %v10005_v60 }
0x1021   :  { %14759 = vmatpush3.bf16.msra.mxu1 %v14758_v25  ;;  %14145 = vmatprep.mubr.msk.f32.mxu1 %vm15480_vm1, %v15479_v46  ;;  %v12734_v25 = vld [vmem:[%s16750_s6 + $0x4] ss:$0 sm:$0xff] }
0x1022   :  { %14760 = vmatprep.subr.bf16.mxu1 %v15487_v63 }
0x1028   :  { %14146 = vmatmul.mubr.f32.vlgmr.msra.gmra.mrb[20].mxu1 %v10006_v7  ;;  %v11022_v7 = vand.u32 4294901760, %v11021_v59 }
0x1029   :  { %14762 = vmatpush3.bf16.msra.mxu1 %v14752_v43  ;;  %14152 = vmatprep.mubr.msk.f32.mxu1 %vm15480_vm1, %v15479_v46 }
0x102a   :  { %14763 = vmatprep.subr.bf16.mxu1 %v15487_v63 }
0x1030   :  { %14153 = vmatmul.mubr.f32.vlgmr.msra.gmra.mrb[20].mxu1 %v10007_v9  ;;  %v11002_v9 = vand.u32 4294901760, %v11001_v53 }
0x1031   :  { %14765 = vmatpush3.bf16.msra.mxu1 %v14764_v44  ;;  %14159 = vmatprep.mubr.msk.f32.mxu1 %vm15480_vm1, %v15479_v46 }
0x1032   :  { %14766 = vmatprep.subr.bf16.mxu1 %v15487_v63  ;;  %v10506_v63 = vand.u32 4294901760, %v10505_v28  ;;  %v11003_v23 = vsub.f32 %v11001_v53, %v11002_v9 }
0x1034   :  { %v10507_v29 = vsub.f32 %v10505_v28, %v10506_v63  ;;  %v14785_v1 = vpack.c.bf16 %v10506_v63, %v10499_v38  ;;  %v11004_v12 = vand.u32 4294901760, %v11003_v23  ;;  %v12736_v23 = vld [vmem:[%s16750_s6 + $0x8] ss:$0 sm:$0xff] }
0x1036   :  { %v10508_v31 = vand.u32 4294901760, %v10507_v29 }
0x1038   :  { %14160 = vmatmul.mubr.f32.vlgmr.msra.gmra.mrb[20].mxu1 %v10005_v60 }
0x1039   :  { %14768 = vmatpush3.bf16.msra.mxu1 %v14752_v43  ;;  %14166 = vmatprep.mubr.msk.f32.mxu1 %vm15480_vm1, %v15479_v46  ;;  %v14773_v46 = vpack.c.bf16 %v10508_v31, %v10501_v30  ;;  %v11013_v43 = vand.u32 4294901760, %v11012_v52 }
0x103b   :  { %14774 = vmatprep.subr.bf16.mxu0 %v14773_v46  ;;  %v11014_v55 = vsub.f32 %v11012_v52, %v11013_v43  ;;  %v14809_v24 = vpack.c.bf16 %v11020_v37, %v11013_v43 }
0x103d   :  { %v11015_v4 = vand.u32 4294901760, %v11014_v55 }
0x103f   :  { %v14797_v0 = vpack.c.bf16 %v11022_v7, %v11015_v4 }
0x1040   :  { %14167 = vmatmul.mubr.f32.vlgmr.msra.gmra.mrb[20].mxu1 %v10005_v60  ;;  %v10992_v60 = vand.u32 4294901760, %v10991_v39 }
0x1042   :  { %v10993_v50 = vsub.f32 %v10991_v39, %v10992_v60 }
0x1044   :  { %v10994_v14 = vand.u32 4294901760, %v10993_v50 }
0x10c0   :  { %v9925_v17 = vpop.f32.mrb[18].mxu0 }
0x10c1   :  { %v10404_v32 = vsel %vm644_vm2, %v9925_v17, 0  ;;  %v14126_v34 = vpop.f32.mrb[19].mxu0 }
0x10c2   :  { %v10476_v33 = vand.u32 4294901760, %v10404_v32  ;;  %v11474_v34 = vld [vmem:[%s16748_s4 + $0x28] sm:$0xff] }
0x10c4   :  { %v10477_v35 = vsub.f32 %v10404_v32, %v10476_v33 }
0x10c6   :  { %v10478_v36 = vand.u32 4294901760, %v10477_v35 }
0x10c8   :  { %v10479_v40 = vsub.f32 %v10477_v35, %v10478_v36 }
0x10ca   :  { %v10480_v42 = vand.u32 4294901760, %v10479_v40  ;;  %v11476_v40 = vld [vmem:[%s16748_s4 + $0x58] sm:$0xff] }
0x10cc   :  { %14173 = vmatprep.mubr.f32.mxu0 %v10480_v42 }
0x1113   :  { %v10393_v57 = vpop.f32.mrb[20].mxu1 }
0x1114   :  { %v10407_v49 = vsel %vm644_vm2, %v10393_v57, 0  ;;  %v14168_v58 = vpop.f32.mrb[21].mxu1  ;;  %v11498_v57 = vand.u32 4294901760, %v11476_v40 }
0x1115   :  { %v10486_v61 = vand.u32 4294901760, %v10407_v49 }
0x1116   :  { %v11600_v13 = vsub.f32 %v11476_v40, %v11498_v57 }
0x1117   :  { %v10487_v62 = vsub.f32 %v10407_v49, %v10486_v61 }
0x1118   :  { %v11601_v19 = vand.u32 4294901760, %v11600_v13 }
0x1119   :  { %v10488_v6 = vand.u32 4294901760, %v10487_v62 }
0x111b   :  { %v10489_v8 = vsub.f32 %v10487_v62, %v10488_v6 }
0x111d   :  { %v10490_v10 = vand.u32 4294901760, %v10489_v8 }
0x111f   :  { %14174 = vmatmul.mubr.f32.vlgmr.msra.gmra.mrb[20].mxu0 %v10490_v10 }
0x1120   :  { %14776 = vmatpush3.bf16.msra.mxu0 %v14773_v46  ;;  %14180 = vmatprep.mubr.f32.mxu0 %v10476_v33 }
0x1121   :  { %14778 = vmatprep.subr.bf16.mxu0 %v14777_v11 }
0x1127   :  { %14181 = vmatmul.mubr.f32.vlgmr.msra.gmra.mrb[20].mxu0 %v10486_v61 }
0x1128   :  { %14780 = vmatpush3.bf16.msra.mxu0 %v14777_v11  ;;  %14187 = vmatprep.mubr.f32.mxu0 %v10477_v35 }
0x1129   :  { %14782 = vmatprep.subr.bf16.mxu0 %v16510_v3 }
0x112f   :  { %14188 = vmatmul.mubr.f32.vlgmr.msra.gmra.mrb[20].mxu0 %v10487_v62 }
0x1130   :  { %14784 = vmatpush3.bf16.msra.mxu0 %v16510_v3  ;;  %14194 = vmatprep.mubr.f32.mxu0 %v10478_v36  ;;  %v11492_v36 = vand.u32 4294901760, %v11474_v34 }
0x1131   :  { %14786 = vmatprep.subr.bf16.mxu0 %v14785_v1 }
0x1132   :  { %v11586_v62 = vsub.f32 %v11474_v34, %v11492_v36  ;;  %v12037_v34 = vld [vmem:[%s16749_s5 + $0x18] sm:$0xff] }
0x1133   :  { %v12064_v40 = vand.u32 4294901760, %v12037_v34 }
0x1134   :  { %v11587_v8 = vand.u32 4294901760, %v11586_v62 }
0x1136   :  { %v11588_v11 = vsub.f32 %v11586_v62, %v11587_v8 }
0x1137   :  { %14195 = vmatmul.mubr.f32.vlgmr.msra.gmra.mrb[20].mxu0 %v10488_v6 }
0x1138   :  { %14788 = vmatpush3.bf16.msra.mxu0 %v14785_v1  ;;  %14201 = vmatprep.mubr.f32.mxu0 %v10476_v33  ;;  %v11589_v45 = vand.u32 4294901760, %v11588_v11 }
0x1139   :  { %14790 = vmatprep.subr.bf16.mxu0 %v16510_v3 }
0x113f   :  { %14202 = vmatmul.mubr.f32.vlgmr.msra.gmra.mrb[20].mxu0 %v10486_v61 }
0x1140   :  { %14792 = vmatpush3.bf16.msra.mxu0 %v16510_v3  ;;  %14208 = vmatprep.mubr.f32.mxu0 %v10476_v33  ;;  %v11475_v33 = vld [vmem:[%s16748_s4 + $0x40] sm:$0xff] }
0x1141   :  { %14794 = vmatprep.subr.bf16.mxu0 %v14793_v56  ;;  %v11495_v42 = vand.u32 4294901760, %v11475_v33 }
0x1143   :  { %v16547_v58 = vpack.c.bf16 %v11498_v57, %v11495_v42  ;;  %v11593_v5 = vsub.f32 %v11475_v33, %v11495_v42 }
0x1145   :  { %v11594_v51 = vand.u32 4294901760, %v11593_v5 }
0x1147   :  { %14209 = vmatmul.mubr.f32.vlgmr.msra.gmra.mrb[20].mxu0 %v10486_v61  ;;  %v11595_v21 = vsub.f32 %v11593_v5, %v11594_v51 }
0x1148   :  { %14796 = vmatpush3.bf16.msra.mxu0 %v14793_v56  ;;  %14215 = vmatprep.mubr.f32.mxu0 %v10994_v14 }
0x1149   :  { %14798 = vmatprep.subr.bf16.mxu0 %v14797_v0  ;;  %v11596_v43 = vand.u32 4294901760, %v11595_v21 }
0x114f   :  { %14216 = vmatmul.mubr.f32.vlgmr.msra.gmra.mrb[20].mxu0 %v11004_v12 }
0x1150   :  { %14800 = vmatpush3.bf16.msra.mxu0 %v14797_v0  ;;  %14222 = vmatprep.mubr.f32.mxu0 %v10990_v22  ;;  %v12735_v0 = vld [vmem:[%s16750_s6 + $0x7] ss:$0 sm:$0xff] }
0x1151   :  { %14802 = vmatprep.subr.bf16.mxu0 %v14801_v41 }
0x1157   :  { %14223 = vmatmul.mubr.f32.vlgmr.msra.gmra.mrb[20].mxu0 %v11000_v54 }
0x1158   :  { %14804 = vmatpush3.bf16.msra.mxu0 %v14801_v41  ;;  %14229 = vmatprep.mubr.f32.mxu0 %v10991_v39 }
0x1159   :  { %14806 = vmatprep.subr.bf16.mxu0 %v14793_v56 }
0x115f   :  { %14230 = vmatmul.mubr.f32.vlgmr.msra.gmra.mrb[20].mxu0 %v11001_v53 }
0x1160   :  { %14808 = vmatpush3.bf16.msra.mxu0 %v14793_v56  ;;  %14236 = vmatprep.mubr.f32.mxu0 %v10992_v60 }
0x1161   :  { %14810 = vmatprep.subr.bf16.mxu0 %v14809_v24 }
0x1167   :  { %14237 = vmatmul.mubr.f32.vlgmr.msra.gmra.mrb[20].mxu0 %v11002_v9 }
0x1168   :  { %14812 = vmatpush3.bf16.msra.mxu0 %v14809_v24  ;;  %14243 = vmatprep.mubr.f32.mxu0 %v10990_v22 }
0x1169   :  { %14814 = vmatprep.subr.bf16.mxu0 %v14793_v56 }
0x116f   :  { %14244 = vmatmul.mubr.f32.vlgmr.msra.gmra.mrb[20].mxu0 %v11000_v54 }
0x1170   :  { %14816 = vmatpush3.bf16.msra.mxu0 %v14793_v56  ;;  %14250 = vmatprep.mubr.f32.mxu0 %v10990_v22  ;;  %v11602_v22 = vsub.f32 %v11600_v13, %v11601_v19  ;;  %v14853_v56 = vpack.c.bf16 %v11601_v19, %v11594_v51 }
0x1172   :  { %v11603_v37 = vand.u32 4294901760, %v11602_v22  ;;  %v12170_v22 = vsub.f32 %v12037_v34, %v12064_v40 }
0x1174   :  { %v14829_v39 = vpack.c.bf16 %v11603_v37, %v11596_v43 }
0x1177   :  { %14251 = vmatmul.mubr.f32.vlgmr.msra.gmra.mrb[20].mxu0 %v11000_v54  ;;  %v14837_v54 = vpack.c.bf16 %v11600_v13, %v11593_v5 }
0x124a   :  { %v14252_v44 = vpop.f32.mrb[20].mxu0 }
0x124b   :  { %v11430_v15 = vadd.f32 %v14252_v44, %v12734_v25  ;;  %v11415_v2 = vpop.f32.mrb[21].mxu0 }
0x124c   :  { %v11429_v26 = vadd.f32 %v12734_v25, %v11415_v2 }
0x124d   :  { %v11434_v27 = vadd.f32 %v11430_v15, %v16074_v48 }
0x124e   :  { %v11433_v20 = vadd.f32 %v11429_v26, %v16068_v18  ;;  %v11473_v18 = vld [vmem:[%s16748_s4 + $0x10] sm:$0xff]  ;;  %s12695_s4 = sshll.u32 %s15488_s24, 4  ;;  %s12696_s4 = int_to_ptr.vmem [resolvable:$true] %s12695_s4 }
0x124f   :  { %v11438_v3 = vsel %vm101_vm0, %v11434_v27, 0.0  ;;  %v11489_v35 = vand.u32 4294901760, %v11473_v18  ;;  %s15397_s3 = scalar_lea.vmem %s12696_s4, 512  ;;  %p15402_p5 = scmp.lt.s32.totalorder %s12696_s4, %s12696_s4 }
0x1250   :  { %11439 = vadd.xlane.f32.xlu1 %v11438_v3  ;;  %v11435_v28 = vsel %vm101_vm0, %v11433_v20, 0.0  ;;  %p15398_p4 = scmp.ne.s32.totalorder %s12696_s4, %s15397_s3  ;;  %p15403_p6 = scmp.lt.s32.totalorder %s15397_s3, %s15397_s3 }
0x1251   :  { %11436 = vadd.xlane.f32.xlu0 %v11435_v28  ;;  %v16545_v49 = vpack.c.bf16 %v11492_v36, %v11489_v35  ;;  %v11579_v61 = vsub.f32 %v11473_v18, %v11489_v35  ;;  %v12038_v35 = vld [vmem:[%s16749_s5 + $0x20] sm:$0xff]  ;;  %v12039_v36 = vld [vmem:[%s16749_s5 + $0x28] sm:$0xff] }
0x1252   :  { %v12067_v57 = vand.u32 4294901760, %v12038_v35  ;;  %p15404_p7 = por %p15403_p6, %p15402_p5 }
0x1253   :  { %14818 = vmatprep.subr.bf16.mxu1 %v16545_v49  ;;  %v11580_v6 = vand.u32 4294901760, %v11579_v61  ;;  %v14833_v47 = vpack.c.bf16 %v11586_v62, %v11579_v61  ;;  %v12041_v62 = vld [vmem:[%s16749_s5 + $0x38] sm:$0xff] }
0x1254   :  { %14820 = vmatpush3.bf16.msra.mxu1 %v16545_v49  ;;  %p15405_p8 = pnand %p15404_p7, %p15398_p4 }
0x1255   :  { %14822 = vmatprep.subr.bf16.mxu1 %v16547_v58  ;;  %v11581_v10 = vsub.f32 %v11579_v61, %v11580_v6  ;;  %v14849_v55 = vpack.c.bf16 %v11587_v8, %v11580_v6  ;;  %v12040_v61 = vld [vmem:[%s16749_s5 + $0x30] sm:$0xff] }
0x1256   :  { %v12073_v8 = vand.u32 4294901760, %v12040_v61 }
0x1257   :  { %v11582_v1 = vand.u32 4294901760, %v11581_v10  ;;  %v12076_v10 = vand.u32 4294901760, %v12041_v62 }
0x1258   :  { %14824 = vmatpush3.bf16.msra.mxu1 %v16547_v58 }
0x1259   :  { %v14825_v52 = vpack.c.bf16 %v11589_v45, %v11582_v1  ;;  %v16615_v11 = vpack.c.bf16 %v12076_v10, %v12073_v8 }
0x125b   :  { %14826 = vmatprep.subr.bf16.mxu1 %v14825_v52 }
0x12dd   :  { %v11440_v38 = vpop.xlane.xlu1 %11439 }
0x12de   :  { %v11442_v63 = vmul.f32 0.03125, %v11440_v38  ;;  %v11437_v16 = vpop.xlane.xlu0 %11436 }
0x12df   :  { %v11441_v29 = vmul.f32 0.03125, %v11437_v16 }
0x12e0   :  { %v11444_v30 = vsub.f32 %v11434_v27, %v11442_v63 }
0x12e1   :  { %v11443_v31 = vsub.f32 %v11433_v20, %v11441_v29 }
0x12e2   :  { %v11446_v32 = vmul.f32 %v11444_v30, %v11444_v30 }
0x12e3   :  { %v11445_v46 = vmul.f32 %v11443_v31, %v11443_v31 }
0x12e4   :  { %v11450_v48 = vsel %vm101_vm0, %v11446_v32, 0.0  ;;  %v12036_v32 = vld [vmem:[%s16749_s5 + $0x10] sm:$0xff] }
0x12e5   :  { %v11447_v17 = vsel %vm101_vm0, %v11445_v46, 0.0  ;;  %v12034_v46 = vld [vmem:[%s16749_s5] sm:$0xff]  ;;  %v12061_v33 = vand.u32 4294901760, %v12036_v32 }
0x12e6   :  { %11448 = vadd.xlane.f32.xlu0 %v11447_v17  ;;  %v12035_v17 = vld [vmem:[%s16749_s5 + $0x8] sm:$0xff] }
0x12e7   :  { %v12058_v18 = vand.u32 4294901760, %v12035_v17  ;;  %v12163_v21 = vsub.f32 %v12036_v32, %v12061_v33  ;;  %v12737_v32 = vld [vmem:[%s16750_s6 + $0xb] ss:$0 sm:$0xff] }
0x12e9   :  { %v12156_v13 = vsub.f32 %v12035_v17, %v12058_v18 }
0x12ea   :  { %11451 = vadd.xlane.f32.xlu0 %v11450_v48  ;;  %v12055_v48 = vand.u32 4294901760, %v12034_v46 }
0x12eb   :  { %v12157_v45 = vand.u32 4294901760, %v12156_v13 }
0x12ec   :  { %v16593_v42 = vpack.c.bf16 %v12058_v18, %v12055_v48  ;;  %v12149_v5 = vsub.f32 %v12034_v46, %v12055_v48 }
0x12ee   :  { %14914 = vmatprep.subr.bf16.mxu0 %v16593_v42  ;;  %v12150_v1 = vand.u32 4294901760, %v12149_v5 }
0x12ef   :  { %14916 = vmatpush3.bf16.msra.mxu0 %v16593_v42 }
0x12f0   :  { %v16623_v51 = vpack.c.bf16 %v12157_v45, %v12150_v1  ;;  %v12151_v19 = vsub.f32 %v12149_v5, %v12150_v1 }
0x12f2   :  { %v12152_v43 = vand.u32 4294901760, %v12151_v19 }
0x1373   :  { %v11449_v59 = vpop.xlane.xlu0 %11448 }
0x1374   :  { %v11453_v60 = vmul.f32 0.03125, %v11449_v59 }
0x1376   :  { %v11455_v53 = vadd.f32 1e-06, %v11453_v60 }
0x1377   :  { %v11452_v4 = vpop.xlane.xlu0 %11451 }
0x1378   :  { %15291 = vrsqrt.f32 %v11455_v53  ;;  %v11454_v7 = vmul.f32 0.03125, %v11452_v4 }
0x137a   :  { %v11456_v50 = vadd.f32 1e-06, %v11454_v7 }
0x137c   :  { %15293 = vrsqrt.f32 %v11456_v50 }
0x1382   :  { %v15292_v9 = vpop.eup %15291 }
0x1383   :  { %v11459_v14 = vmul.f32 %v15292_v9, %v11443_v31 }
0x1385   :  { %v11465_v12 = vmul.f32 %v12735_v0, %v11459_v14 }
0x1386   :  { %v15294_v41 = vpop.eup %15293 }
0x1387   :  { %v11460_v24 = vmul.f32 %v15294_v41, %v11444_v30  ;;  %v16559_v25 = vadd.f32 %v12736_v23, %v11465_v12  ;;  %v12191_v12 = vsub.f32 %v12040_v61, %v12073_v8 }
0x1389   :  { %v11466_v44 = vmul.f32 %v12735_v0, %v11460_v24  ;;  %v11483_v15 = vsel %vm101_vm0, %v16559_v25, 0  ;;  %v12198_v24 = vsub.f32 %v12041_v62, %v12076_v10 }
0x138a   :  { %v11557_v2 = vand.u32 4294901760, %v11483_v15 }
0x138b   :  { %v16563_v26 = vadd.f32 %v12736_v23, %v11466_v44  ;;  %v16647_v17 = vpack.c.bf16 %v12198_v24, %v12191_v12 }
0x138c   :  { %v11558_v27 = vsub.f32 %v11483_v15, %v11557_v2 }
0x138d   :  { %v11486_v20 = vsel %vm101_vm0, %v16563_v26, 0 }
0x138e   :  { %v11559_v3 = vand.u32 4294901760, %v11558_v27  ;;  %v11567_v28 = vand.u32 4294901760, %v11486_v20 }
0x1390   :  { %v11560_v38 = vsub.f32 %v11558_v27, %v11559_v3  ;;  %v11568_v63 = vsub.f32 %v11486_v20, %v11567_v28 }
0x1392   :  { %v11561_v16 = vand.u32 4294901760, %v11560_v38  ;;  %v11569_v29 = vand.u32 4294901760, %v11568_v63 }
0x1394   :  { %14261 = vmatprep.mubr.f32.mxu1 %v11561_v16  ;;  %v11570_v30 = vsub.f32 %v11568_v63, %v11569_v29 }
0x1396   :  { %v11571_v31 = vand.u32 4294901760, %v11570_v30  ;;  %v16641_v30 = vpack.c.bf16 %v12156_v13, %v12149_v5 }
0x1398   :  { %14262 = vmatmul.mubr.f32.vlgmr.msra.gmra.mrb[22].mxu1 %v11571_v31  ;;  %v16643_v31 = vpack.c.bf16 %v12170_v22, %v12163_v21 }
0x1399   :  { %14828 = vmatpush3.bf16.msra.mxu1 %v14825_v52  ;;  %14272 = vmatprep.mubr.f32.mxu1 %v11557_v2  ;;  %v12158_v52 = vsub.f32 %v12156_v13, %v12157_v45 }
0x139a   :  { %14830 = vmatprep.subr.bf16.mxu1 %v14829_v39 }
0x139b   :  { %v12159_v37 = vand.u32 4294901760, %v12158_v52 }
0x139d   :  { %14832 = vmatpush3.bf16.msra.mxu1 %v14829_v39  ;;  %v12164_v39 = vand.u32 4294901760, %v12163_v21 }
0x139e   :  { %14834 = vmatprep.subr.bf16.mxu1 %v14833_v47 }
0x13a0   :  { %14273 = vmatmul.mubr.f32.vlgmr.msra.gmra.mrb[22].mxu1 %v11567_v28 }
0x13a1   :  { %14836 = vmatpush3.bf16.msra.mxu1 %v14833_v47  ;;  %14283 = vmatprep.mubr.f32.mxu1 %v11558_v27  ;;  %v12171_v47 = vand.u32 4294901760, %v12170_v22  ;;  %v12199_v27 = vand.u32 4294901760, %v12198_v24 }
0x13a2   :  { %14838 = vmatprep.subr.bf16.mxu1 %v14837_v54 }
0x13a3   :  { %v16628_v60 = vpack.c.bf16 %v12171_v47, %v12164_v39  ;;  %v12172_v53 = vsub.f32 %v12170_v22, %v12171_v47  ;;  %v12200_v38 = vsub.f32 %v12198_v24, %v12199_v27 }
0x13a5   :  { %14840 = vmatpush3.bf16.msra.mxu1 %v14837_v54  ;;  %v16626_v54 = vpack.c.bf16 %v12159_v37, %v12152_v43  ;;  %v12173_v9 = vand.u32 4294901760, %v12172_v53  ;;  %v12201_v16 = vand.u32 4294901760, %v12200_v38 }
0x13a6   :  { %14842 = vmatprep.subr.bf16.mxu1 %v16545_v49 }
0x13a8   :  { %14284 = vmatmul.mubr.f32.vlgmr.msra.gmra.mrb[22].mxu1 %v11568_v63 }
0x13a9   :  { %14844 = vmatpush3.bf16.msra.mxu1 %v16545_v49  ;;  %14294 = vmatprep.mubr.f32.mxu1 %v11559_v3 }
0x13aa   :  { %14846 = vmatprep.subr.bf16.mxu1 %v16547_v58 }
0x13ad   :  { %14848 = vmatpush3.bf16.msra.mxu1 %v16547_v58 }
0x13ae   :  { %14850 = vmatprep.subr.bf16.mxu1 %v14849_v55 }
0x13b0   :  { %14295 = vmatmul.mubr.f32.vlgmr.msra.gmra.mrb[22].mxu1 %v11569_v29 }
0x13b1   :  { %14852 = vmatpush3.bf16.msra.mxu1 %v14849_v55  ;;  %14305 = vmatprep.mubr.f32.mxu1 %v11557_v2  ;;  %v12165_v55 = vsub.f32 %v12163_v21, %v12164_v39 }
0x13b2   :  { %14854 = vmatprep.subr.bf16.mxu1 %v14853_v56 }
0x13b3   :  { %v12166_v4 = vand.u32 4294901760, %v12165_v55 }
0x13b5   :  { %14856 = vmatpush3.bf16.msra.mxu1 %v14853_v56  ;;  %v12177_v56 = vsub.f32 %v12038_v35, %v12067_v57  ;;  %v16633_v41 = vpack.c.bf16 %v12173_v9, %v12166_v4 }
0x13b6   :  { %14858 = vmatprep.subr.bf16.mxu1 %v16545_v49 }
0x13b7   :  { %v12178_v7 = vand.u32 4294901760, %v12177_v56 }
0x13b8   :  { %14306 = vmatmul.mubr.f32.vlgmr.msra.gmra.mrb[22].mxu1 %v11567_v28 }
0x13b9   :  { %14860 = vmatpush3.bf16.msra.mxu1 %v16545_v49  ;;  %14316 = vmatprep.mubr.f32.mxu1 %v11557_v2  ;;  %v12070_v49 = vand.u32 4294901760, %v12039_v36  ;;  %v12179_v14 = vsub.f32 %v12177_v56, %v12178_v7  ;;  %v12192_v2 = vand.u32 4294901760, %v12191_v12 }
0x13ba   :  { %14862 = vmatprep.subr.bf16.mxu1 %v16547_v58 }
0x13bb   :  { %v16609_v6 = vpack.c.bf16 %v12070_v49, %v12067_v57  ;;  %v12184_v59 = vsub.f32 %v12039_v36, %v12070_v49  ;;  %v12180_v44 = vand.u32 4294901760, %v12179_v14  ;;  %v12193_v3 = vsub.f32 %v12191_v12, %v12192_v2 }
0x13bd   :  { %14864 = vmatpush3.bf16.msra.mxu1 %v16547_v58  ;;  %v16595_v58 = vpack.c.bf16 %v12064_v40, %v12061_v33  ;;  %v12185_v50 = vand.u32 4294901760, %v12184_v59  ;;  %v12194_v63 = vand.u32 4294901760, %v12193_v3  ;;  %v16645_v46 = vpack.c.bf16 %v12184_v59, %v12177_v56 }
0x13be   :  { %14866 = vmatprep.subr.bf16.mxu1 %v16593_v42 }
0x13bf   :  { %14918 = vmatprep.subr.bf16.mxu0 %v16595_v58  ;;  %v16631_v0 = vpack.c.bf16 %v12185_v50, %v12178_v7  ;;  %v12186_v23 = vsub.f32 %v12184_v59, %v12185_v50  ;;  %v16639_v29 = vpack.c.bf16 %v12201_v16, %v12194_v63 }
0x13c0   :  { %14317 = vmatmul.mubr.f32.vlgmr.msra.gmra.mrb[22].mxu1 %v11567_v28  ;;  %14920 = vmatpush3.bf16.msra.mxu0 %v16595_v58  ;;  %v16637_v28 = vpack.c.bf16 %v12199_v27, %v12192_v2 }
0x13c1   :  { %14868 = vmatpush3.bf16.msra.mxu1 %v16593_v42  ;;  %14922 = vmatprep.subr.bf16.mxu0 %v16609_v6  ;;  %v12187_v15 = vand.u32 4294901760, %v12186_v23 }
0x13c2   :  { %14870 = vmatprep.subr.bf16.mxu1 %v16595_v58 }
0x13c3   :  { %v16635_v20 = vpack.c.bf16 %v12187_v15, %v12180_v44 }
0x13c4   :  { %14924 = vmatpush3.bf16.msra.mxu0 %v16609_v6 }
0x13c5   :  { %14872 = vmatpush3.bf16.msra.mxu1 %v16595_v58  ;;  %14926 = vmatprep.subr.bf16.mxu0 %v16615_v11 }
0x13c6   :  { %14874 = vmatprep.subr.bf16.mxu1 %v16609_v6 }
0x13c8   :  { %14928 = vmatpush3.bf16.msra.mxu0 %v16615_v11 }
0x13c9   :  { %14876 = vmatpush3.bf16.msra.mxu1 %v16609_v6  ;;  %14930 = vmatprep.subr.bf16.mxu0 %v16623_v51 }
0x13ca   :  { %14878 = vmatprep.subr.bf16.mxu1 %v16615_v11 }
0x13cd   :  { %14880 = vmatpush3.bf16.msra.mxu1 %v16615_v11 }
0x13ce   :  { %14882 = vmatprep.subr.bf16.mxu1 %v16626_v54 }
0x1493   :  { %v14318_v48 = vpop.f32.mrb[22].mxu1 }
0x1494   :  { %v14969_v18 = vadd.f32 %v14318_v48, %v12737_v32  ;;  %v12006_v34 = vpop.f32.mrb[23].mxu1 }
0x1495   :  { %v14970_v33 = vadd.f32 %v12737_v32, %v12006_v34 }
0x1496   :  { %v12019_v35 = vmul.f32 0.044715, %v14969_v18  ;;  %v12017_v45 = vmul.f32 0.5, %v14969_v18 }
0x1497   :  { %v12018_v36 = vmul.f32 0.044715, %v14970_v33  ;;  %v12016_v52 = vmul.f32 0.5, %v14970_v33 }
0x1498   :  { %v12021_v40 = vmul.f32 %v14969_v18, %v12019_v35 }
0x1499   :  { %v12020_v57 = vmul.f32 %v14970_v33, %v12018_v36 }
0x149a   :  { %v12023_v49 = vmul.f32 %v14969_v18, %v12021_v40 }
0x149b   :  { %v12022_v61 = vmul.f32 %v14970_v33, %v12020_v57 }
0x149c   :  { %v12025_v62 = vadd.f32 %v14969_v18, %v12023_v49 }
0x149d   :  { %v12024_v8 = vadd.f32 %v14970_v33, %v12022_v61 }
0x149e   :  { %v12027_v10 = vmul.f32 0.7978846, %v12025_v62 }
0x149f   :  { %v12026_v5 = vmul.f32 0.7978846, %v12024_v8 }
0x14a0   :  { %15295 = vtanh.f32 %v12027_v10 }
0x14a1   :  { %15297 = vtanh.f32 %v12026_v5 }
0x14aa   :  { %v15296_v13 = vpop.eup %15295 }
0x14ab   :  { %v15298_v1 = vpop.eup %15297  ;;  %v12031_v19 = vadd.f32 1.0, %v15296_v13 }
0x14ac   :  { %v12030_v21 = vadd.f32 1.0, %v15298_v1 }
0x14ad   :  { %v12033_v22 = vmul.f32 %v12031_v19, %v12017_v45 }
0x14ae   :  { %v12032_v43 = vmul.f32 %v12030_v21, %v12016_v52 }
0x14af   :  { %v12052_v37 = vsel %vm12047_vm8, %v12033_v22, 0 }
0x14b0   :  { %v12049_v39 = vsel %vm12047_vm8, %v12032_v43, 0  ;;  %v12137_v47 = vand.u32 4294901760, %v12052_v37 }
0x14b1   :  { %v12127_v55 = vand.u32 4294901760, %v12049_v39 }
0x14b2   :  { %v12138_v56 = vsub.f32 %v12052_v37, %v12137_v47 }
0x14b3   :  { %v12128_v59 = vsub.f32 %v12049_v39, %v12127_v55 }
0x14b4   :  { %v12139_v53 = vand.u32 4294901760, %v12138_v56 }
0x14b5   :  { %v12129_v4 = vand.u32 4294901760, %v12128_v59 }
0x14b6   :  { %v12140_v7 = vsub.f32 %v12138_v56, %v12139_v53 }
0x14b7   :  { %14392 = vmatprep.mubr.f32.mxu0 %v12129_v4  ;;  %v12130_v50 = vsub.f32 %v12128_v59, %v12129_v4 }
0x14b8   :  { %14393 = vmatmul.mubr.f32.vlgmr.msra.gmra.mrb[22].mxu0 %v12139_v53  ;;  %v12141_v14 = vand.u32 4294901760, %v12140_v7 }
0x14b9   :  { %14932 = vmatpush3.bf16.msra.mxu0 %v16623_v51  ;;  %14411 = vmatprep.mubr.f32.mxu0 %v12127_v55  ;;  %v12131_v9 = vand.u32 4294901760, %v12130_v50 }
0x14ba   :  { %14934 = vmatprep.subr.bf16.mxu0 %v16628_v60 }
0x14bb   :  { %14335 = vmatprep.mubr.f32.mxu1 %v12131_v9 }
0x14bc   :  { %14336 = vmatmul.mubr.f32.vlgmr.msra.gmra.mrb[24].mxu1 %v12141_v14 }
0x14bd   :  { %14884 = vmatpush3.bf16.msra.mxu1 %v16626_v54  ;;  %14936 = vmatpush3.bf16.msra.mxu0 %v16628_v60 }
0x14be   :  { %14354 = vmatprep.mubr.f32.mxu1 %v12127_v55  ;;  %14886 = vmatprep.subr.bf16.mxu1 %v16633_v41 }
0x14bf   :  { %14938 = vmatprep.subr.bf16.mxu0 %v16631_v0 }
0x14c1   :  { %14888 = vmatpush3.bf16.msra.mxu1 %v16633_v41  ;;  %14940 = vmatpush3.bf16.msra.mxu0 %v16631_v0 }
0x14c2   :  { %14890 = vmatprep.subr.bf16.mxu1 %v16635_v20  ;;  %14942 = vmatprep.subr.bf16.mxu0 %v16637_v28 }
0x14c5   :  { %14892 = vmatpush3.bf16.msra.mxu1 %v16635_v20  ;;  %14944 = vmatpush3.bf16.msra.mxu0 %v16637_v28 }
0x14c6   :  { %14894 = vmatprep.subr.bf16.mxu1 %v16639_v29  ;;  %14946 = vmatprep.subr.bf16.mxu0 %v16593_v42 }
0x14c8   :  { %14412 = vmatmul.mubr.f32.vlgmr.msra.gmra.mrb[22].mxu0 %v12137_v47 }
0x14c9   :  { %14896 = vmatpush3.bf16.msra.mxu1 %v16639_v29  ;;  %14948 = vmatpush3.bf16.msra.mxu0 %v16593_v42 }
0x14ca   :  { %14430 = vmatprep.mubr.f32.mxu0 %v12127_v55  ;;  %14898 = vmatprep.subr.bf16.mxu1 %v16641_v30 }
0x14cb   :  { %14950 = vmatprep.subr.bf16.mxu0 %v16595_v58 }
0x14cc   :  { %14355 = vmatmul.mubr.f32.vlgmr.msra.gmra.mrb[24].mxu1 %v12137_v47 }
0x14cd   :  { %14900 = vmatpush3.bf16.msra.mxu1 %v16641_v30  ;;  %14373 = vmatprep.mubr.f32.mxu1 %v12128_v59 }
0x14ce   :  { %14952 = vmatpush3.bf16.msra.mxu0 %v16595_v58  ;;  %14902 = vmatprep.subr.bf16.mxu1 %v16643_v31 }
0x14cf   :  { %14954 = vmatprep.subr.bf16.mxu0 %v16609_v6 }
0x14d1   :  { %14904 = vmatpush3.bf16.msra.mxu1 %v16643_v31 }
0x14d2   :  { %14956 = vmatpush3.bf16.msra.mxu0 %v16609_v6  ;;  %14906 = vmatprep.subr.bf16.mxu1 %v16645_v46  ;;  %v12738_v6 = vld [vmem:[%s16750_s6 + $0xc] ss:$0 sm:$0xff] }
0x14d3   :  { %14958 = vmatprep.subr.bf16.mxu0 %v16615_v11 }
0x14d5   :  { %14908 = vmatpush3.bf16.msra.mxu1 %v16645_v46 }
0x14d6   :  { %14960 = vmatpush3.bf16.msra.mxu0 %v16615_v11  ;;  %14910 = vmatprep.subr.bf16.mxu1 %v16647_v17 }
0x14d9   :  { %14431 = vmatmul.mubr.f32.vlgmr.msra.gmra.mrb[22].mxu0 %v12137_v47  ;;  %14912 = vmatpush3.bf16.msra.mxu1 %v16647_v17 }
0x14dc   :  { %14374 = vmatmul.mubr.f32.vlgmr.msra.gmra.mrb[24].mxu1 %v12138_v56 }
0x15ac   :  { %v14432_v42 = vpop.f32.mrb[22].mxu0 }
0x15ad   :  { %v12624_v58 = vpop.f32.mrb[23].mxu0 }
0x15af   :  { %v14375_v51 = vpop.f32.mrb[24].mxu1 }
0x15b0   :  { %v14971_v54 = vadd.f32 %v14375_v51, %v12738_v6  ;;  %v12348_v60 = vpop.f32.mrb[25].mxu1 }
0x15b1   :  { %v14973_v0 = vadd.f32 %v12738_v6, %v12348_v60 }
0x15b2   :  { %v14972_v23 = vadd.f32 %v14971_v54, %v14432_v42 }
0x15b3   :  { %v14974_v12 = vadd.f32 %v14973_v0, %v12624_v58 }
0x15b4   :  { %v12637_v11 = vadd.f32 %v14972_v23, %v16563_v26 }
0x15b5   :  { %v12636_v41 = vadd.f32 %v14974_v12, %v16559_v25 }
0x15b6   :  { %v12641_v24 = vsel %vm101_vm0, %v12637_v11, 0.0 }
0x15b7   :  { %12642 = vadd.xlane.f32.xlu0 %v12641_v24  ;;  %v12638_v44 = vsel %vm101_vm0, %v12636_v41, 0.0 }
0x15b8   :  { %12639 = vadd.xlane.f32.xlu1 %v12638_v44 }
0x1644   :  { %v12643_v15 = vpop.xlane.xlu0 %12642 }
0x1645   :  { %v12645_v2 = vmul.f32 0.03125, %v12643_v15  ;;  %v12640_v27 = vpop.xlane.xlu1 %12639 }
0x1646   :  { %v12644_v20 = vmul.f32 0.03125, %v12640_v27 }
0x1647   :  { %v12647_v3 = vsub.f32 %v12637_v11, %v12645_v2 }
0x1648   :  { %v12646_v28 = vsub.f32 %v12636_v41, %v12644_v20 }
0x1649   :  { %v12649_v38 = vmul.f32 %v12647_v3, %v12647_v3 }
0x164a   :  { %v12648_v63 = vmul.f32 %v12646_v28, %v12646_v28 }
0x164b   :  { %v12653_v16 = vsel %vm101_vm0, %v12649_v38, 0.0 }
0x164c   :  { %12654 = vadd.xlane.f32.xlu0 %v12653_v16  ;;  %v12650_v26 = vsel %vm101_vm0, %v12648_v63, 0.0 }
0x164d   :  { %12651 = vadd.xlane.f32.xlu1 %v12650_v26 }
0x164e   :  { %15408 = shalt.err (!%p15405_p8)
}
0x164f   :  { %s15409_s26 = scalar_lea.hbm %s16752_s8, 512 }
0x1650   :  { %p15410_p9 = scmp.ne.s32.totalorder %s16752_s8, %s15409_s26  ;;  %p15413_p10 = scmp.lt.u32.totalorder %s15409_s26, %s16752_s8 }
0x1652   :  { %p15415_p11 = pnand %p15413_p10, %p15410_p9 }
0x1654   :  { %15418 = shalt.err (!%p15415_p11)
}
0x1655   :  { %12701 = dma.vmem_to_hbm [thread:$0]  %s12696_s4, 512, %s16752_s8, [#allocation12], %s15475_s21, %s15475_s21, %s15476_s22  }
0x1656   :  { %s15489_s1 = smov [#allocation13]  }
0x1657   :  { %s12707_s10 = sshll.u32 %s15489_s1, 4  ;;  %s12708_s10 = int_to_ptr.vmem [resolvable:$true] %s12707_s10 }
0x1658   :  { %s15419_s27 = scalar_lea.vmem %s12708_s10, 512  ;;  %p15424_p13 = scmp.lt.s32.totalorder %s12708_s10, %s12708_s10 }
0x1659   :  { %p15420_p12 = scmp.ne.s32.totalorder %s12708_s10, %s15419_s27  ;;  %p15425_p0 = scmp.lt.s32.totalorder %s15419_s27, %s15419_s27 }
0x165b   :  { %p15426_p1 = por %p15425_p0, %p15424_p13 }
0x165d   :  { %p15427_p2 = pnand %p15426_p1, %p15420_p12 }
0x165f   :  { %15430 = shalt.err (!%p15427_p2)
}
0x1660   :  { %s15431_s2 = scalar_lea.hbm %s16753_s9, 512 }
0x1661   :  { %p15432_p3 = scmp.ne.s32.totalorder %s16753_s9, %s15431_s2  ;;  %p15435_p4 = scmp.lt.u32.totalorder %s15431_s2, %s16753_s9 }
0x1663   :  { %p15437_p5 = pnand %p15435_p4, %p15432_p3 }
0x1665   :  { %15440 = shalt.err (!%p15437_p5)
}
0x1666   :  { %12713 = dma.vmem_to_hbm [thread:$0]  %s12708_s10, 512, %s16753_s9, [#allocation12], %s15475_s21, %s15475_s21, %s15476_s22  }
0x1667   :  { %v12739_v48 = vld [vmem:[%s16750_s6 + $0x9] ss:$0 sm:$0xff]  ;;  %v12740_v35 = vld [vmem:[%s16750_s6 + $0xa] ss:$0 sm:$0xff]  ;;  %s15490_s9 = smov [#allocation10]  }
0x1668   :  { %s12683_s3 = sshll.u32 %s15490_s9, 4  ;;  %s12684_s3 = int_to_ptr.vmem [resolvable:$true] %s12683_s3 }
0x1669   :  { %s15441_s17 = scalar_lea.vmem %s12684_s3, 256  ;;  %p15446_p7 = scmp.lt.s32.totalorder %s12684_s3, %s12684_s3 }
0x166a   :  { %p15442_p6 = scmp.ne.s32.totalorder %s12684_s3, %s15441_s17  ;;  %p15447_p8 = scmp.lt.s32.totalorder %s15441_s17, %s15441_s17 }
0x166c   :  { %p15448_p9 = por %p15447_p8, %p15446_p7 }
0x166e   :  { %p15449_p10 = pnand %p15448_p9, %p15442_p6 }
0x16d9   :  { %v12655_v25 = vpop.xlane.xlu0 %12654 }
0x16da   :  { %v12657_v29 = vmul.f32 0.03125, %v12655_v25  ;;  %v12652_v30 = vpop.xlane.xlu1 %12651 }
0x16db   :  { %v12656_v31 = vmul.f32 0.03125, %v12652_v30 }
0x16dc   :  { %v12659_v46 = vadd.f32 1e-06, %v12657_v29 }
0x16dd   :  { %v12658_v17 = vadd.f32 1e-06, %v12656_v31 }
0x16de   :  { %15299 = vrsqrt.f32 %v12659_v46 }
0x16df   :  { %15301 = vrsqrt.f32 %v12658_v17 }
0x16e8   :  { %v15300_v32 = vpop.eup %15299 }
0x16e9   :  { %v15302_v18 = vpop.eup %15301  ;;  %v12663_v34 = vmul.f32 %v15300_v32, %v12647_v3 }
0x16ea   :  { %v12662_v33 = vmul.f32 %v15302_v18, %v12646_v28 }
0x16eb   :  { %v12669_v36 = vmul.f32 %v12739_v48, %v12663_v34 }
0x16ec   :  { %v12668_v40 = vmul.f32 %v12739_v48, %v12662_v33 }
0x16ed   :  { %v12675_v57 = vadd.f32 %v12740_v35, %v12669_v36 }
0x16ee   :  { %v12674_v49 = vadd.f32 %v12740_v35, %v12668_v40 }
0x16ef   :  { %12677 = vst.msk [vmem:[#allocation10 + $0x8] sm:$0xff] %vm101_vm0, %v12675_v57 }
0x16f0   :  { %12676 = vst.msk [vmem:[#allocation10] sm:$0xff] %vm101_vm0, %v12674_v49 }
0x16f1   :  { %15452 = shalt.err (!%p15449_p10)
}
0x16f2   :  { %s15453_s26 = scalar_lea.hbm %s16751_s7, 256 }
0x16f3   :  { %p15454_p11 = scmp.ne.s32.totalorder %s16751_s7, %s15453_s26  ;;  %p15457_p12 = scmp.lt.u32.totalorder %s15453_s26, %s16751_s7 }
0x16f5   :  { %p15459_p13 = pnand %p15457_p12, %p15454_p11 }
0x16f7   :  { %15462 = shalt.err (!%p15459_p13)
}
0x16f8   :  { %12689 = dma.vmem_to_hbm [thread:$0]  %s12684_s3, 256, %s16751_s7, [#allocation4], %s15475_s21, %s15475_s21, %s15476_s22  }
0x16f9   :  { %15469 = dma.done.wait [#allocation4], 256  }
0x16fa   :  { %15470 = vsyncadd [#allocation4], 4294967040 }
0x16fb   :  { %15471 = dma.done.wait [#allocation12], 1024  }
0x16fc   :  { %15472 = vsyncadd [#allocation12], 4294966272 }
0x16fd   :  { %12723 = vsyncpa [#allocation3], 1 }
0x16fe   :  { %12724 = vsyncpa [#allocation6], 1 }
0x16ff   :  { %12725 = vsyncpa [#allocation9], 1 }
0x1700   :  { %12726 = vsyncpa [#allocation4], 1 }
0x1701   :  { %12727 = vsyncpa [#allocation12], 1 }

</bundles_post_ra>
